<compile_context>
chip_gen: v6e
topology: v6e:2x2x1
jax: 0.10.0
libtpu: 0.0.40
codegen_flags: <defaults>
</compile_context>

<pallas_src>
import functools
import math

import jax
import jax.numpy as jnp
from jax import lax
from jax.experimental import pallas as pl
from jax.experimental.pallas import tpu as pltpu
import numpy as np

LANE = 128     # lane width: channel axes padded to a multiple of this
SUBLANE = 8    # sublane width: spatial W axes padded to a multiple of this


def _round_up(x, m):
    return ((x + m - 1) // m) * m


# ----------------------------------------------------------------------------
# In-kernel helper: 3x3 conv + bias + ReLU over the width-padded slab layout.
# ----------------------------------------------------------------------------
def _conv3x3_relu(slab_fn, w_ref, b_ref, *, H, Wp, cin, cout, col_offset):
    """`slab_fn(ki)` returns the (H, Wp, cin) bf16 row slab (rows ki..ki+H-1 of
    the 1-pixel-padded input).  Per ki: one MXU dot against the three kj weight
    blocks concatenated along N; the kj column shift is applied to the f32 dot
    result with an XLU sublane rotation.  Column w' of the returned
    (H*Wp, cout) f32 array holds the conv output at spatial column
    (w' - col_offset); other columns are garbage (caller masks / slices them)."""
    rows = H * Wp
    acc = jnp.zeros((rows, cout), jnp.float32)
    for ki in range(3):
        flat = slab_fn(ki).reshape(rows, cin)                    # stride-free flatten
        res = jnp.dot(flat, w_ref[ki * cin:(ki + 1) * cin, :],   # (rows, 3*cout)
                      preferred_element_type=jnp.float32)
        for kj in range(3):
            chunk = res[:, kj * cout:(kj + 1) * cout]            # lane-aligned slice
            shift = (col_offset - kj) % rows
            if shift:
                chunk = pltpu.roll(chunk, shift=shift, axis=0)   # XLU sublane rotate
            acc = acc + chunk
    return jnp.maximum(acc + b_ref[...], 0.0)                    # (rows, cout) f32


# ----------------------------------------------------------------------------
# Fused DoubleConv kernel (one grid step = one image)
# ----------------------------------------------------------------------------
def _double_conv_kernel(x_ref, w1_ref, b1_ref, w2_ref, b2_ref, o_ref, y1p_ref,
                        *, H, W, Wp, Wo, C1, C2, C3):
    # ---- conv1 + ReLU (input already bf16).  The result is positioned at
    #      column offset 1 so the scratch store below is fully aligned. ----
    y1 = _conv3x3_relu(lambda ki: x_ref[ki:ki + H, :, :], w1_ref, b1_ref,
                       H=H, Wp=Wp, cin=C1, cout=C2, col_offset=1)

    # Zero the halo / right-pad columns (valid data lives in columns [1, W]) with
    # a vectorized select instead of a full-scratch zero or masked column stores.
    col = lax.broadcasted_iota(jnp.int32, (H, Wp, C2), 1)
    y1 = jnp.where((col >= 1) & (col <= W),
                   y1.reshape(H, Wp, C2), 0.0).astype(jnp.bfloat16)

    # Stage conv1's output (bf16) in VMEM scratch: zero ONLY the two halo rows;
    # the interior is fully overwritten by one aligned full-width store.
    y1p_ref[0:1, :, :] = jnp.zeros((1, Wp, C2), jnp.bfloat16)
    y1p_ref[H + 1:H + 2, :, :] = jnp.zeros((1, Wp, C2), jnp.bfloat16)
    y1p_ref[1:1 + H, :, :] = y1

    # ---- conv2 + ReLU, reading row slabs from the VMEM-resident intermediate. ----
    y2 = _conv3x3_relu(lambda ki: y1p_ref[ki:ki + H, :, :], w2_ref, b2_ref,
                       H=H, Wp=Wp, cin=C2, cout=C3, col_offset=0)

    # Valid output columns are a sublane-aligned prefix -> unmasked, lane-dense store.
    o_ref[...] = y2.reshape(H, Wp, C3)[:, :Wo, :].astype(o_ref.dtype)


# ----------------------------------------------------------------------------
# Weight / bias packing (layout plumbing, traced once under jit)
# ----------------------------------------------------------------------------
def _pack_w(w, cin_p, cout_p):
    """(Cout, Cin, 3, 3) OIHW -> (3*cin_p, 3*cout_p) bf16.  Row block = tap row ki,
    column block = tap col kj, so the kernel issues one K=cin_p, N=3*cout_p dot per
    tap row and slices the kj chunks from the lane-aligned result."""
    cout, cin = w.shape[0], w.shape[1]
    wt = jnp.transpose(w, (2, 3, 1, 0))                                   # (3,3,cin,cout)
    wt = jnp.pad(wt, ((0, 0), (0, 0), (0, cin_p - cin), (0, cout_p - cout)))
    wt = jnp.transpose(wt, (0, 2, 1, 3)).reshape(3 * cin_p, 3 * cout_p)
    return wt.astype(jnp.bfloat16)


def _pack_b(b, cout_p):
    # Zero padding of the bias (and weights) keeps the padded output channels at
    # exactly 0 through the ReLU epilogue -- required for correctness of slicing.
    return jnp.pad(b, (0, cout_p - b.shape[0])).astype(jnp.float32)[None, :]


# ----------------------------------------------------------------------------
# Host-side wrapper (NCHW torch-compat; the kernel path is NHWC bf16)
# ----------------------------------------------------------------------------
def double_conv_forward(x_nchw, params):
    """DoubleConv forward: x (N, Cin, H, W) -> (N, Cout, H, W), float32."""
    w1, b1 = params["c1_w"], params["c1_b"]      # (Cout, Cin, 3, 3), (Cout,)
    w2, b2 = params["c2_w"], params["c2_b"]      # (Cout, Cout, 3, 3), (Cout,)
    N, C1, H, W = x_nchw.shape
    C2, C3 = w1.shape[0], w2.shape[0]
    C1p, C2p, C3p = (_round_up(c, LANE) for c in (C1, C2, C3))
    Hp2 = H + 2
    Wp = _round_up(W + 2, SUBLANE)   # sublane-aligned padded width (1-px halo + pad)
    Wo = _round_up(W, SUBLANE)       # sublane-aligned output width

    # NCHW<->NHWC transposes are torch-compat only; a real UNet keeps bf16 NHWC.
    x = jnp.transpose(x_nchw, (0, 2, 3, 1)).astype(jnp.bfloat16)
    xp = jnp.pad(x, ((0, 0), (1, 1), (1, Wp - W - 1), (0, C1p - C1)))

    w1p, b1p = _pack_w(w1, C1p, C2p), _pack_b(b1, C2p)
    w2p, b2p = _pack_w(w2, C2p, C3p), _pack_b(b2, C3p)

    kernel = functools.partial(_double_conv_kernel, H=H, W=W, Wp=Wp, Wo=Wo,
                               C1=C1p, C2=C2p, C3=C3p)

    # VMEM budget from actual block sizes (double-buffered ins/outs) + scratch
    # + in-kernel f32 temporaries, with headroom; clamped to a sane range.
    blk_in = Hp2 * Wp * C1p * 2
    blk_out = H * Wo * C3p * 2
    blk_w = (9 * C1p * C2p + 9 * C2p * C3p) * 2
    scratch_b = Hp2 * Wp * C2p * 2
    temps = H * Wp * 4 * (4 * C2p + 4 * C3p)
    vmem_needed = 2 * (blk_in + blk_out + blk_w) + scratch_b + temps + (4 << 20)
    vmem_limit = int(min(max(vmem_needed, 32 << 20), 100 << 20))

    flops = 2 * N * H * Wp * 9 * (C1p * C2p + C2p * C3p)
    bytes_accessed = (N * Hp2 * Wp * C1p * 2          # input (bf16)
                      + blk_w                          # weights (bf16)
                      + (C2p + C3p) * 4                # biases (f32)
                      + N * H * Wo * C3p * 2)          # output (bf16)

    out = pl.pallas_call(
        kernel,
        out_shape=jax.ShapeDtypeStruct((N, H, Wo, C3p), jnp.bfloat16),
        grid=(N,),
        in_specs=[
            pl.BlockSpec((None, Hp2, Wp, C1p), lambda n: (n, 0, 0, 0)),
            pl.BlockSpec((3 * C1p, 3 * C2p), lambda n: (0, 0)),
            pl.BlockSpec((1, C2p), lambda n: (0, 0)),
            pl.BlockSpec((3 * C2p, 3 * C3p), lambda n: (0, 0)),
            pl.BlockSpec((1, C3p), lambda n: (0, 0)),
        ],
        out_specs=pl.BlockSpec((None, H, Wo, C3p), lambda n: (n, 0, 0, 0)),
        scratch_shapes=[pltpu.VMEM((Hp2, Wp, C2p), jnp.bfloat16)],
        compiler_params=pltpu.CompilerParams(
            dimension_semantics=("parallel",),
            vmem_limit_bytes=vmem_limit),
        cost_estimate=pl.CostEstimate(flops=flops, transcendentals=0,
                                      bytes_accessed=bytes_accessed),
    )(xp, w1p, b1p, w2p, b2p)

    # Drop width/channel padding; back to NCHW f32 for the torch-compat check.
    out = out[:, :, :W, :C3]
    return jnp.transpose(out, (0, 3, 1, 2)).astype(jnp.float32)


# ----------------------------------------------------------------------------
# Pure-JAX f32 reference (NCHW, lax convs) for validation
# ----------------------------------------------------------------------------
def reference_forward(x, params):
    def conv(z, w, b):
        y = lax.conv_general_dilated(z, w, (1, 1), "SAME",
                                     dimension_numbers=("NCHW", "OIHW", "NCHW"))
        return jnp.maximum(y + b[None, :, None, None], 0.0)

    y = conv(x, params["c1_w"], params["c1_b"])
    return conv(y, params["c2_w"], params["c2_b"])


# ----------------------------------------------------------------------------
# Deterministic parameter init (PyTorch-style uniform bounds, synthetic weights)
# ----------------------------------------------------------------------------
def init_params(key, in_channels, out_channels):
    ks = jax.random.split(key, 4)

    def uni(k, shape, fan_in):
        bound = 1.0 / math.sqrt(fan_in)
        return jax.random.uniform(k, shape, jnp.float32, -bound, bound)

    return {
        "c1_w": uni(ks[0], (out_channels, in_channels, 3, 3), in_channels * 9),
        "c1_b": uni(ks[1], (out_channels,), in_channels * 9),
        "c2_w": uni(ks[2], (out_channels, out_channels, 3, 3), out_channels * 9),
        "c2_b": uni(ks[3], (out_channels,), out_channels * 9),
    }


if __name__ == "__main__":
    key = jax.random.PRNGKey(0)
    k_x, k_p = jax.random.split(key)

    N, C_in, H, W = 2, 4, 16, 16
    C_out = 4
    x = jax.random.normal(k_x, (N, C_in, H, W), jnp.float32)
    params = init_params(k_p, C_in, C_out)

    out = jax.block_until_ready(double_conv_forward(x, params))
    ref = jax.block_until_ready(reference_forward(x, params))

    assert out.shape == (N, C_out, H, W), out.shape
    # Tolerance loosened vs the f32 reference because activations/weights are bf16
    # on the MXU (accumulation is f32).
    assert np.allclose(np.asarray(out), np.asarray(ref), atol=5e-2, rtol=5e-2), (
        "mismatch vs reference")
    print("KERNEL_OK")
</pallas_src>

<mosaic_0001>
module attributes {stable_mosaic.version = 11 : i64} {
  func.func @_double_conv_kernel(%arg0: i32, %arg1: memref<1x18x24x128xbf16, #tpu.memory_space<vmem>>, %arg2: memref<384x384xbf16, #tpu.memory_space<vmem>>, %arg3: memref<1x128xf32, #tpu.memory_space<vmem>>, %arg4: memref<384x384xbf16, #tpu.memory_space<vmem>>, %arg5: memref<1x128xf32, #tpu.memory_space<vmem>>, %arg6: memref<1x16x16x128xbf16, #tpu.memory_space<vmem>>, %arg7: memref<18x24x128xbf16, #tpu.memory_space<vmem>>) attributes {dimension_semantics = [#tpu.dimension_semantics<parallel>], iteration_bounds = array<i64: 2>, scalar_prefetch = 0 : i64, scratch_operands = 1 : i64, tpu.core_type = #tpu.core_type<tc>, window_params = [{transform_indices = @transform_0, window_bounds = array<i64: 1, 18, 24, 128>}, {pipeline_mode = #tpu.pipeline_mode<synchronous>, transform_indices = @transform_1, window_bounds = array<i64: 384, 384>}, {pipeline_mode = #tpu.pipeline_mode<synchronous>, transform_indices = @transform_2, window_bounds = array<i64: 1, 128>}, {pipeline_mode = #tpu.pipeline_mode<synchronous>, transform_indices = @transform_3, window_bounds = array<i64: 384, 384>}, {pipeline_mode = #tpu.pipeline_mode<synchronous>, transform_indices = @transform_4, window_bounds = array<i64: 1, 128>}, {transform_indices = @transform_5, window_bounds = array<i64: 1, 16, 16, 128>}]} {
    %cst = arith.constant 0.000000e+00 : f32
    %0 = vector.broadcast %cst : f32 to vector<384x128xf32>
    %c0 = arith.constant 0 : index
    %c0_0 = arith.constant 0 : index
    %c0_1 = arith.constant 0 : index
    %c0_2 = arith.constant 0 : index
    %1 = vector.load %arg1[%c0, %c0_0, %c0_1, %c0_2] : memref<1x18x24x128xbf16, #tpu.memory_space<vmem>>, vector<1x16x24x128xbf16>
    %2 = vector.shape_cast %1 : vector<1x16x24x128xbf16> to vector<16x24x128xbf16>
    %3 = vector.shape_cast %2 : vector<16x24x128xbf16> to vector<384x128xbf16>
    %c0_3 = arith.constant 0 : index
    %c0_4 = arith.constant 0 : index
    %4 = vector.load %arg2[%c0_3, %c0_4] : memref<384x384xbf16, #tpu.memory_space<vmem>>, vector<128x384xbf16>
    %cst_5 = arith.constant dense<0.000000e+00> : vector<384x384xf32>
    %5 = tpu.matmul %3, %4, %cst_5 {dimension_numbers = #tpu.dot_dimension_numbers<[1], [0], [0], [1], [0, 0, 1, 1], [], []>} : vector<384x128xbf16>, vector<128x384xbf16>, vector<384x384xf32> -> vector<384x384xf32>
    %6 = vector.extract_strided_slice %5 {offsets = [0, 0], sizes = [384, 128], strides = [1, 1]} : vector<384x384xf32> to vector<384x128xf32>
    %c1_i32 = arith.constant 1 : i32
    %7 = tpu.dynamic_rotate %6 by %c1_i32 dim 0 : vector<384x128xf32>, i32 -> vector<384x128xf32>
    %8 = arith.addf %0, %7 : vector<384x128xf32>
    %9 = vector.extract_strided_slice %5 {offsets = [0, 128], sizes = [384, 128], strides = [1, 1]} : vector<384x384xf32> to vector<384x128xf32>
    %10 = arith.addf %8, %9 : vector<384x128xf32>
    %11 = vector.extract_strided_slice %5 {offsets = [0, 256], sizes = [384, 128], strides = [1, 1]} : vector<384x384xf32> to vector<384x128xf32>
    %c383_i32 = arith.constant 383 : i32
    %12 = tpu.dynamic_rotate %11 by %c383_i32 dim 0 : vector<384x128xf32>, i32 -> vector<384x128xf32>
    %13 = arith.addf %10, %12 : vector<384x128xf32>
    %c0_6 = arith.constant 0 : index
    %c1 = arith.constant 1 : index
    %c0_7 = arith.constant 0 : index
    %c0_8 = arith.constant 0 : index
    %14 = vector.load %arg1[%c0_6, %c1, %c0_7, %c0_8] : memref<1x18x24x128xbf16, #tpu.memory_space<vmem>>, vector<1x16x24x128xbf16>
    %15 = vector.shape_cast %14 : vector<1x16x24x128xbf16> to vector<16x24x128xbf16>
    %16 = vector.shape_cast %15 : vector<16x24x128xbf16> to vector<384x128xbf16>
    %c128 = arith.constant 128 : index
    %c0_9 = arith.constant 0 : index
    %17 = vector.load %arg2[%c128, %c0_9] : memref<384x384xbf16, #tpu.memory_space<vmem>>, vector<128x384xbf16>
    %cst_10 = arith.constant dense<0.000000e+00> : vector<384x384xf32>
    %18 = tpu.matmul %16, %17, %cst_10 {dimension_numbers = #tpu.dot_dimension_numbers<[1], [0], [0], [1], [0, 0, 1, 1], [], []>} : vector<384x128xbf16>, vector<128x384xbf16>, vector<384x384xf32> -> vector<384x384xf32>
    %19 = vector.extract_strided_slice %18 {offsets = [0, 0], sizes = [384, 128], strides = [1, 1]} : vector<384x384xf32> to vector<384x128xf32>
    %c1_i32_11 = arith.constant 1 : i32
    %20 = tpu.dynamic_rotate %19 by %c1_i32_11 dim 0 : vector<384x128xf32>, i32 -> vector<384x128xf32>
    %21 = arith.addf %13, %20 : vector<384x128xf32>
    %22 = vector.extract_strided_slice %18 {offsets = [0, 128], sizes = [384, 128], strides = [1, 1]} : vector<384x384xf32> to vector<384x128xf32>
    %23 = arith.addf %21, %22 : vector<384x128xf32>
    %24 = vector.extract_strided_slice %18 {offsets = [0, 256], sizes = [384, 128], strides = [1, 1]} : vector<384x384xf32> to vector<384x128xf32>
    %c383_i32_12 = arith.constant 383 : i32
    %25 = tpu.dynamic_rotate %24 by %c383_i32_12 dim 0 : vector<384x128xf32>, i32 -> vector<384x128xf32>
    %26 = arith.addf %23, %25 : vector<384x128xf32>
    %c0_13 = arith.constant 0 : index
    %c2 = arith.constant 2 : index
    %c0_14 = arith.constant 0 : index
    %c0_15 = arith.constant 0 : index
    %27 = vector.load %arg1[%c0_13, %c2, %c0_14, %c0_15] : memref<1x18x24x128xbf16, #tpu.memory_space<vmem>>, vector<1x16x24x128xbf16>
    %28 = vector.shape_cast %27 : vector<1x16x24x128xbf16> to vector<16x24x128xbf16>
    %29 = vector.shape_cast %28 : vector<16x24x128xbf16> to vector<384x128xbf16>
    %c256 = arith.constant 256 : index
    %c0_16 = arith.constant 0 : index
    %30 = vector.load %arg2[%c256, %c0_16] : memref<384x384xbf16, #tpu.memory_space<vmem>>, vector<128x384xbf16>
    %cst_17 = arith.constant dense<0.000000e+00> : vector<384x384xf32>
    %31 = tpu.matmul %29, %30, %cst_17 {dimension_numbers = #tpu.dot_dimension_numbers<[1], [0], [0], [1], [0, 0, 1, 1], [], []>} : vector<384x128xbf16>, vector<128x384xbf16>, vector<384x384xf32> -> vector<384x384xf32>
    %32 = vector.extract_strided_slice %31 {offsets = [0, 0], sizes = [384, 128], strides = [1, 1]} : vector<384x384xf32> to vector<384x128xf32>
    %c1_i32_18 = arith.constant 1 : i32
    %33 = tpu.dynamic_rotate %32 by %c1_i32_18 dim 0 : vector<384x128xf32>, i32 -> vector<384x128xf32>
    %34 = arith.addf %26, %33 : vector<384x128xf32>
    %35 = vector.extract_strided_slice %31 {offsets = [0, 128], sizes = [384, 128], strides = [1, 1]} : vector<384x384xf32> to vector<384x128xf32>
    %36 = arith.addf %34, %35 : vector<384x128xf32>
    %37 = vector.extract_strided_slice %31 {offsets = [0, 256], sizes = [384, 128], strides = [1, 1]} : vector<384x384xf32> to vector<384x128xf32>
    %c383_i32_19 = arith.constant 383 : i32
    %38 = tpu.dynamic_rotate %37 by %c383_i32_19 dim 0 : vector<384x128xf32>, i32 -> vector<384x128xf32>
    %39 = arith.addf %36, %38 : vector<384x128xf32>
    %c0_20 = arith.constant 0 : index
    %c0_21 = arith.constant 0 : index
    %40 = vector.load %arg3[%c0_20, %c0_21] : memref<1x128xf32, #tpu.memory_space<vmem>>, vector<1x128xf32>
    %41 = vector.broadcast %40 : vector<1x128xf32> to vector<384x128xf32>
    %42 = arith.addf %39, %41 : vector<384x128xf32>
    %cst_22 = arith.constant 0.000000e+00 : f32
    %43 = vector.broadcast %cst_22 : f32 to vector<384x128xf32>
    %44 = arith.maximumf %42, %43 : vector<384x128xf32>
    %45 = tpu.iota {dimensions = array<i32: 1>} : vector<16x24x128xi32>
    %c1_i32_23 = arith.constant 1 : i32
    %46 = vector.broadcast %c1_i32_23 : i32 to vector<16x24x128xi32>
    %47 = arith.cmpi sge, %45, %46 : vector<16x24x128xi32>
    %c16_i32 = arith.constant 16 : i32
    %48 = vector.broadcast %c16_i32 : i32 to vector<16x24x128xi32>
    %49 = arith.cmpi sle, %45, %48 : vector<16x24x128xi32>
    %50 = arith.andi %47, %49 : vector<16x24x128xi1>
    %51 = vector.shape_cast %44 : vector<384x128xf32> to vector<16x24x128xf32>
    %cst_24 = arith.constant 0.000000e+00 : f32
    %52 = vector.broadcast %cst_24 : f32 to vector<16x24x128xf32>
    %53 = arith.select %50, %51, %52 : vector<16x24x128xi1>, vector<16x24x128xf32>
    %54 = arith.truncf %53 : vector<16x24x128xf32> to vector<16x24x128xbf16>
    %cst_25 = arith.constant 0.000000e+00 : bf16
    %55 = vector.broadcast %cst_25 : bf16 to vector<1x24x128xbf16>
    %c0_26 = arith.constant 0 : index
    %c0_27 = arith.constant 0 : index
    %c0_28 = arith.constant 0 : index
    %56 = vector.load %arg7[%c0_26, %c0_27, %c0_28] : memref<18x24x128xbf16, #tpu.memory_space<vmem>>, vector<1x24x128xbf16>
    tpu.vector_store %arg7[%c0_26, %c0_27, %c0_28], %55 {strides = array<i32>} : memref<18x24x128xbf16, #tpu.memory_space<vmem>>, vector<1x24x128xbf16>,
    %cst_29 = arith.constant 0.000000e+00 : bf16
    %57 = vector.broadcast %cst_29 : bf16 to vector<1x24x128xbf16>
    %c17 = arith.constant 17 : index
    %c0_30 = arith.constant 0 : index
    %c0_31 = arith.constant 0 : index
    %58 = vector.load %arg7[%c17, %c0_30, %c0_31] : memref<18x24x128xbf16, #tpu.memory_space<vmem>>, vector<1x24x128xbf16>
    tpu.vector_store %arg7[%c17, %c0_30, %c0_31], %57 {strides = array<i32>} : memref<18x24x128xbf16, #tpu.memory_space<vmem>>, vector<1x24x128xbf16>,
    %c1_32 = arith.constant 1 : index
    %c0_33 = arith.constant 0 : index
    %c0_34 = arith.constant 0 : index
    %59 = vector.load %arg7[%c1_32, %c0_33, %c0_34] : memref<18x24x128xbf16, #tpu.memory_space<vmem>>, vector<16x24x128xbf16>
    tpu.vector_store %arg7[%c1_32, %c0_33, %c0_34], %54 {strides = array<i32>} : memref<18x24x128xbf16, #tpu.memory_space<vmem>>, vector<16x24x128xbf16>,
    %cst_35 = arith.constant 0.000000e+00 : f32
    %60 = vector.broadcast %cst_35 : f32 to vector<384x128xf32>
    %c0_36 = arith.constant 0 : index
    %c0_37 = arith.constant 0 : index
    %c0_38 = arith.constant 0 : index
    %61 = vector.load %arg7[%c0_36, %c0_37, %c0_38] : memref<18x24x128xbf16, #tpu.memory_space<vmem>>, vector<16x24x128xbf16>
    %62 = vector.shape_cast %61 : vector<16x24x128xbf16> to vector<384x128xbf16>
    %c0_39 = arith.constant 0 : index
    %c0_40 = arith.constant 0 : index
    %63 = vector.load %arg4[%c0_39, %c0_40] : memref<384x384xbf16, #tpu.memory_space<vmem>>, vector<128x384xbf16>
    %cst_41 = arith.constant dense<0.000000e+00> : vector<384x384xf32>
    %64 = tpu.matmul %62, %63, %cst_41 {dimension_numbers = #tpu.dot_dimension_numbers<[1], [0], [0], [1], [0, 0, 1, 1], [], []>} : vector<384x128xbf16>, vector<128x384xbf16>, vector<384x384xf32> -> vector<384x384xf32>
    %65 = vector.extract_strided_slice %64 {offsets = [0, 0], sizes = [384, 128], strides = [1, 1]} : vector<384x384xf32> to vector<384x128xf32>
    %66 = arith.addf %60, %65 : vector<384x128xf32>
    %67 = vector.extract_strided_slice %64 {offsets = [0, 128], sizes = [384, 128], strides = [1, 1]} : vector<384x384xf32> to vector<384x128xf32>
    %c383_i32_42 = arith.constant 383 : i32
    %68 = tpu.dynamic_rotate %67 by %c383_i32_42 dim 0 : vector<384x128xf32>, i32 -> vector<384x128xf32>
    %69 = arith.addf %66, %68 : vector<384x128xf32>
    %70 = vector.extract_strided_slice %64 {offsets = [0, 256], sizes = [384, 128], strides = [1, 1]} : vector<384x384xf32> to vector<384x128xf32>
    %c382_i32 = arith.constant 382 : i32
    %71 = tpu.dynamic_rotate %70 by %c382_i32 dim 0 : vector<384x128xf32>, i32 -> vector<384x128xf32>
    %72 = arith.addf %69, %71 : vector<384x128xf32>
    %c1_43 = arith.constant 1 : index
    %c0_44 = arith.constant 0 : index
    %c0_45 = arith.constant 0 : index
    %73 = vector.load %arg7[%c1_43, %c0_44, %c0_45] : memref<18x24x128xbf16, #tpu.memory_space<vmem>>, vector<16x24x128xbf16>
    %74 = vector.shape_cast %73 : vector<16x24x128xbf16> to vector<384x128xbf16>
    %c128_46 = arith.constant 128 : index
    %c0_47 = arith.constant 0 : index
    %75 = vector.load %arg4[%c128_46, %c0_47] : memref<384x384xbf16, #tpu.memory_space<vmem>>, vector<128x384xbf16>
    %cst_48 = arith.constant dense<0.000000e+00> : vector<384x384xf32>
    %76 = tpu.matmul %74, %75, %cst_48 {dimension_numbers = #tpu.dot_dimension_numbers<[1], [0], [0], [1], [0, 0, 1, 1], [], []>} : vector<384x128xbf16>, vector<128x384xbf16>, vector<384x384xf32> -> vector<384x384xf32>
    %77 = vector.extract_strided_slice %76 {offsets = [0, 0], sizes = [384, 128], strides = [1, 1]} : vector<384x384xf32> to vector<384x128xf32>
    %78 = arith.addf %72, %77 : vector<384x128xf32>
    %79 = vector.extract_strided_slice %76 {offsets = [0, 128], sizes = [384, 128], strides = [1, 1]} : vector<384x384xf32> to vector<384x128xf32>
    %c383_i32_49 = arith.constant 383 : i32
    %80 = tpu.dynamic_rotate %79 by %c383_i32_49 dim 0 : vector<384x128xf32>, i32 -> vector<384x128xf32>
    %81 = arith.addf %78, %80 : vector<384x128xf32>
    %82 = vector.extract_strided_slice %76 {offsets = [0, 256], sizes = [384, 128], strides = [1, 1]} : vector<384x384xf32> to vector<384x128xf32>
    %c382_i32_50 = arith.constant 382 : i32
    %83 = tpu.dynamic_rotate %82 by %c382_i32_50 dim 0 : vector<384x128xf32>, i32 -> vector<384x128xf32>
    %84 = arith.addf %81, %83 : vector<384x128xf32>
    %c2_51 = arith.constant 2 : index
    %c0_52 = arith.constant 0 : index
    %c0_53 = arith.constant 0 : index
    %85 = vector.load %arg7[%c2_51, %c0_52, %c0_53] : memref<18x24x128xbf16, #tpu.memory_space<vmem>>, vector<16x24x128xbf16>
    %86 = vector.shape_cast %85 : vector<16x24x128xbf16> to vector<384x128xbf16>
    %c256_54 = arith.constant 256 : index
    %c0_55 = arith.constant 0 : index
    %87 = vector.load %arg4[%c256_54, %c0_55] : memref<384x384xbf16, #tpu.memory_space<vmem>>, vector<128x384xbf16>
    %cst_56 = arith.constant dense<0.000000e+00> : vector<384x384xf32>
    %88 = tpu.matmul %86, %87, %cst_56 {dimension_numbers = #tpu.dot_dimension_numbers<[1], [0], [0], [1], [0, 0, 1, 1], [], []>} : vector<384x128xbf16>, vector<128x384xbf16>, vector<384x384xf32> -> vector<384x384xf32>
    %89 = vector.extract_strided_slice %88 {offsets = [0, 0], sizes = [384, 128], strides = [1, 1]} : vector<384x384xf32> to vector<384x128xf32>
    %90 = arith.addf %84, %89 : vector<384x128xf32>
    %91 = vector.extract_strided_slice %88 {offsets = [0, 128], sizes = [384, 128], strides = [1, 1]} : vector<384x384xf32> to vector<384x128xf32>
    %c383_i32_57 = arith.constant 383 : i32
    %92 = tpu.dynamic_rotate %91 by %c383_i32_57 dim 0 : vector<384x128xf32>, i32 -> vector<384x128xf32>
    %93 = arith.addf %90, %92 : vector<384x128xf32>
    %94 = vector.extract_strided_slice %88 {offsets = [0, 256], sizes = [384, 128], strides = [1, 1]} : vector<384x384xf32> to vector<384x128xf32>
    %c382_i32_58 = arith.constant 382 : i32
    %95 = tpu.dynamic_rotate %94 by %c382_i32_58 dim 0 : vector<384x128xf32>, i32 -> vector<384x128xf32>
    %96 = arith.addf %93, %95 : vector<384x128xf32>
    %c0_59 = arith.constant 0 : index
    %c0_60 = arith.constant 0 : index
    %97 = vector.load %arg5[%c0_59, %c0_60] : memref<1x128xf32, #tpu.memory_space<vmem>>, vector<1x128xf32>
    %98 = vector.broadcast %97 : vector<1x128xf32> to vector<384x128xf32>
    %99 = arith.addf %96, %98 : vector<384x128xf32>
    %cst_61 = arith.constant 0.000000e+00 : f32
    %100 = vector.broadcast %cst_61 : f32 to vector<384x128xf32>
    %101 = arith.maximumf %99, %100 : vector<384x128xf32>
    %102 = vector.shape_cast %101 : vector<384x128xf32> to vector<16x24x128xf32>
    %103 = vector.extract_strided_slice %102 {offsets = [0, 0, 0], sizes = [16, 16, 128], strides = [1, 1, 1]} : vector<16x24x128xf32> to vector<16x16x128xf32>
    %104 = arith.truncf %103 : vector<16x16x128xf32> to vector<16x16x128xbf16>
    %c0_62 = arith.constant 0 : index
    %c0_63 = arith.constant 0 : index
    %c0_64 = arith.constant 0 : index
    %c0_65 = arith.constant 0 : index
    %105 = vector.load %arg6[%c0_62, %c0_63, %c0_64, %c0_65] : memref<1x16x16x128xbf16, #tpu.memory_space<vmem>>, vector<1x16x16x128xbf16>
    %106 = vector.shape_cast %105 : vector<1x16x16x128xbf16> to vector<16x16x128xbf16>
    %107 = vector.shape_cast %104 : vector<16x16x128xbf16> to vector<1x16x16x128xbf16>
    tpu.vector_store %arg6[%c0_62, %c0_63, %c0_64, %c0_65], %107 {strides = array<i32>} : memref<1x16x16x128xbf16, #tpu.memory_space<vmem>>, vector<1x16x16x128xbf16>,
    return
  }
  func.func @transform_0(%arg0: i32) -> (i32, i32, i32, i32) {
    %c0_i32 = arith.constant 0 : i32
    %c0_i32_0 = arith.constant 0 : i32
    %c0_i32_1 = arith.constant 0 : i32
    %c0_i32_2 = arith.constant 0 : i32
    return %arg0, %c0_i32, %c0_i32_0, %c0_i32_1 : i32, i32, i32, i32
  }
  func.func @transform_1(%arg0: i32) -> (i32, i32) {
    %c0_i32 = arith.constant 0 : i32
    %c0_i32_0 = arith.constant 0 : i32
    %c0_i32_1 = arith.constant 0 : i32
    return %c0_i32, %c0_i32_0 : i32, i32
  }
  func.func @transform_2(%arg0: i32) -> (i32, i32) {
    %c0_i32 = arith.constant 0 : i32
    %c0_i32_0 = arith.constant 0 : i32
    %c0_i32_1 = arith.constant 0 : i32
    return %c0_i32, %c0_i32_0 : i32, i32
  }
  func.func @transform_3(%arg0: i32) -> (i32, i32) {
    %c0_i32 = arith.constant 0 : i32
    %c0_i32_0 = arith.constant 0 : i32
    %c0_i32_1 = arith.constant 0 : i32
    return %c0_i32, %c0_i32_0 : i32, i32
  }
  func.func @transform_4(%arg0: i32) -> (i32, i32) {
    %c0_i32 = arith.constant 0 : i32
    %c0_i32_0 = arith.constant 0 : i32
    %c0_i32_1 = arith.constant 0 : i32
    return %c0_i32, %c0_i32_0 : i32, i32
  }
  func.func @transform_5(%arg0: i32) -> (i32, i32, i32, i32) {
    %c0_i32 = arith.constant 0 : i32
    %c0_i32_0 = arith.constant 0 : i32
    %c0_i32_1 = arith.constant 0 : i32
    %c0_i32_2 = arith.constant 0 : i32
    return %arg0, %c0_i32, %c0_i32_0, %c0_i32_1 : i32, i32, i32, i32
  }
}

</mosaic_0001>

<bundles_post_ra>
// kernel: tpu_custom_call.1
= control target key start
LH: loop header
LB: loop body
LE: loop exit
PB: predicated region body
PF: predicated region fallthrough
CT: control target
= control target key end

     0   :  { %10 = vsyncpa [#allocation4], 0  ;;  %s12828_s0 = inlined_call_operand.hbm [shape: bf16[2,18,24,128], index: 0, kind: input, shape index: {}]   ;;  %s12829_s1 = inlined_call_operand.hbm [shape: bf16[384,384], index: 1, kind: input, shape index: {}]   ;;  %s12830_s2 = inlined_call_operand.vmem [shape: f32[1,128], index: 2, kind: input, shape index: {}]   ;;  %s12831_s3 = inlined_call_operand.hbm [shape: bf16[384,384], index: 3, kind: input, shape index: {}]   ;;  %s12832_s4 = inlined_call_operand.vmem [shape: f32[1,128], index: 4, kind: input, shape index: {}]   ;;  %s12833_s5 = inlined_call_operand.hbm [shape: bf16[2,16,16,128], index: 5, kind: output, shape index: {}]  }
   0x1   :  { %12 = vsyncpa [#allocation4 + $0x1], 0 }
   0x2   :  { %13 = vsyncpa [#allocation7], 0 }
   0x3   :  { %14 = vsyncpa [#allocation5], 0 }
   0x4   :  { %16 = vsyncpa [#allocation5 + $0x1], 0  ;;  %s9848_s18 = smov 0   ;;  %s9850_s19 = smov 0  }
   0x5   :  { %s9852_s20 = smov 0   ;;  %s9854_s21 = smov 0  }
   0x6 LB: > { %s9869_s22 = sadd.s32 4294967295, %s9805_s21   ;;  %s7872_s23 = sadd.s32 4294967294, %s9805_s21   ;;  %s9805_s21 = sphi %s9854_s21, %s12982_s21   ;;  %s9801_s20 = sphi %s9852_s20, %s12981_s20   ;;  %s9797_s19 = sphi %s9850_s19, %s12980_s19   ;;  %s9793_s18 = sphi %s9848_s18, %s12979_s18  }
   0x7   : > { %p42_p0 = scmp.ne.s32.totalorder %s9797_s19, %s9793_s18  ;;  %p12834_p1 = scmp.eq.s32.totalorder %s9869_s22, 0 }
   0x8   : > { %p156_p3 = scmp.eq.s32.totalorder %s7872_s23, 1  ;;  %p7873_p5 = scmp.ge.s32.totalorder %s9805_s21, 1 }
   0x9   : > { %p9878_p4 = por %p12834_p1, %p42_p0  ;;  %p163_p7 = scmp.lt.s32.totalorder %s9805_s21, 3 }
   0xa   : > { %p9883_p6 = por %p156_p3, %p42_p0  ;;  %s9807_s27 = smov [#allocation6]  }
   0xb   : > { %s12853_s24 = scalar_select %p9878_p4, 1, 0 }
   0xc   : > { %s12854_s25 = scalar_select %p9883_p6, 1, 0 }
   0xd   : > { %p9888_p8 = pnand %p7873_p5, %p163_p7  ;;  %s175_s28 = sshll.u32 %s9807_s27, 4  ;;  %s176_s28 = int_to_ptr.vmem [resolvable:$true] %s175_s28 }
   0xe   : > { %s9808_s30 = smov [#allocation8]   ;;  %s9668_s7 = scalar_lea.vmem %s176_s28, 9216 }
   0xf   : > { %s12855_s26 = scalar_select %p9888_p8, 1, 0 }
  0x10   : > { %p9258_p9 = pneg %p9888_p8  ;;  %s191_s6 = sshll.u32 %s9808_s30, 4  ;;  %s192_s6 = int_to_ptr.vmem [resolvable:$true] %s191_s6 }
  0x11   : > { %p9669_p13 = scmp.ne.s32.totalorder %s176_s28, %s9668_s7  ;;  %p9676_p5 = scmp.lt.s32.totalorder %s176_s28, %s176_s28 }
  0x12   : > { %p9897_p11 = pnand %p9258_p9, %p12834_p1  ;;  %p9677_p7 = scmp.lt.s32.totalorder %s9668_s7, %s9668_s7 }
  0x14   : > { %p9659_p12 = pneg %p9897_p11  ;;  %p9678_p10 = por %p9677_p7, %p9676_p5 }
  0x16   : > { %p9671_p0 = pnand %p9669_p13, %p9659_p12 }
  0x18   : > { %p9672_p3 = pneg %p9671_p0 }
  0x1a   : > { %p9679_p9 = pnand %p9678_p10, %p9672_p3 }
  0x1c   : > { %9682 = shalt.err (!%p9679_p9)
}
  0x1d   : > { %s9809_s8 = smov 192   ;;  %s9810_s9 = smov 12  }
  0x1e   : > { %9261 = dma.hbm_to_vmem [thread:$0]  (!%p9897_p11), %s12829_s1, 9216, %s176_s28, [#allocation7], %s9809_s8, %s9809_s8, %s9810_s9  }
  0x1f   : > { %s9694_s12 = scalar_lea.vmem %s192_s6, 9216  ;;  %p9702_p2 = scmp.lt.s32.totalorder %s192_s6, %s192_s6 }
  0x20   : > { %p9695_p1 = scmp.ne.s32.totalorder %s192_s6, %s9694_s12  ;;  %p9703_p6 = scmp.lt.s32.totalorder %s9694_s12, %s9694_s12 }
  0x22   : > { %p9697_p13 = pnand %p9695_p1, %p9659_p12  ;;  %p9704_p5 = por %p9703_p6, %p9702_p2 }
  0x24   : > { %p9698_p0 = pneg %p9697_p13 }
  0x26   : > { %p9705_p10 = pnand %p9704_p5, %p9698_p0 }
  0x28   : > { %9708 = shalt.err (!%p9705_p10)
}
  0x29   : > { %9264 = dma.hbm_to_vmem [thread:$0]  (!%p9897_p11), %s12831_s3, 9216, %s192_s6, [#allocation7], %s9809_s8, %s9809_s8, %s9810_s9  }
  0x2a   : > { %s9920_s15 = sadd.s32 1, %s9805_s21   ;;  %s29_s16 = sadd.s32 1, %s9801_s20 }
  0x2b   : > { %s26_s17 = ssub.s32 %s9805_s21, %s9920_s15  ;;  %p36_p1 = scmp.ne.s32.totalorder %s9801_s20, %s9797_s19 }
  0x2c   : > { %p27_p2 = scmp.eq.s32.totalorder %s26_s17, 0  ;;  %p37_p6 = scmp.eq.s32.totalorder %s9805_s21, 0 }
  0x2d   : > { %p12857_p12 = scmp.eq.s32.totalorder %s9869_s22, 1  ;;  %p9275_p7 = scmp.lt.s32.totalorder %s9805_s21, 2 }
  0x2e   : > { %s9936_s27 = scalar_select %p27_p2, %s9801_s20, %s29_s16  }
  0x2f   : > { %p9930_p3 = por %p12857_p12, %p36_p1  ;;  %p38_p9 = por %p37_p6, %p36_p1 }
  0x30   : > { %s208_s28 = sand.u32 1, %s9801_s20   ;;  %s9244_s30 = smul.u32 3456, %s9805_s21 }
  0x31   : > { %s12858_s23 = scalar_select %p9930_p3, 1, 0 }
  0x32   : > { %s9243_s29 = smul.u32 216, %s208_s28  ;;  %p9940_p11 = pnand %p9275_p7, %p38_p9 }
  0x33   : > { %s9947_s9 = scalar_lea.hbm %s12828_s0, %s9244_s30  ;;  %s9951_s12 = scalar_lea.sflag [#allocation4], %s208_s28 }
  0x34   : > { %s212_s10 = scalar_lea.vmem [#allocation3], %s9243_s29  ;;  %s9709_s13 = scalar_lea.hbm %s9947_s9, 3456 }
  0x35   : > { %s219_s11 = sshll.u32 %s212_s10, 4  ;;  %p9710_p13 = scmp.ne.s32.totalorder %s9947_s9, %s9709_s13  ;;  %s9949_s11 = int_to_ptr.vmem [resolvable:$true] %s219_s11 }
  0x36   : > { %p9711_p0 = pneg %p9940_p11  ;;  %s9714_s17 = scalar_lea.hbm %s12828_s0, 6912 }
  0x37   : > { %p9715_p1 = scmp.lt.s32.totalorder %s9947_s9, %s12828_s0  ;;  %p9716_p2 = scmp.lt.s32.totalorder %s9714_s17, %s9709_s13 }
  0x38   : > { %p9712_p5 = pnand %p9711_p0, %p9710_p13 }
  0x39   : > { %p9717_p6 = por %p9716_p2, %p9715_p1 }
  0x3a   : > { %p9713_p10 = pneg %p9712_p5 }
  0x3c   : > { %p9718_p12 = pnand %p9717_p6, %p9713_p10 }
  0x3e   : > { %9721 = shalt.err (!%p9718_p12)
}
  0x3f   : > { %s9722_s28 = scalar_lea.vmem %s9949_s11, 3456  ;;  %s9811_s29 = smov [#allocation3]  }
  0x40   : > { %p9723_p7 = scmp.ne.s32.totalorder %s9949_s11, %s9722_s28  ;;  %s9727_s8 = sshll.u32 %s9811_s29, 4  ;;  %s9728_s8 = int_to_ptr.vmem [resolvable:$false] %s9727_s8 }
  0x41   : > { %s9729_s10 = scalar_lea.vmem %s9728_s8, 6912  ;;  %p9730_p5 = scmp.lt.s32.totalorder %s9949_s11, %s9728_s8 }
  0x42   : > { %p9725_p9 = pnand %p9723_p7, %p9711_p0  ;;  %p9731_p3 = scmp.lt.s32.totalorder %s9729_s10, %s9722_s28 }
  0x44   : > { %p9726_p13 = pneg %p9725_p9  ;;  %p9732_p4 = por %p9731_p3, %p9730_p5 }
  0x46   : > { %p9733_p8 = pnand %p9732_p4, %p9726_p13 }
  0x48   : > { %9736 = shalt.err (!%p9733_p8)
}
  0x49   : > { %s9812_s13 = smov 64   ;;  %s9813_s14 = smov 4  }
  0x4a   : > { %9268 = dma.hbm_to_vmem [thread:$0]  (!%p9940_p11), %s9947_s9, 3456, %s9949_s11, %s9951_s12, %s9812_s13, %s9812_s13, %s9813_s14  }
  0x4b   : > { %p12860_p0 = scmp.ne.s32.totalorder %s12855_s26, 0 }
  0x4d   : > { %231 = sbr.rel (%p12860_p0) target bundleno = 1506 (0x5e2), region = 40 }
  0x52   : > { %s9975_s16 = sand.u32 1, %s9797_s19   ;;  %p12861_p4 = scmp.ne.s32.totalorder %s12853_s24, 0 }
  0x53   : > { %s9245_s17 = smul.u32 216, %s9975_s16  ;;  %s234_s30 = scalar_lea.sflag [#allocation4], %s9975_s16 }
  0x55   : > { %s9979_s7 = scalar_lea.vmem [#allocation3], %s9245_s17 }
  0x56   : > { %9780 = dma.done.wait (%p12861_p4), %s234_s30, 3456  }
  0x57   : > { %9782 = vsyncadd (%p12861_p4), %s234_s30, 4294963840  ;;  %p12862_p8 = scmp.eq.s32.totalorder %s9869_s22, 0 }
  0x59   : > { %9784 = dma.done.wait (%p12862_p8), [#allocation7], 18432   ;;  %p12863_p3 = pmov %p12862_p8 }
  0x5a   : > { %v12840_v0 = vmov 0   ;;  %v9320_v1 = vld [vmem:[#allocation6 + $0xac] ss:$12 sps:$4 sm:$0xff]   ;;  %v9322_v2 = vld [vmem:[#allocation6 + $0xb0] ss:$12 sps:$4 sm:$0xff]   ;;  %s7881_s28 = sshll.u32 %s9975_s16, 7 }
  0x5b   : > { %9786 = vsyncadd (%p12863_p3), [#allocation7], 4294948864  ;;  %657 = vmatprep.mubr.bf16.mxu0 %v12840_v0  ;;  %4031 = vst [vmem:[#allocation2] sm:$0xf] %v12840_v0  ;;  %625 = vmatprep.subr.bf16.mxu0 %v9320_v1  ;;  %v9323_v3 = vld [vmem:[#allocation6 + $0xa8] ss:$12 sps:$4 sm:$0xff]  }
  0x5c   : > { %4032 = vst [vmem:[#allocation2 + $0x4] sm:$0xf] %v12840_v0  ;;  %4033 = vst [vmem:[#allocation2 + $0x8] sm:$0xf] %v12840_v0  ;;  %8859 = vmatprep.subr.bf16.mxu1 %v9322_v2  ;;  %v9324_v4 = vld [vmem:[#allocation6 + $0x94] ss:$12 sps:$4 sm:$0xff]   ;;  %626 = vmatpush1.bf16.msra.mxu0 %v9323_v3 }
  0x5d   : > { %4035 = vst [vmem:[#allocation2 + $0xcc] sm:$0xf] %v12840_v0  ;;  %4036 = vst [vmem:[#allocation2 + $0xd0] sm:$0xf] %v12840_v0  ;;  %8860 = vmatpush3.bf16.msra.mxu1 %v9322_v2  ;;  %v9326_v5 = vld [vmem:[#allocation6 + $0x98] ss:$12 sps:$4 sm:$0xff]   ;;  %627 = vmatprep.subr.bf16.mxu0 %v9324_v4 }
  0x5e   : > { %4037 = vst [vmem:[#allocation2 + $0xd4] sm:$0xf] %v12840_v0  ;;  %v9327_v6 = vld [vmem:[#allocation6 + $0x90] ss:$12 sps:$4 sm:$0xff]   ;;  %8861 = vmatprep.subr.bf16.mxu1 %v9326_v5  ;;  %v9330_v8 = vld [vmem:[#allocation6 + $0x80] ss:$12 sps:$4 sm:$0xff]  }
  0x5f   : > { %v9328_v7 = vld [vmem:[#allocation6 + $0x7c] ss:$12 sps:$4 sm:$0xff]   ;;  %v9331_v9 = vld [vmem:[#allocation6 + $0x78] ss:$12 sps:$4 sm:$0xff]   ;;  %v9335_v12 = vld [vmem:[#allocation6 + $0x60] ss:$12 sps:$4 sm:$0xff]  }
  0x60   : > { %628 = vmatpush1.bf16.msra.mxu0 %v9327_v6  ;;  %v9332_v10 = vld [vmem:[#allocation6 + $0x64] ss:$12 sps:$4 sm:$0xff]   ;;  %v9334_v11 = vld [vmem:[#allocation6 + $0x68] ss:$12 sps:$4 sm:$0xff]   ;;  %v9336_v13 = vld [vmem:[#allocation6 + $0x4c] ss:$12 sps:$4 sm:$0xff]  }
  0x61   : > { %8862 = vmatpush3.bf16.msra.mxu1 %v9326_v5  ;;  %629 = vmatprep.subr.bf16.mxu0 %v9328_v7  ;;  %v9338_v14 = vld [vmem:[#allocation6 + $0x50] ss:$12 sps:$4 sm:$0xff]   ;;  %v9339_v15 = vld [vmem:[#allocation6 + $0x48] ss:$12 sps:$4 sm:$0xff]   ;;  %v9342_v17 = vld [vmem:[#allocation6 + $0x38] ss:$12 sps:$4 sm:$0xff]  }
  0x62   : > { %8863 = vmatprep.subr.bf16.mxu1 %v9330_v8  ;;  %v9340_v16 = vld [vmem:[#allocation6 + $0x34] ss:$12 sps:$4 sm:$0xff]   ;;  %v9343_v18 = vld [vmem:[#allocation6 + $0x30] ss:$12 sps:$4 sm:$0xff]   ;;  %v9347_v22 = vld [vmem:[#allocation6 + $0x18] ss:$12 sps:$4 sm:$0xff]  }
  0x63   : > { %v9352_v19 = vld [vmem:[%s9979_s7] sm:$0xff]   ;;  %v9353_v27 = vld [vmem:[%s9979_s7 + $0x8] sm:$0xff]   ;;  %v9355_v28 = vld [vmem:[%s9979_s7 + $0x10] sm:$0xff]   ;;  %s12560_s29 = scalar_lea.vmem [#allocation9], %s7881_s28  ;;  %s8433_s8 = sshll.u32 %s9869_s22, 11 }
  0x64   : > { %630 = vmatpush1.bf16.msra.mxu0 %v9331_v9  ;;  %v9344_v20 = vld [vmem:[#allocation6 + $0x1c] ss:$12 sps:$4 sm:$0xff]   ;;  %v9346_v21 = vld [vmem:[#allocation6 + $0x20] ss:$12 sps:$4 sm:$0xff]   ;;  %8875 = vmatprep.mubr.bf16.mxu1 %v9352_v19  ;;  %v9348_v23 = vld [vmem:[#allocation6 + $0x4] ss:$12 sps:$4 sm:$0xff]   ;;  %s12782_s17 = scalar_lea.hbm %s12833_s5, %s8433_s8 }
  0x65   : > { %8864 = vmatpush3.bf16.msra.mxu1 %v9330_v8  ;;  %631 = vmatprep.subr.bf16.mxu0 %v9332_v10  ;;  %v9350_v24 = vld [vmem:[#allocation6 + $0x8] ss:$12 sps:$4 sm:$0xff]   ;;  %v9351_v25 = vld [vmem:[#allocation6] ss:$12 sps:$4 sm:$0xff]   ;;  %v9354_v26 = vld [vmem:[#allocation6 + $0x170] ss:$12 sps:$4 sm:$0xff]  }
  0x66   : > { %8865 = vmatprep.subr.bf16.mxu1 %v9334_v11  ;;  %v9361_v29 = vld [vmem:[#allocation6 + $0x158] ss:$12 sps:$4 sm:$0xff]   ;;  %v9368_v30 = vld [vmem:[#allocation6 + $0x140] ss:$12 sps:$4 sm:$0xff]   ;;  %v9373_v34 = vld [vmem:[#allocation6 + $0x168] ss:$12 sps:$4 sm:$0xff]  }
  0x67   : > { %v9356_v31 = vld [vmem:[%s9979_s7 + $0x18] sm:$0xff]   ;;  %v9357_v32 = vld [vmem:[%s9979_s7 + $0x20] sm:$0xff]   ;;  %v9358_v39 = vld [vmem:[%s9979_s7 + $0x28] sm:$0xff]   ;;  %s7780_s10 = sshll.u32 %s12560_s29, 4  ;;  %s7767_s30 = scalar_lea.sflag [#allocation5], %s9975_s16  ;;  %s12784_s10 = int_to_ptr.vmem [resolvable:$true] %s7780_s10 }
  0x68   : > { %632 = vmatpush1.bf16.msra.mxu0 %v9335_v12  ;;  %v9375_v33 = vld [vmem:[#allocation6 + $0x16c] ss:$12 sps:$4 sm:$0xff]   ;;  %v9378_v35 = vld [vmem:[#allocation6 + $0x154] ss:$12 sps:$4 sm:$0xff]   ;;  %v9376_v36 = vld [vmem:[#allocation6 + $0x150] ss:$12 sps:$4 sm:$0xff]  }
  0x69   : > { %8866 = vmatpush3.bf16.msra.mxu1 %v9334_v11  ;;  %633 = vmatprep.subr.bf16.mxu0 %v9336_v13  ;;  %v9383_v37 = vld [vmem:[#allocation6 + $0x13c] ss:$12 sps:$4 sm:$0xff]   ;;  %v9381_v41 = vld [vmem:[#allocation6 + $0x138] ss:$12 sps:$4 sm:$0xff]   ;;  %v9385_v43 = vld [vmem:[#allocation6 + $0x120] ss:$12 sps:$4 sm:$0xff]  }
  0x6a   : > { %8867 = vmatprep.subr.bf16.mxu1 %v9338_v14  ;;  %v9384_v38 = vld [vmem:[#allocation6 + $0x128] ss:$12 sps:$4 sm:$0xff]   ;;  %v9359_v40 = vld [vmem:[%s9979_s7 + $0x30] sm:$0xff]   ;;  %p12976_p10 = scmp.ne.s32.totalorder %s12858_s23, 0  ;;  %s9815_s22 = smov [#allocation9]  }
  0x6b   : > { %v9387_v42 = vld [vmem:[#allocation6 + $0x124] ss:$12 sps:$4 sm:$0xff]   ;;  %v9392_v44 = vld [vmem:[#allocation6 + $0x10c] ss:$12 sps:$4 sm:$0xff]   ;;  %v9390_v47 = vld [vmem:[#allocation6 + $0x108] ss:$12 sps:$4 sm:$0xff]  }
  0x6c   : > { %634 = vmatpush1.bf16.msra.mxu0 %v9339_v15  ;;  %v9360_v45 = vld [vmem:[%s9979_s7 + $0x38] sm:$0xff]   ;;  %v9362_v46 = vld [vmem:[%s9979_s7 + $0x40] sm:$0xff]   ;;  %v9363_v50 = vld [vmem:[%s9979_s7 + $0x48] sm:$0xff]   ;;  %s9741_s24 = sshll.u32 %s9815_s22, 4  ;;  %s9742_s24 = int_to_ptr.vmem [resolvable:$false] %s9741_s24 }
  0x6d   : > { %8868 = vmatpush3.bf16.msra.mxu1 %v9338_v14  ;;  %635 = vmatprep.subr.bf16.mxu0 %v9340_v16  ;;  %v9395_v48 = vld [vmem:[#allocation6 + $0xf4] ss:$12 sps:$4 sm:$0xff]   ;;  %v9405_v49 = vld [vmem:[#allocation6 + $0x110] ss:$12 sps:$4 sm:$0xff]   ;;  %v9409_v53 = vld [vmem:[#allocation6 + $0xf8] ss:$12 sps:$4 sm:$0xff]   ;;  %p9744_p6 = scmp.lt.s32.totalorder %s12784_s10, %s9742_s24 }
  0x6e   : > { %8869 = vmatprep.subr.bf16.mxu1 %v9342_v17  ;;  %v9393_v51 = vld [vmem:[#allocation6 + $0xf0] ss:$12 sps:$4 sm:$0xff]   ;;  %v9398_v55 = vld [vmem:[#allocation6 + $0xd8] ss:$12 sps:$4 sm:$0xff]   ;;  %v9413_v57 = vld [vmem:[#allocation6 + $0xe0] ss:$12 sps:$4 sm:$0xff]  }
  0x6f   : > { %v9400_v52 = vld [vmem:[#allocation6 + $0xdc] ss:$12 sps:$4 sm:$0xff]   ;;  %v9403_v56 = vld [vmem:[#allocation6 + $0xc4] ss:$12 sps:$4 sm:$0xff]   ;;  %v9401_v59 = vld [vmem:[#allocation6 + $0xc0] ss:$12 sps:$4 sm:$0xff]  }
  0x70   : > { %636 = vmatpush1.bf16.msra.mxu0 %v9343_v18  ;;  %v9364_v54 = vld [vmem:[%s9979_s7 + $0x50] sm:$0xff]   ;;  %v9365_v58 = vld [vmem:[%s9979_s7 + $0x58] sm:$0xff]   ;;  %v9366_v60 = vld [vmem:[%s9979_s7 + $0x60] sm:$0xff]   ;;  %s9743_s26 = scalar_lea.vmem %s9742_s24, 4096 }
  0x71   : > { %8870 = vmatpush3.bf16.msra.mxu1 %v9342_v17  ;;  %637 = vmatprep.subr.bf16.mxu0 %v9344_v20  ;;  %v9417_v61 = vld [vmem:[#allocation6 + $0xc8] ss:$12 sps:$4 sm:$0xff]   ;;  %v9369_v63 = vld [vmem:[%s9979_s7 + $0x70] sm:$0xff]  }
  0x72   : > { %8871 = vmatprep.subr.bf16.mxu1 %v9346_v21  ;;  %v9367_v62 = vld [vmem:[%s9979_s7 + $0x68] sm:$0xff]   ;;  %v9370_v1 = vld [vmem:[%s9979_s7 + $0x78] sm:$0xff]   ;;  %v9371_v2 = vld [vmem:[%s9979_s7 + $0x80] sm:$0xff]  }
  0x73   : > { %v9372_v3 = vld [vmem:[%s9979_s7 + $0x88] sm:$0xff]   ;;  %v10023_v4 = vld [vmem:[%s9979_s7 + $0x90] sm:$0xff]   ;;  %v10028_v6 = vld [vmem:[%s9979_s7 + $0x98] sm:$0xff]  }
  0x74   : > { %638 = vmatpush1.bf16.msra.mxu0 %v9347_v22  ;;  %v9423_v5 = vld [vmem:[#allocation6 + $0x22c] ss:$12 sps:$4 sm:$0xff]   ;;  %v10058_v12 = vld [vmem:[%s9979_s7 + $0x14] sm:$0xff]  }
  0x75   : > { %8872 = vmatpush3.bf16.msra.mxu1 %v9346_v21  ;;  %639 = vmatprep.subr.bf16.mxu0 %v9348_v23  ;;  %v10031_v7 = vld [vmem:[%s9979_s7 + $0xa0] sm:$0xff]   ;;  %v10037_v8 = vld [vmem:[%s9979_s7 + $0xa8] sm:$0xff]   ;;  %v10040_v9 = vld [vmem:[%s9979_s7 + $0xb0] sm:$0xff]  }
  0x76   : > { %8873 = vmatprep.subr.bf16.mxu1 %v9350_v24  ;;  %v10046_v10 = vld [vmem:[%s9979_s7 + $0xb8] sm:$0xff]   ;;  %v10052_v11 = vld [vmem:[%s9979_s7 + $0xc] sm:$0xff]   ;;  %v10070_v14 = vld [vmem:[%s9979_s7 + $0x24] sm:$0xff]  }
  0x77   : > { %v10064_v13 = vld [vmem:[%s9979_s7 + $0x1c] sm:$0xff]   ;;  %v10076_v15 = vld [vmem:[%s9979_s7 + $0x2c] sm:$0xff]   ;;  %v10082_v17 = vld [vmem:[%s9979_s7 + $0x34] sm:$0xff]  }
  0x78   : > { %640 = vmatpush1.bf16.msra.mxu0 %v9351_v25  ;;  %v9447_v16 = vld [vmem:[#allocation6 + $0x230] ss:$12 sps:$4 sm:$0xff]   ;;  %v9448_v18 = vld [vmem:[#allocation6 + $0x218] ss:$12 sps:$4 sm:$0xff]   ;;  %v9454_v21 = vld [vmem:[#allocation6 + $0x1e8] ss:$12 sps:$4 sm:$0xff]  }
  0x79   : > { %8874 = vmatpush3.bf16.msra.mxu1 %v9350_v24  ;;  %8923 = vmatprep.subr.bf16.mxu0 %v9354_v26  ;;  %v10088_v20 = vld [vmem:[%s9979_s7 + $0x3c] sm:$0xff]   ;;  %v10095_v23 = vld [vmem:[%s9979_s7 + $0x44] sm:$0xff]  }
  0x7a   : > { %1816 = vmatprep.subr.bf16.mxu1 %v9375_v33  ;;  %v9456_v22 = vld [vmem:[#allocation6 + $0x1d0] ss:$12 sps:$4 sm:$0xff]   ;;  %v9460_v24 = vld [vmem:[#allocation6 + $0x1b8] ss:$12 sps:$4 sm:$0xff]   ;;  %v9462_v25 = vld [vmem:[#allocation6 + $0x1a0] ss:$12 sps:$4 sm:$0xff]  }
  0x7b   : > { %658 = vmatmul.mubr.bf16.vlgmr.msra.gmra.mxu0 %v9352_v19  ;;  %v9453_v19 = vld [vmem:[#allocation6 + $0x200] ss:$12 sps:$4 sm:$0xff]   ;;  %v9421_v33 = vld [vmem:[#allocation6 + $0x228] ss:$12 sps:$4 sm:$0xff]  }
  0x7c   : > { %8876 = vmatmul.mubr.bf16.vlgmr.msra.gmra.mxu1 %v9353_v27  ;;  %8924 = vmatpush3.bf16.msra.mxu0 %v9354_v26  ;;  %v10102_v26 = vld [vmem:[%s9979_s7 + $0x4c] sm:$0xff]  }
  0x7d   : > { %667 = vmatprep.mubr.bf16.mxu0 %v12840_v0  ;;  %8879 = vmatprep.mubr.bf16.mxu1 %v9355_v28 }
  0x7e   : > { %8925 = vmatprep.subr.bf16.mxu0 %v9361_v29  ;;  %1817 = vmatpush1.bf16.msra.mxu1 %v9373_v34  ;;  %v9427_v34 = vld [vmem:[#allocation6 + $0x214] ss:$12 sps:$4 sm:$0xff]  }
  0x7f   : > { %1818 = vmatprep.subr.bf16.mxu1 %v9378_v35 }
  0x80   : > { %8926 = vmatpush3.bf16.msra.mxu0 %v9361_v29  ;;  %v10116_v29 = vld [vmem:[%s9979_s7 + $0x5c] sm:$0xff]  }
  0x81   : > { %8927 = vmatprep.subr.bf16.mxu0 %v9368_v30 }
  0x82   : > { %1819 = vmatpush1.bf16.msra.mxu1 %v9376_v36 }
  0x83   : > { %668 = vmatmul.mubr.bf16.gmra.mxu0 %v9353_v27  ;;  %1820 = vmatprep.subr.bf16.mxu1 %v9383_v37  ;;  %v9463_v27 = vld [vmem:[#allocation6 + $0x188] ss:$12 sps:$4 sm:$0xff]  }
  0x84   : > { %8880 = vmatmul.mubr.bf16.gmra.mxu1 %v9356_v31  ;;  %677 = vmatprep.mubr.bf16.mxu0 %v12840_v0 }
  0x85   : > { %8883 = vmatprep.mubr.bf16.mxu1 %v9357_v32  ;;  %8928 = vmatpush3.bf16.msra.mxu0 %v9368_v30  ;;  %v10123_v30 = vld [vmem:[%s9979_s7 + $0x64] sm:$0xff]  }
  0x86   : > { %8929 = vmatprep.subr.bf16.mxu0 %v9384_v38  ;;  %1821 = vmatpush1.bf16.msra.mxu1 %v9381_v41  ;;  %v9432_v41 = vld [vmem:[#allocation6 + $0x1fc] ss:$12 sps:$4 sm:$0xff]  }
  0x87   : > { %1822 = vmatprep.subr.bf16.mxu1 %v9387_v42 }
  0x89   : > { %8930 = vmatpush3.bf16.msra.mxu0 %v9384_v38  ;;  %v9425_v38 = vld [vmem:[#allocation6 + $0x210] ss:$12 sps:$4 sm:$0xff]  }
  0x8a   : > { %1823 = vmatpush1.bf16.msra.mxu1 %v9385_v43  ;;  %8931 = vmatprep.subr.bf16.mxu0 %v9405_v49 }
  0x8b   : > { %678 = vmatmul.mubr.bf16.gmra.mxu0 %v9355_v28  ;;  %1824 = vmatprep.subr.bf16.mxu1 %v9392_v44  ;;  %v10109_v28 = vld [vmem:[%s9979_s7 + $0x54] sm:$0xff]  }
  0x8c   : > { %8884 = vmatmul.mubr.bf16.gmra.mxu1 %v9358_v39  ;;  %687 = vmatprep.mubr.bf16.mxu0 %v12840_v0 }
  0x8d   : > { %8887 = vmatprep.mubr.bf16.mxu1 %v9359_v40  ;;  %8932 = vmatpush3.bf16.msra.mxu0 %v9405_v49 }
  0x8e   : > { %1825 = vmatpush1.bf16.msra.mxu1 %v9390_v47  ;;  %8933 = vmatprep.subr.bf16.mxu0 %v9409_v53 }
  0x8f   : > { %1826 = vmatprep.subr.bf16.mxu1 %v9395_v48 }
  0x91   : > { %8934 = vmatpush3.bf16.msra.mxu0 %v9409_v53 }
  0x92   : > { %1827 = vmatpush1.bf16.msra.mxu1 %v9393_v51  ;;  %8935 = vmatprep.subr.bf16.mxu0 %v9413_v57 }
  0x93   : > { %688 = vmatmul.mubr.bf16.gmra.mxu0 %v9356_v31  ;;  %1828 = vmatprep.subr.bf16.mxu1 %v9400_v52  ;;  %v10130_v31 = vld [vmem:[%s9979_s7 + $0x6c] sm:$0xff]  }
  0x94   : > { %8888 = vmatmul.mubr.bf16.gmra.mxu1 %v9360_v45  ;;  %697 = vmatprep.mubr.bf16.mxu0 %v12840_v0  ;;  %v9430_v52 = vld [vmem:[#allocation6 + $0x1f8] ss:$12 sps:$4 sm:$0xff]  }
  0x95   : > { %8891 = vmatprep.mubr.bf16.mxu1 %v9362_v46  ;;  %8936 = vmatpush3.bf16.msra.mxu0 %v9413_v57 }
  0x96   : > { %1829 = vmatpush1.bf16.msra.mxu1 %v9398_v55  ;;  %8937 = vmatprep.subr.bf16.mxu0 %v9417_v61 }
  0x97   : > { %1830 = vmatprep.subr.bf16.mxu1 %v9403_v56  ;;  %v9436_v56 = vld [vmem:[#allocation6 + $0x1e4] ss:$12 sps:$4 sm:$0xff]  }
  0x99   : > { %8938 = vmatpush3.bf16.msra.mxu0 %v9417_v61 }
  0x9a   : > { %1831 = vmatpush1.bf16.msra.mxu1 %v9401_v59  ;;  %3003 = vmatprep.subr.bf16.mxu0 %v9423_v5 }
  0x9b   : > { %698 = vmatmul.mubr.bf16.gmra.mxu0 %v9357_v32  ;;  %8987 = vmatprep.subr.bf16.mxu1 %v9447_v16  ;;  %v1171_v32 = vlaneseq }
  0x9c   : > { %8892 = vmatmul.mubr.bf16.gmra.mxu1 %v9363_v50  ;;  %707 = vmatprep.mubr.bf16.mxu0 %v12840_v0 }
  0x9d   : > { %8895 = vmatprep.mubr.bf16.mxu1 %v9364_v54  ;;  %v10136_v37 = vshrl.u32 %v1171_v32, 7 }
  0x9f   : > { %vm1173_vm0 = vcmp.lt.s32.totalorder %v10136_v37, 1  ;;  %vm1366_vm1 = vcmp.lt.s32.totalorder %v10136_v37, 7  ;;  %vm3942_vm3 = vcmp.ge.s32.totalorder %v10136_v37, 1  ;;  %vm5289_vm4 = vcmp.lt.s32.totalorder %v10136_v37, 6 }
  0xa3   : > { %708 = vmatmul.mubr.bf16.gmra.mxu0 %v9358_v39 }
  0xa4   : > { %8896 = vmatmul.mubr.bf16.gmra.mxu1 %v9365_v58  ;;  %717 = vmatprep.mubr.bf16.mxu0 %v12840_v0 }
  0xa5   : > { %8899 = vmatprep.mubr.bf16.mxu1 %v9366_v60 }
  0xab   : > { %718 = vmatmul.mubr.bf16.gmra.mxu0 %v9359_v40 }
  0xac   : > { %8900 = vmatmul.mubr.bf16.gmra.mxu1 %v9367_v62  ;;  %727 = vmatprep.mubr.bf16.mxu0 %v12840_v0 }
  0xad   : > { %8903 = vmatprep.mubr.bf16.mxu1 %v9369_v63 }
  0xb3   : > { %728 = vmatmul.mubr.bf16.gmra.mxu0 %v9360_v45  ;;  %v10147_v45 = vld [vmem:[%s9979_s7 + $0x74] sm:$0xff]  }
  0xb4   : > { %8904 = vmatmul.mubr.bf16.gmra.mxu1 %v9370_v1  ;;  %737 = vmatprep.mubr.bf16.mxu0 %v12840_v0 }
  0xb5   : > { %8907 = vmatprep.mubr.bf16.mxu1 %v9371_v2 }
  0xbb   : > { %738 = vmatmul.mubr.bf16.gmra.mxu0 %v9362_v46 }
  0xbc   : > { %8908 = vmatmul.mubr.bf16.gmra.mxu1 %v9372_v3  ;;  %747 = vmatprep.mubr.bf16.mxu0 %v12840_v0 }
  0xbd   : > { %8911 = vmatprep.mubr.bf16.mxu1 %v10023_v4 }
  0xc3   : > { %748 = vmatmul.mubr.bf16.gmra.mxu0 %v9363_v50 }
  0xc4   : > { %8912 = vmatmul.mubr.bf16.gmra.mxu1 %v10028_v6  ;;  %757 = vmatprep.mubr.bf16.mxu0 %v12840_v0 }
  0xc5   : > { %8915 = vmatprep.mubr.bf16.mxu1 %v10031_v7 }
  0xcb   : > { %758 = vmatmul.mubr.bf16.gmra.mxu0 %v9364_v54 }
  0xcc   : > { %8916 = vmatmul.mubr.bf16.gmra.mxu1 %v10037_v8  ;;  %767 = vmatprep.mubr.bf16.mxu0 %v12840_v0 }
  0xcd   : > { %8919 = vmatprep.mubr.bf16.mxu1 %v10040_v9 }
  0xd3   : > { %768 = vmatmul.mubr.bf16.gmra.mxu0 %v9365_v58 }
  0xd4   : > { %8920 = vmatmul.mubr.bf16.gmra.mxu1 %v10046_v10  ;;  %777 = vmatprep.mubr.bf16.mxu0 %v12840_v0 }
  0xd5   : > { %1848 = vmatprep.mubr.bf16.mxu1 %v12840_v0 }
  0xdb   : > { %778 = vmatmul.mubr.bf16.gmra.mxu0 %v9366_v60 }
  0xdc   : > { %1849 = vmatmul.mubr.bf16.vlgmr.msra.gmra.mxu1 %v10052_v11  ;;  %787 = vmatprep.mubr.bf16.mxu0 %v12840_v0 }
  0xdd   : > { %1858 = vmatprep.mubr.bf16.mxu1 %v12840_v0  ;;  %8988 = vmatpush3.bf16.msra.mxu1 %v9447_v16 }
  0xde   : > { %8989 = vmatprep.subr.bf16.mxu1 %v9448_v18 }
  0xe1   : > { %8990 = vmatpush3.bf16.msra.mxu1 %v9448_v18 }
  0xe2   : > { %8991 = vmatprep.subr.bf16.mxu1 %v9453_v19 }
  0xe3   : > { %788 = vmatmul.mubr.bf16.gmra.mxu0 %v9367_v62 }
  0xe4   : > { %1859 = vmatmul.mubr.bf16.gmra.mxu1 %v10058_v12  ;;  %797 = vmatprep.mubr.bf16.mxu0 %v12840_v0 }
  0xe5   : > { %1868 = vmatprep.mubr.bf16.mxu1 %v12840_v0  ;;  %8992 = vmatpush3.bf16.msra.mxu1 %v9453_v19  ;;  %v9439_v19 = vld [vmem:[#allocation6 + $0x1c8] ss:$12 sps:$4 sm:$0xff]  }
  0xe6   : > { %8993 = vmatprep.subr.bf16.mxu1 %v9454_v21 }
  0xe9   : > { %8994 = vmatpush3.bf16.msra.mxu1 %v9454_v21 }
  0xea   : > { %8995 = vmatprep.subr.bf16.mxu1 %v9456_v22 }
  0xeb   : > { %798 = vmatmul.mubr.bf16.gmra.mxu0 %v9369_v63 }
  0xec   : > { %1869 = vmatmul.mubr.bf16.gmra.mxu1 %v10064_v13  ;;  %807 = vmatprep.mubr.bf16.mxu0 %v12840_v0 }
  0xed   : > { %1878 = vmatprep.mubr.bf16.mxu1 %v12840_v0  ;;  %8996 = vmatpush3.bf16.msra.mxu1 %v9456_v22 }
  0xee   : > { %8997 = vmatprep.subr.bf16.mxu1 %v9460_v24 }
  0xf1   : > { %8998 = vmatpush3.bf16.msra.mxu1 %v9460_v24 }
  0xf2   : > { %8999 = vmatprep.subr.bf16.mxu1 %v9462_v25 }
  0xf3   : > { %808 = vmatmul.mubr.bf16.gmra.mxu0 %v9370_v1 }
  0xf4   : > { %1879 = vmatmul.mubr.bf16.gmra.mxu1 %v10070_v14  ;;  %817 = vmatprep.mubr.bf16.mxu0 %v12840_v0 }
  0xf5   : > { %1888 = vmatprep.mubr.bf16.mxu1 %v12840_v0  ;;  %9000 = vmatpush3.bf16.msra.mxu1 %v9462_v25  ;;  %v9445_v25 = vld [vmem:[#allocation6 + $0x1b4] ss:$12 sps:$4 sm:$0xff]  }
  0xf6   : > { %9001 = vmatprep.subr.bf16.mxu1 %v9463_v27 }
  0xf9   : > { %9002 = vmatpush3.bf16.msra.mxu1 %v9463_v27 }
  0xfb   : > { %818 = vmatmul.mubr.bf16.gmra.mxu0 %v9371_v2  ;;  %v9434_v2 = vld [vmem:[#allocation6 + $0x1e0] ss:$12 sps:$4 sm:$0xff]  }
  0xfc   : > { %1889 = vmatmul.mubr.bf16.gmra.mxu1 %v10076_v15  ;;  %827 = vmatprep.mubr.bf16.mxu0 %v12840_v0 }
  0xfd   : > { %1898 = vmatprep.mubr.bf16.mxu1 %v12840_v0 }
 0x103   : > { %828 = vmatmul.mubr.bf16.gmra.mxu0 %v9372_v3 }
 0x104   : > { %1899 = vmatmul.mubr.bf16.gmra.mxu1 %v10082_v17  ;;  %837 = vmatprep.mubr.bf16.mxu0 %v12840_v0 }
 0x105   : > { %1908 = vmatprep.mubr.bf16.mxu1 %v12840_v0 }
 0x10b   : > { %838 = vmatmul.mubr.bf16.gmra.mxu0 %v10023_v4 }
 0x10c   : > { %1909 = vmatmul.mubr.bf16.gmra.mxu1 %v10088_v20  ;;  %847 = vmatprep.mubr.bf16.mxu0 %v12840_v0 }
 0x10d   : > { %1918 = vmatprep.mubr.bf16.mxu1 %v12840_v0 }
 0x113   : > { %848 = vmatmul.mubr.bf16.gmra.mxu0 %v10028_v6  ;;  %v9441_v6 = vld [vmem:[#allocation6 + $0x1cc] ss:$12 sps:$4 sm:$0xff]  }
 0x114   : > { %1919 = vmatmul.mubr.bf16.gmra.mxu1 %v10095_v23  ;;  %857 = vmatprep.mubr.bf16.mxu0 %v12840_v0 }
 0x115   : > { %1928 = vmatprep.mubr.bf16.mxu1 %v12840_v0 }
 0x11b   : > { %858 = vmatmul.mubr.bf16.gmra.mxu0 %v10031_v7 }
 0x11c   : > { %1929 = vmatmul.mubr.bf16.gmra.mxu1 %v10102_v26  ;;  %867 = vmatprep.mubr.bf16.mxu0 %v12840_v0 }
 0x11d   : > { %1938 = vmatprep.mubr.bf16.mxu1 %v12840_v0 }
 0x123   : > { %868 = vmatmul.mubr.bf16.gmra.mxu0 %v10037_v8 }
 0x124   : > { %1939 = vmatmul.mubr.bf16.gmra.mxu1 %v10109_v28  ;;  %877 = vmatprep.mubr.bf16.mxu0 %v12840_v0 }
 0x125   : > { %1948 = vmatprep.mubr.bf16.mxu1 %v12840_v0 }
 0x12b   : > { %878 = vmatmul.mubr.bf16.gmra.mxu0 %v10040_v9 }
 0x12c   : > { %1949 = vmatmul.mubr.bf16.gmra.mxu1 %v10116_v29  ;;  %887 = vmatprep.mubr.bf16.mxu0 %v12840_v0 }
 0x12d   : > { %1958 = vmatprep.mubr.bf16.mxu1 %v12840_v0 }
 0x133   : > { %888 = vmatmul.mubr.bf16.gmra.mxu0 %v10046_v10  ;;  %v10174_v10 = vld [vmem:[%s9979_s7 + $0x7c] sm:$0xff]  }
 0x134   : > { %1959 = vmatmul.mubr.bf16.gmra.mxu1 %v10123_v30  ;;  %8939 = vmatprep.mubr.bf16.mxu0 %v10052_v11 }
 0x135   : > { %1968 = vmatprep.mubr.bf16.mxu1 %v12840_v0 }
 0x13b   : > { %v10132_v35 = vpop.f32.mrf.mxu0  ;;  %8940 = vmatmul.mubr.bf16.vlgmr.msra.gmra.mxu0 %v10058_v12 }
 0x13c   : > { %12864 = vst [vmem:[#allocation13_spill] sm:$0xff] %v10132_v35  ;;  %v8877_v36 = vpop.f32.mrf.mxu1  ;;  %1969 = vmatmul.mubr.bf16.gmra.mxu1 %v10130_v31  ;;  %3004 = vmatpush1.bf16.msra.mxu0 %v9421_v33  ;;  %v12838_v42 = vrot.slane %v10132_v35, 7 }
 0x13d   : > { %1978 = vmatprep.mubr.bf16.mxu1 %v12840_v0  ;;  %v10139_v39 = vpop.f32.mrf.mxu0  ;;  %8943 = vmatprep.mubr.bf16.mxu0 %v10064_v13  ;;  %v1320_v46 = vrot.slane %v8877_v36, 1 }
 0x13e   : > { %12865 = vst [vmem:[#allocation14_spill] sm:$0xff] %v10139_v39  ;;  %v10141_v40 = vpop.f32.mrf.mxu1  ;;  %3005 = vmatprep.subr.bf16.mxu0 %v9427_v34 }
 0x13f   : > { %v663_v43 = vpop.f32.mrf.mxu0  ;;  %v12839_v47 = vrot.slane %v10141_v40, 1 }
 0x140   : > { %v8878_v44 = vpop.f32.mrf.mxu1  ;;  %v1124_v48 = vrot.slane %v663_v43, 7  ;;  %3006 = vmatpush1.bf16.msra.mxu0 %v9425_v38 }
 0x141   : > { %v1321_v49 = vrot.slane %v8878_v44, 1  ;;  %v665_v50 = vpop.f32.mrf.mxu0  ;;  %3007 = vmatprep.subr.bf16.mxu0 %v9432_v41 }
 0x142   : > { %v935_v51 = vpop.f32.mrf.mxu1  ;;  %v1220_v53 = vsel %vm1173_vm0, %v12838_v42, %v1124_v48 }
 0x143   : > { %v1319_v54 = vrot.slane %v935_v51, 1  ;;  %v1411_v55 = vsel %vm1366_vm1, %v1320_v46, %v1321_v49  ;;  %v1271_v57 = vadd.f32 %v1220_v53, %v665_v50  ;;  %v669_v58 = vpop.f32.mrf.mxu0  ;;  %8944 = vmatmul.mubr.bf16.gmra.mxu0 %v10070_v14  ;;  %v10199_v53 = vld [vmem:[%s9979_s7 + $0x84] sm:$0xff]  }
 0x144   : > { %v8881_v59 = vpop.f32.mrf.mxu1  ;;  %1979 = vmatmul.mubr.bf16.gmra.mxu1 %v10147_v45  ;;  %v1125_v62 = vrot.slane %v669_v58, 7  ;;  %8947 = vmatprep.mubr.bf16.mxu0 %v10076_v15 }
 0x145   : > { %v1412_v60 = vsel %vm1366_vm1, %v1319_v54, %v1320_v46  ;;  %v10165_v61 = vsel %vm1366_vm1, %v12839_v47, %v1319_v54  ;;  %1988 = vmatprep.mubr.bf16.mxu1 %v12840_v0  ;;  %v671_v63 = vpop.f32.mrf.mxu0  ;;  %3008 = vmatpush1.bf16.msra.mxu0 %v9430_v52  ;;  %v1324_v11 = vrot.slane %v8881_v59, 1  ;;  %v9443_v46 = vld [vmem:[#allocation6 + $0x1b0] ss:$12 sps:$4 sm:$0xff]   ;;  %v9464_v47 = vld [vmem:[%s9979_s7 + $0x18] sm:$0xff]  }
 0x146   : > { %12866 = vst [vmem:[#allocation15_spill] sm:$0xff] %v10165_v61  ;;  %v948_v1 = vpop.f32.mrf.mxu1  ;;  %v10169_v3 = vadd.f32 %v1412_v60, %v1271_v57  ;;  %v1219_v4 = vsel %vm1173_vm0, %v1124_v48, %v1125_v62  ;;  %3009 = vmatprep.subr.bf16.mxu0 %v9436_v56  ;;  %v9450_v60 = vld [vmem:[#allocation6 + $0x198] ss:$12 sps:$4 sm:$0xff]   ;;  %v9465_v61 = vld [vmem:[%s9979_s7 + $0x20] sm:$0xff]  }
 0x147   : > { %v1322_v5 = vrot.slane %v948_v1, 1  ;;  %v1272_v7 = vadd.f32 %v1219_v4, %v671_v63  ;;  %v673_v8 = vpop.f32.mrf.mxu0 }
 0x148   : > { %v8882_v9 = vpop.f32.mrf.mxu1  ;;  %v1126_v12 = vrot.slane %v673_v8, 7 }
 0x149   : > { %v1325_v13 = vrot.slane %v8882_v9, 1  ;;  %v1410_v14 = vsel %vm1366_vm1, %v1321_v49, %v1322_v5  ;;  %v10178_v15 = vadd.f32 %v1411_v55, %v1272_v7  ;;  %v675_v16 = vpop.f32.mrf.mxu0  ;;  %3010 = vmatpush1.bf16.msra.mxu0 %v9434_v2  ;;  %v9452_v49 = vld [vmem:[#allocation6 + $0x19c] ss:$12 sps:$4 sm:$0xff]   ;;  %v9459_v2 = vld [vmem:[#allocation6 + $0x184] ss:$12 sps:$4 sm:$0xff]  }
 0x14a   : > { %v951_v18 = vpop.f32.mrf.mxu1  ;;  %v1218_v21 = vsel %vm1173_vm0, %v1125_v62, %v1126_v12  ;;  %3011 = vmatprep.subr.bf16.mxu0 %v9441_v6 }
 0x14b   : > { %v1323_v22 = vrot.slane %v951_v18, 1  ;;  %v10184_v24 = vsel %vm1366_vm1, %v1324_v11, %v1325_v13  ;;  %v1273_v27 = vadd.f32 %v1218_v21, %v675_v16  ;;  %v679_v32 = vpop.f32.mrf.mxu0  ;;  %8948 = vmatmul.mubr.bf16.gmra.mxu0 %v10082_v17  ;;  %v10226_v21 = vld [vmem:[%s9979_s7 + $0x8c] sm:$0xff]  }
 0x14c   : > { %v8885_v33 = vpop.f32.mrf.mxu1  ;;  %1989 = vmatmul.mubr.bf16.gmra.mxu1 %v10174_v10  ;;  %v1127_v34 = vrot.slane %v679_v32, 7  ;;  %8951 = vmatprep.mubr.bf16.mxu0 %v10088_v20 }
 0x14d   : > { %v1409_v36 = vsel %vm1366_vm1, %v1322_v5, %v1323_v22  ;;  %v1408_v38 = vsel %vm1366_vm1, %v1323_v22, %v1324_v11  ;;  %1998 = vmatprep.mubr.bf16.mxu1 %v12840_v0  ;;  %v10194_v41 = vadd.f32 %v1410_v14, %v1273_v27  ;;  %v681_v43 = vpop.f32.mrf.mxu0  ;;  %3012 = vmatpush1.bf16.msra.mxu0 %v9439_v19  ;;  %v1328_v54 = vrot.slane %v8885_v33, 1  ;;  %v9457_v14 = vld [vmem:[#allocation6 + $0x180] ss:$12 sps:$4 sm:$0xff]  }
 0x14e   : > { %v964_v44 = vpop.f32.mrf.mxu1  ;;  %v1217_v17 = vsel %vm1173_vm0, %v1126_v12, %v1127_v34  ;;  %3013 = vmatprep.subr.bf16.mxu0 %v9445_v25 }
 0x14f   : > { %v1326_v48 = vrot.slane %v964_v44, 1  ;;  %v1274_v50 = vadd.f32 %v1217_v17, %v681_v43  ;;  %v683_v51 = vpop.f32.mrf.mxu0 }
 0x150   : > { %v8886_v52 = vpop.f32.mrf.mxu1  ;;  %v1128_v55 = vrot.slane %v683_v51, 7 }
 0x151   : > { %v1329_v20 = vrot.slane %v8886_v52, 1  ;;  %v1406_v56 = vsel %vm1366_vm1, %v1325_v13, %v1326_v48  ;;  %v10203_v57 = vadd.f32 %v1409_v36, %v1274_v50  ;;  %v685_v58 = vpop.f32.mrf.mxu0  ;;  %3014 = vmatpush1.bf16.msra.mxu0 %v9443_v46 }
 0x152   : > { %v967_v59 = vpop.f32.mrf.mxu1  ;;  %v1216_v62 = vsel %vm1173_vm0, %v1127_v34, %v1128_v55  ;;  %3015 = vmatprep.subr.bf16.mxu0 %v9452_v49 }
 0x153   : > { %v1327_v63 = vrot.slane %v967_v59, 1  ;;  %v10209_v1 = vsel %vm1366_vm1, %v1328_v54, %v1329_v20  ;;  %v1275_v4 = vadd.f32 %v1216_v62, %v685_v58  ;;  %v689_v5 = vpop.f32.mrf.mxu0  ;;  %8952 = vmatmul.mubr.bf16.gmra.mxu0 %v10095_v23 }
 0x154   : > { %v8889_v6 = vpop.f32.mrf.mxu1  ;;  %1999 = vmatmul.mubr.bf16.gmra.mxu1 %v10199_v53  ;;  %v1129_v7 = vrot.slane %v689_v5, 7  ;;  %8955 = vmatprep.mubr.bf16.mxu0 %v10102_v26 }
 0x155   : > { %2008 = vmatprep.mubr.bf16.mxu1 %v12840_v0  ;;  %v1405_v8 = vsel %vm1366_vm1, %v1326_v48, %v1327_v63  ;;  %v10219_v9 = vsel %vm1366_vm1, %v1327_v63, %v1328_v54  ;;  %v10221_v11 = vadd.f32 %v1408_v38, %v1275_v4  ;;  %v691_v12 = vpop.f32.mrf.mxu0  ;;  %3016 = vmatpush1.bf16.msra.mxu0 %v9450_v60  ;;  %v1332_v22 = vrot.slane %v8889_v6, 1 }
 0x156   : > { %v980_v13 = vpop.f32.mrf.mxu1  ;;  %v1215_v23 = vsel %vm1173_vm0, %v1128_v55, %v1129_v7  ;;  %3017 = vmatprep.subr.bf16.mxu0 %v9459_v2 }
 0x157   : > { %v1330_v16 = vrot.slane %v980_v13, 1  ;;  %v1276_v18 = vadd.f32 %v1215_v23, %v691_v12  ;;  %v693_v26 = vpop.f32.mrf.mxu0 }
 0x158   : > { %v8890_v19 = vpop.f32.mrf.mxu1  ;;  %v1130_v25 = vrot.slane %v693_v26, 7 }
 0x159   : > { %v1333_v27 = vrot.slane %v8890_v19, 1  ;;  %v10230_v32 = vsel %vm1366_vm1, %v1329_v20, %v1330_v16  ;;  %v10233_v33 = vadd.f32 %v10184_v24, %v1276_v18  ;;  %v695_v34 = vpop.f32.mrf.mxu0  ;;  %3018 = vmatpush1.bf16.msra.mxu0 %v9457_v14 }
 0x15a   : > { %v983_v36 = vpop.f32.mrf.mxu1  ;;  %v1214_v38 = vsel %vm1173_vm0, %v1129_v7, %v1130_v25 }
 0x15b   : > { %v1331_v43 = vrot.slane %v983_v36, 1  ;;  %v10239_v44 = vsel %vm1366_vm1, %v1332_v22, %v1333_v27  ;;  %v1277_v46 = vadd.f32 %v1214_v38, %v695_v34  ;;  %v699_v17 = vpop.f32.mrf.mxu0  ;;  %8956 = vmatmul.mubr.bf16.gmra.mxu0 %v10109_v28  ;;  %v10290_v36 = vld [vmem:[%s9979_s7 + $0x9c] sm:$0xff]  }
 0x15c   : > { %v8893_v48 = vpop.f32.mrf.mxu1  ;;  %2009 = vmatmul.mubr.bf16.gmra.mxu1 %v10226_v21  ;;  %v1131_v24 = vrot.slane %v699_v17, 7  ;;  %8959 = vmatprep.mubr.bf16.mxu0 %v10116_v29  ;;  %v10258_v29 = vld [vmem:[%s9979_s7 + $0x94] sm:$0xff]  }
 0x15d   : > { %2018 = vmatprep.mubr.bf16.mxu1 %v12840_v0  ;;  %v10247_v49 = vsel %vm1366_vm1, %v1330_v16, %v1331_v43  ;;  %v10251_v50 = vsel %vm1366_vm1, %v1331_v43, %v1332_v22  ;;  %v10253_v51 = vadd.f32 %v1406_v56, %v1277_v46  ;;  %v701_v52 = vpop.f32.mrf.mxu0  ;;  %v1336_v60 = vrot.slane %v8893_v48, 1 }
 0x15e   : > { %v996_v54 = vpop.f32.mrf.mxu1  ;;  %v1213_v28 = vsel %vm1173_vm0, %v1130_v25, %v1131_v24 }
 0x15f   : > { %v1334_v55 = vrot.slane %v996_v54, 1  ;;  %v1278_v20 = vadd.f32 %v1213_v28, %v701_v52  ;;  %v703_v58 = vpop.f32.mrf.mxu0 }
 0x160   : > { %v8894_v59 = vpop.f32.mrf.mxu1  ;;  %v1132_v62 = vrot.slane %v703_v58, 7 }
 0x161   : > { %v1337_v63 = vrot.slane %v8894_v59, 1  ;;  %v10262_v2 = vsel %vm1366_vm1, %v1333_v27, %v1334_v55  ;;  %v10264_v56 = vadd.f32 %v1405_v8, %v1278_v20  ;;  %v705_v4 = vpop.f32.mrf.mxu0 }
 0x162   : > { %v999_v5 = vpop.f32.mrf.mxu1  ;;  %v1212_v6 = vsel %vm1173_vm0, %v1131_v24, %v1132_v62 }
 0x163   : > { %v1335_v7 = vrot.slane %v999_v5, 1  ;;  %v10270_v12 = vsel %vm1366_vm1, %v1336_v60, %v1337_v63  ;;  %v1279_v13 = vadd.f32 %v1212_v6, %v705_v4  ;;  %v709_v14 = vpop.f32.mrf.mxu0  ;;  %8960 = vmatmul.mubr.bf16.gmra.mxu0 %v10123_v30 }
 0x164   : > { %v8897_v23 = vpop.f32.mrf.mxu1  ;;  %2019 = vmatmul.mubr.bf16.gmra.mxu1 %v10258_v29  ;;  %v1133_v8 = vrot.slane %v709_v14, 7  ;;  %8963 = vmatprep.mubr.bf16.mxu0 %v10130_v31 }
 0x165   : > { %2028 = vmatprep.mubr.bf16.mxu1 %v12840_v0  ;;  %v10278_v16 = vsel %vm1366_vm1, %v1334_v55, %v1335_v7  ;;  %v10282_v18 = vsel %vm1366_vm1, %v1335_v7, %v1336_v60  ;;  %v10285_v26 = vadd.f32 %v10219_v9, %v1279_v13  ;;  %v711_v19 = vpop.f32.mrf.mxu0  ;;  %v1340_v38 = vrot.slane %v8897_v23, 1  ;;  %v10323_v13 = vld [vmem:[%s9979_s7 + $0xa4] sm:$0xff]  }
 0x166   : > { %v1012_v22 = vpop.f32.mrf.mxu1  ;;  %v1211_v30 = vsel %vm1173_vm0, %v1132_v62, %v1133_v8 }
 0x167   : > { %v1338_v25 = vrot.slane %v1012_v22, 1  ;;  %v1280_v27 = vadd.f32 %v1211_v30, %v711_v19  ;;  %v713_v34 = vpop.f32.mrf.mxu0 }
 0x168   : > { %v8898_v31 = vpop.f32.mrf.mxu1  ;;  %v1134_v43 = vrot.slane %v713_v34, 7 }
 0x169   : > { %v1341_v46 = vrot.slane %v8898_v31, 1  ;;  %v10294_v17 = vsel %vm1366_vm1, %v1337_v63, %v1338_v25  ;;  %v10297_v9 = vadd.f32 %v10209_v1, %v1280_v27  ;;  %v715_v48 = vpop.f32.mrf.mxu0 }
 0x16a   : > { %v1015_v24 = vpop.f32.mrf.mxu1  ;;  %v1210_v52 = vsel %vm1173_vm0, %v1133_v8, %v1134_v43 }
 0x16b   : > { %v1339_v54 = vrot.slane %v1015_v24, 1  ;;  %v10303_v28 = vsel %vm1366_vm1, %v1340_v38, %v1341_v46  ;;  %v1281_v55 = vadd.f32 %v1210_v52, %v715_v48  ;;  %v719_v20 = vpop.f32.mrf.mxu0  ;;  %8964 = vmatmul.mubr.bf16.gmra.mxu0 %v10147_v45 }
 0x16c   : > { %v8901_v58 = vpop.f32.mrf.mxu1  ;;  %2029 = vmatmul.mubr.bf16.gmra.mxu1 %v10290_v36  ;;  %v1135_v1 = vrot.slane %v719_v20, 7  ;;  %8967 = vmatprep.mubr.bf16.mxu0 %v10174_v10 }
 0x16d   : > { %2038 = vmatprep.mubr.bf16.mxu1 %v12840_v0  ;;  %v10311_v59 = vsel %vm1366_vm1, %v1338_v25, %v1339_v54  ;;  %v10315_v60 = vsel %vm1366_vm1, %v1339_v54, %v1340_v38  ;;  %v10318_v62 = vadd.f32 %v10230_v32, %v1281_v55  ;;  %v721_v63 = vpop.f32.mrf.mxu0  ;;  %v1344_v14 = vrot.slane %v8901_v58, 1 }
 0x16e   : > { %v1028_v4 = vpop.f32.mrf.mxu1  ;;  %v1209_v45 = vsel %vm1173_vm0, %v1134_v43, %v1135_v1 }
 0x16f   : > { %v1342_v5 = vrot.slane %v1028_v4, 1  ;;  %v1282_v6 = vadd.f32 %v1209_v45, %v721_v63  ;;  %v723_v7 = vpop.f32.mrf.mxu0 }
 0x170   : > { %v8902_v10 = vpop.f32.mrf.mxu1  ;;  %v1136_v23 = vrot.slane %v723_v7, 7 }
 0x171   : > { %v1345_v8 = vrot.slane %v8902_v10, 1  ;;  %v10327_v19 = vsel %vm1366_vm1, %v1341_v46, %v1342_v5  ;;  %v10330_v32 = vadd.f32 %v10247_v49, %v1282_v6  ;;  %v725_v22 = vpop.f32.mrf.mxu0 }
 0x172   : > { %v1031_v30 = vpop.f32.mrf.mxu1  ;;  %v1208_v25 = vsel %vm1173_vm0, %v1135_v1, %v1136_v23  ;;  %v9446_v1 = vld [vmem:[%s9979_s7 + $0xac] sm:$0xff]  }
 0x173   : > { %v1343_v27 = vrot.slane %v1031_v30, 1  ;;  %v10336_v34 = vsel %vm1366_vm1, %v1344_v14, %v1345_v8  ;;  %v1283_v31 = vadd.f32 %v1208_v25, %v725_v22  ;;  %v729_v38 = vpop.f32.mrf.mxu0  ;;  %8968 = vmatmul.mubr.bf16.gmra.mxu0 %v10199_v53 }
 0x174   : > { %v8905_v43 = vpop.f32.mrf.mxu1  ;;  %2039 = vmatmul.mubr.bf16.gmra.mxu1 %v10323_v13  ;;  %v1137_v49 = vrot.slane %v729_v38, 7  ;;  %8971 = vmatprep.mubr.bf16.mxu0 %v10226_v21 }
 0x175   : > { %2048 = vmatprep.mubr.bf16.mxu1 %v12840_v0  ;;  %v10344_v46 = vsel %vm1366_vm1, %v1342_v5, %v1343_v27  ;;  %v10348_v48 = vsel %vm1366_vm1, %v1343_v27, %v1344_v14  ;;  %v10351_v24 = vadd.f32 %v10251_v50, %v1283_v31  ;;  %v731_v52 = vpop.f32.mrf.mxu0  ;;  %v1348_v63 = vrot.slane %v8905_v43, 1 }
 0x176   : > { %v1044_v54 = vpop.f32.mrf.mxu1  ;;  %v1207_v53 = vsel %vm1173_vm0, %v1136_v23, %v1137_v49 }
 0x177   : > { %v1346_v55 = vrot.slane %v1044_v54, 1  ;;  %v1284_v20 = vadd.f32 %v1207_v53, %v731_v52  ;;  %v733_v58 = vpop.f32.mrf.mxu0  ;;  %v9449_v53 = vld [vmem:[%s9979_s7 + $0xb4] sm:$0xff]  }
 0x178   : > { %v8906_v21 = vpop.f32.mrf.mxu1  ;;  %v1138_v4 = vrot.slane %v733_v58, 7 }
 0x179   : > { %v1349_v45 = vrot.slane %v8906_v21, 1  ;;  %v10358_v5 = vsel %vm1366_vm1, %v1345_v8, %v1346_v55  ;;  %v10361_v50 = vadd.f32 %v10239_v44, %v1284_v20  ;;  %v735_v6 = vpop.f32.mrf.mxu0 }
 0x17a   : > { %v1047_v7 = vpop.f32.mrf.mxu1  ;;  %v1206_v10 = vsel %vm1173_vm0, %v1137_v49, %v1138_v4 }
 0x17b   : > { %v1347_v14 = vrot.slane %v1047_v7, 1  ;;  %v10367_v23 = vsel %vm1366_vm1, %v1348_v63, %v1349_v45  ;;  %v1285_v22 = vadd.f32 %v1206_v10, %v735_v6  ;;  %v739_v30 = vpop.f32.mrf.mxu0  ;;  %8972 = vmatmul.mubr.bf16.gmra.mxu0 %v10258_v29 }
 0x17c   : > { %v8909_v25 = vpop.f32.mrf.mxu1  ;;  %2049 = vmatmul.mubr.bf16.gmra.mxu1 %v9446_v1  ;;  %v1139_v8 = vrot.slane %v739_v30, 7  ;;  %8975 = vmatprep.mubr.bf16.mxu0 %v10290_v36 }
 0x17d   : > { %2058 = vmatprep.mubr.bf16.mxu1 %v12840_v0  ;;  %v10374_v44 = vsel %vm1366_vm1, %v1346_v55, %v1347_v14  ;;  %v10378_v27 = vsel %vm1366_vm1, %v1347_v14, %v1348_v63  ;;  %v10381_v31 = vadd.f32 %v10262_v2, %v1285_v22  ;;  %v741_v38 = vpop.f32.mrf.mxu0  ;;  %v1352_v20 = vrot.slane %v8909_v25, 1 }
 0x17e   : > { %v1060_v43 = vpop.f32.mrf.mxu1  ;;  %v1205_v29 = vsel %vm1173_vm0, %v1138_v4, %v1139_v8 }
 0x17f   : > { %v1350_v49 = vrot.slane %v1060_v43, 1  ;;  %v1286_v52 = vadd.f32 %v1205_v29, %v741_v38  ;;  %v743_v54 = vpop.f32.mrf.mxu0 }
 0x180   : > { %v8910_v36 = vpop.f32.mrf.mxu1  ;;  %v1140_v55 = vrot.slane %v743_v54, 7 }
 0x181   : > { %v1353_v58 = vrot.slane %v8910_v36, 1  ;;  %v10388_v21 = vsel %vm1366_vm1, %v1349_v45, %v1350_v49  ;;  %v10391_v2 = vadd.f32 %v10278_v16, %v1286_v52  ;;  %v745_v63 = vpop.f32.mrf.mxu0  ;;  %v9455_v36 = vld [vmem:[%s9979_s7 + $0xbc] sm:$0xff]  }
 0x182   : > { %v1063_v6 = vpop.f32.mrf.mxu1  ;;  %v1204_v4 = vsel %vm1173_vm0, %v1139_v8, %v1140_v55 }
 0x183   : > { %v1351_v7 = vrot.slane %v1063_v6, 1  ;;  %v10397_v10 = vsel %vm1366_vm1, %v1352_v20, %v1353_v58  ;;  %v1287_v14 = vadd.f32 %v1204_v4, %v745_v63  ;;  %v749_v22 = vpop.f32.mrf.mxu0  ;;  %8976 = vmatmul.mubr.bf16.gmra.mxu0 %v10323_v13 }
 0x184   : > { %v8913_v30 = vpop.f32.mrf.mxu1  ;;  %2059 = vmatmul.mubr.bf16.gmra.mxu1 %v9449_v53  ;;  %v1141_v45 = vrot.slane %v749_v22, 7  ;;  %8979 = vmatprep.mubr.bf16.mxu0 %v9446_v1 }
 0x185   : > { %2068 = vmatprep.mubr.bf16.mxu1 %v12840_v0  ;;  %v10403_v16 = vsel %vm1366_vm1, %v1350_v49, %v1351_v7  ;;  %v10407_v25 = vsel %vm1366_vm1, %v1351_v7, %v1352_v20  ;;  %v10410_v8 = vadd.f32 %v10282_v18, %v1287_v14  ;;  %v751_v38 = vpop.f32.mrf.mxu0  ;;  %v1356_v63 = vrot.slane %v8913_v30, 1 }
 0x186   : > { %v1076_v43 = vpop.f32.mrf.mxu1  ;;  %v1203_v13 = vsel %vm1173_vm0, %v1140_v55, %v1141_v45 }
 0x187   : > { %v1354_v29 = vrot.slane %v1076_v43, 1  ;;  %v1288_v52 = vadd.f32 %v1203_v13, %v751_v38  ;;  %v753_v54 = vpop.f32.mrf.mxu0 }
 0x188   : > { %v8914_v1 = vpop.f32.mrf.mxu1  ;;  %v1142_v49 = vrot.slane %v753_v54, 7 }
 0x189   : > { %v1357_v6 = vrot.slane %v8914_v1, 1  ;;  %v10417_v20 = vsel %vm1366_vm1, %v1353_v58, %v1354_v29  ;;  %v10420_v18 = vadd.f32 %v10270_v12, %v1288_v52  ;;  %v755_v4 = vpop.f32.mrf.mxu0 }
 0x18a   : > { %v1079_v7 = vpop.f32.mrf.mxu1  ;;  %v1202_v55 = vsel %vm1173_vm0, %v1141_v45, %v1142_v49 }
 0x18b   : > { %v1355_v14 = vrot.slane %v1079_v7, 1  ;;  %v10426_v22 = vsel %vm1366_vm1, %v1356_v63, %v1357_v6  ;;  %v1289_v30 = vadd.f32 %v1202_v55, %v755_v4  ;;  %v759_v38 = vpop.f32.mrf.mxu0  ;;  %8980 = vmatmul.mubr.bf16.gmra.mxu0 %v9449_v53  ;;  %v9461_v55 = vld [vmem:[%s9979_s7 + $0xc4] sm:$0xff]  }
 0x18c   : > { %v8917_v43 = vpop.f32.mrf.mxu1  ;;  %2069 = vmatmul.mubr.bf16.gmra.mxu1 %v9455_v36  ;;  %v1143_v58 = vrot.slane %v759_v38, 7  ;;  %8983 = vmatprep.mubr.bf16.mxu0 %v9455_v36 }
 0x18d   : > { %2078 = vmatprep.mubr.bf16.mxu1 %v12840_v0  ;;  %v10431_v12 = vsel %vm1366_vm1, %v1354_v29, %v1355_v14  ;;  %v10435_v45 = vsel %vm1366_vm1, %v1355_v14, %v1356_v63  ;;  %v10438_v13 = vadd.f32 %v10294_v17, %v1289_v30  ;;  %v761_v52 = vpop.f32.mrf.mxu0  ;;  %v1360_v38 = vrot.slane %v8917_v43, 1 }
 0x18e   : > { %v1092_v54 = vpop.f32.mrf.mxu1  ;;  %v1201_v53 = vsel %vm1173_vm0, %v1142_v49, %v1143_v58 }
 0x18f   : > { %v1358_v1 = vrot.slane %v1092_v54, 1  ;;  %v1290_v4 = vadd.f32 %v1201_v53, %v761_v52  ;;  %v763_v7 = vpop.f32.mrf.mxu0 }
 0x190   : > { %v8918_v36 = vpop.f32.mrf.mxu1  ;;  %v1144_v29 = vrot.slane %v763_v7, 7 }
 0x191   : > { %v1361_v42 = vrot.slane %v8918_v36, 1  ;;  %v10446_v63 = vsel %vm1366_vm1, %v1357_v6, %v1358_v1  ;;  %v10449_v17 = vadd.f32 %v10311_v59, %v1290_v4  ;;  %v765_v14 = vpop.f32.mrf.mxu0 }
 0x192   : > { %v1095_v30 = vpop.f32.mrf.mxu1  ;;  %v1200_v49 = vsel %vm1173_vm0, %v1143_v58, %v1144_v29 }
 0x193   : > { %12867 = vst [vmem:[#allocation16_spill] sm:$0xff] %v10449_v17  ;;  %v1359_v52 = vrot.slane %v1095_v30, 1  ;;  %v10455_v54 = vsel %vm1366_vm1, %v1360_v38, %v1361_v42  ;;  %v1291_v43 = vadd.f32 %v1200_v49, %v765_v14  ;;  %v769_v53 = vpop.f32.mrf.mxu0  ;;  %8984 = vmatmul.mubr.bf16.gmra.mxu0 %v9461_v55  ;;  %v10473_v17 = vld [vmem:[%s9979_s7 + $0x28] sm:$0xff]  }
 0x194   : > { %v8921_v7 = vpop.f32.mrf.mxu1  ;;  %2079 = vmatmul.mubr.bf16.gmra.mxu1 %v9461_v55  ;;  %v1145_v6 = vrot.slane %v769_v53, 7  ;;  %3035 = vmatprep.mubr.bf16.mxu0 %v12840_v0 }
 0x195   : > { %9003 = vmatprep.mubr.bf16.mxu1 %v9464_v47  ;;  %v10460_v59 = vsel %vm1366_vm1, %v1358_v1, %v1359_v52  ;;  %v10464_v58 = vsel %vm1366_vm1, %v1359_v52, %v1360_v38  ;;  %v10467_v4 = vadd.f32 %v10315_v60, %v1291_v43  ;;  %v771_v36 = vpop.f32.mrf.mxu0  ;;  %v1364_v39 = vrot.slane %v8921_v7, 1 }
 0x196   : > { %v1108_v14 = vpop.f32.mrf.mxu1  ;;  %v1199_v55 = vsel %vm1173_vm0, %v1144_v29, %v1145_v6 }
 0x197   : > { %v1362_v30 = vrot.slane %v1108_v14, 1  ;;  %v1292_v49 = vadd.f32 %v1199_v55, %v771_v36  ;;  %v773_v53 = vpop.f32.mrf.mxu0 }
 0x198   : > { %v8922_v0 = vpop.f32.mrf.mxu1  ;;  %v1146_v1 = vrot.slane %v773_v53, 7 }
 0x199   : > { %v1365_v35 = vrot.slane %v8922_v0, 1  ;;  %v10477_v38 = vsel %vm1366_vm1, %v1361_v42, %v1362_v30  ;;  %v10480_v60 = vadd.f32 %v10303_v28, %v1292_v49  ;;  %v775_v52 = vpop.f32.mrf.mxu0  ;;  %v12870_v0 = vrot.slane %v10141_v40, 1 }
 0x19a   : > { %v1111_v43 = vpop.f32.mrf.mxu1  ;;  %v1198_v29 = vsel %vm1173_vm0, %v1145_v6, %v1146_v1  ;;  %v12873_v6 = vmov 0  }
 0x19b   : > { %12868 = vst [vmem:[#allocation17_spill] sm:$0xff] %v10480_v60  ;;  %v1363_v36 = vrot.slane %v1111_v43, 1  ;;  %v10486_v7 = vsel %vm1366_vm1, %v1364_v39, %v1365_v35  ;;  %v10492_v14 = vsel %vm1366_vm1, %v1365_v35, %v12870_v0  ;;  %v1293_v42 = vadd.f32 %v1198_v29, %v775_v52  ;;  %v779_v55 = vpop.f32.mrf.mxu0  ;;  %3036 = vmatmul.mubr.bf16.vlgmr.msra.gmra.mxu0 %v9464_v47 }
 0x19c   : > { %12869 = vst [vmem:[#allocation18_spill] sm:$0xff] %v10486_v7  ;;  %12871 = vst [vmem:[#allocation19_spill] sm:$0xff] %v10492_v14  ;;  %v10494_v28 = vpop.f32.mrf.mxu1  ;;  %9004 = vmatmul.mubr.bf16.vlgmr.msra.gmra.mxu1 %v9465_v61  ;;  %v1147_v49 = vrot.slane %v779_v55, 7  ;;  %3045 = vmatprep.mubr.bf16.mxu0 %v12873_v6 }
 0x19d   : > { %12872 = vst [vmem:[#allocation20_spill] sm:$0xff] %v10494_v28  ;;  %9007 = vmatprep.mubr.bf16.mxu1 %v10473_v17  ;;  %v10500_v40 = vsel %vm1366_vm1, %v1362_v30, %v1363_v36  ;;  %v10504_v35 = vsel %vm1366_vm1, %v1363_v36, %v1364_v39  ;;  %v10507_v53 = vadd.f32 %v10327_v19, %v1293_v42  ;;  %v781_v52 = vpop.f32.mrf.mxu0  ;;  %v10515_v30 = vld [vmem:[%s9979_s7 + $0x30] sm:$0xff]   ;;  %v10518_v39 = vld [vmem:[%s9979_s7 + $0x38] sm:$0xff]  }
 0x19e   : > { %v10509_v47 = vpop.f32.mrf.mxu1  ;;  %v1197_v29 = vsel %vm1173_vm0, %v1146_v1, %v1147_v49 }
 0x19f   : > { %12874 = vst [vmem:[#allocation21_spill] sm:$0xff] %v10507_v53  ;;  %12875 = vst [vmem:[#allocation22_spill] sm:$0xff] %v10509_v47  ;;  %v1294_v0 = vadd.f32 %v1197_v29, %v781_v52  ;;  %v783_v55 = vpop.f32.mrf.mxu0  ;;  %v12877_v47 = vrot.slane %v10494_v28, 7 }
 0x1a0   : > { %v1854_v14 = vpop.f32.mrf.mxu1  ;;  %v1148_v7 = vrot.slane %v783_v55, 7 }
 0x1a1   : > { %v2315_v60 = vrot.slane %v1854_v14, 7  ;;  %v10521_v19 = vadd.f32 %v10344_v46, %v1294_v0  ;;  %v785_v36 = vpop.f32.mrf.mxu0 }
 0x1a2   : > { %v1856_v42 = vpop.f32.mrf.mxu1  ;;  %v1196_v43 = vsel %vm1173_vm0, %v1147_v49, %v1148_v7 }
 0x1a3   : > { %12876 = vst [vmem:[#allocation23_spill] sm:$0xff] %v10521_v19  ;;  %v2408_v1 = vsel %vm1173_vm0, %v12877_v47, %v2315_v60  ;;  %v1295_v52 = vadd.f32 %v1196_v43, %v785_v36  ;;  %v789_v55 = vpop.f32.mrf.mxu0  ;;  %3046 = vmatmul.mubr.bf16.gmra.mxu0 %v9465_v61  ;;  %v10544_v19 = vld [vmem:[%s9979_s7 + $0x40] sm:$0xff]  }
 0x1a4   : > { %v2411_v29 = vadd.f32 %v2408_v1, %v10169_v3  ;;  %v1860_v14 = vpop.f32.mrf.mxu1  ;;  %9008 = vmatmul.mubr.bf16.gmra.mxu1 %v10515_v30  ;;  %v1149_v46 = vrot.slane %v789_v55, 7  ;;  %3055 = vmatprep.mubr.bf16.mxu0 %v12873_v6 }
 0x1a5   : > { %v2316_v0 = vrot.slane %v1860_v14, 7  ;;  %9011 = vmatprep.mubr.bf16.mxu1 %v10518_v39  ;;  %v10534_v49 = vadd.f32 %v10348_v48, %v1295_v52  ;;  %v791_v43 = vpop.f32.mrf.mxu0  ;;  %v10547_v52 = vld [vmem:[%s9979_s7 + $0x48] sm:$0xff]  }
 0x1a6   : > { %v10536_v47 = vadd.f32 %v2411_v29, %v1856_v42  ;;  %v1862_v3 = vpop.f32.mrf.mxu1  ;;  %v1195_v61 = vsel %vm1173_vm0, %v1148_v7, %v1149_v46 }
 0x1a7   : > { %v2407_v36 = vsel %vm1173_vm0, %v2315_v60, %v2316_v0  ;;  %v1296_v1 = vadd.f32 %v1195_v61, %v791_v43  ;;  %v793_v14 = vpop.f32.mrf.mxu0 }
 0x1a8   : > { %12878 = vst [vmem:[#allocation24_spill] sm:$0xff] %v10536_v47  ;;  %v2412_v55 = vadd.f32 %v2407_v36, %v10178_v15  ;;  %v1864_v28 = vpop.f32.mrf.mxu1  ;;  %v1150_v53 = vrot.slane %v793_v14, 7 }
 0x1a9   : > { %v2317_v48 = vrot.slane %v1864_v28, 7  ;;  %v10550_v42 = vadd.f32 %v10336_v34, %v1296_v1  ;;  %v795_v7 = vpop.f32.mrf.mxu0 }
 0x1aa   : > { %v10552_v29 = vadd.f32 %v2412_v55, %v1862_v3  ;;  %v1866_v47 = vpop.f32.mrf.mxu1  ;;  %v1194_v60 = vsel %vm1173_vm0, %v1149_v46, %v1150_v53 }
 0x1ab   : > { %v2406_v15 = vsel %vm1173_vm0, %v2316_v0, %v2317_v48  ;;  %v1297_v43 = vadd.f32 %v1194_v60, %v795_v7  ;;  %v799_v36 = vpop.f32.mrf.mxu0  ;;  %3056 = vmatmul.mubr.bf16.gmra.mxu0 %v10473_v17 }
 0x1ac   : > { %v2413_v61 = vadd.f32 %v2406_v15, %v10194_v41  ;;  %v1870_v28 = vpop.f32.mrf.mxu1  ;;  %9012 = vmatmul.mubr.bf16.gmra.mxu1 %v10544_v19  ;;  %v1151_v34 = vrot.slane %v799_v36, 7  ;;  %3065 = vmatprep.mubr.bf16.mxu0 %v12873_v6  ;;  %v10574_v36 = vld [vmem:[%s9979_s7 + $0x50] sm:$0xff]  }
 0x1ad   : > { %v2318_v3 = vrot.slane %v1870_v28, 7  ;;  %9015 = vmatprep.mubr.bf16.mxu1 %v10547_v52  ;;  %v10564_v46 = vadd.f32 %v10358_v5, %v1297_v43  ;;  %v801_v41 = vpop.f32.mrf.mxu0  ;;  %v10577_v43 = vld [vmem:[%s9979_s7 + $0x58] sm:$0xff]  }
 0x1ae   : > { %v10566_v0 = vadd.f32 %v2413_v61, %v1866_v47  ;;  %v1872_v1 = vpop.f32.mrf.mxu1  ;;  %v1193_v17 = vsel %vm1173_vm0, %v1150_v53, %v1151_v34 }
 0x1af   : > { %12879 = vst [vmem:[#allocation25_spill] sm:$0xff] %v10564_v46  ;;  %v2405_v55 = vsel %vm1173_vm0, %v2317_v48, %v2318_v3  ;;  %v1298_v14 = vadd.f32 %v1193_v17, %v801_v41  ;;  %v803_v60 = vpop.f32.mrf.mxu0 }
 0x1b0   : > { %v2414_v7 = vadd.f32 %v2405_v55, %v10203_v57  ;;  %v1874_v15 = vpop.f32.mrf.mxu1  ;;  %v1152_v28 = vrot.slane %v803_v60, 7 }
 0x1b1   : > { %v2319_v5 = vrot.slane %v1874_v15, 7  ;;  %v10580_v47 = vadd.f32 %v10374_v44, %v1298_v14  ;;  %v805_v53 = vpop.f32.mrf.mxu0 }
 0x1b2   : > { %v10582_v61 = vadd.f32 %v2414_v7, %v1872_v1  ;;  %v1876_v46 = vpop.f32.mrf.mxu1  ;;  %v1192_v48 = vsel %vm1173_vm0, %v1151_v34, %v1152_v28 }
 0x1b3   : > { %v2404_v57 = vsel %vm1173_vm0, %v2318_v3, %v2319_v5  ;;  %v1299_v41 = vadd.f32 %v1192_v48, %v805_v53  ;;  %v809_v55 = vpop.f32.mrf.mxu0  ;;  %3066 = vmatmul.mubr.bf16.gmra.mxu0 %v10515_v30 }
 0x1b4   : > { %v2415_v17 = vadd.f32 %v2404_v57, %v10221_v11  ;;  %v1880_v60 = vpop.f32.mrf.mxu1  ;;  %9016 = vmatmul.mubr.bf16.gmra.mxu1 %v10574_v36  ;;  %v1153_v44 = vrot.slane %v809_v55, 7  ;;  %3075 = vmatprep.mubr.bf16.mxu0 %v12873_v6  ;;  %v10604_v55 = vld [vmem:[%s9979_s7 + $0x60] sm:$0xff]  }
 0x1b5   : > { %v2320_v1 = vrot.slane %v1880_v60, 7  ;;  %9019 = vmatprep.mubr.bf16.mxu1 %v10577_v43  ;;  %v10594_v34 = vadd.f32 %v10378_v27, %v1299_v41  ;;  %v811_v11 = vpop.f32.mrf.mxu0  ;;  %v10607_v41 = vld [vmem:[%s9979_s7 + $0x68] sm:$0xff]  }
 0x1b6   : > { %v10596_v3 = vadd.f32 %v2415_v17, %v1876_v46  ;;  %v1882_v14 = vpop.f32.mrf.mxu1  ;;  %v1191_v30 = vsel %vm1173_vm0, %v1152_v28, %v1153_v44 }
 0x1b7   : > { %12880 = vst [vmem:[#allocation26_spill] sm:$0xff] %v10594_v34  ;;  %v2403_v7 = vsel %vm1173_vm0, %v2319_v5, %v2320_v1  ;;  %v1300_v15 = vadd.f32 %v1191_v30, %v811_v11  ;;  %v813_v48 = vpop.f32.mrf.mxu0 }
 0x1b8   : > { %v2416_v53 = vadd.f32 %v2403_v7, %v10233_v33  ;;  %v1884_v57 = vpop.f32.mrf.mxu1  ;;  %v1154_v60 = vrot.slane %v813_v48, 7 }
 0x1b9   : > { %v2321_v27 = vrot.slane %v1884_v57, 7  ;;  %v10610_v46 = vadd.f32 %v10367_v23, %v1300_v15  ;;  %v815_v28 = vpop.f32.mrf.mxu0 }
 0x1ba   : > { %v10612_v17 = vadd.f32 %v2416_v53, %v1882_v14  ;;  %v1886_v34 = vpop.f32.mrf.mxu1  ;;  %v1190_v5 = vsel %vm1173_vm0, %v1153_v44, %v1154_v60 }
 0x1bb   : > { %v2402_v33 = vsel %vm1173_vm0, %v2320_v1, %v2321_v27  ;;  %v1301_v11 = vadd.f32 %v1190_v5, %v815_v28  ;;  %v819_v7 = vpop.f32.mrf.mxu0  ;;  %3076 = vmatmul.mubr.bf16.gmra.mxu0 %v10518_v39 }
 0x1bc   : > { %v2417_v30 = vadd.f32 %v2402_v33, %v10253_v51  ;;  %v1890_v48 = vpop.f32.mrf.mxu1  ;;  %9020 = vmatmul.mubr.bf16.gmra.mxu1 %v10604_v55  ;;  %v1155_v23 = vrot.slane %v819_v7, 7  ;;  %3085 = vmatprep.mubr.bf16.mxu0 %v12873_v6  ;;  %v10634_v7 = vld [vmem:[%s9979_s7 + $0x70] sm:$0xff]  }
 0x1bd   : > { %v2322_v14 = vrot.slane %v1890_v48, 7  ;;  %9023 = vmatprep.mubr.bf16.mxu1 %v10607_v41  ;;  %v10624_v44 = vadd.f32 %v10388_v21, %v1301_v11  ;;  %v821_v51 = vpop.f32.mrf.mxu0  ;;  %v10637_v11 = vld [vmem:[%s9979_s7 + $0x78] sm:$0xff]  }
 0x1be   : > { %v10626_v1 = vadd.f32 %v2417_v30, %v1886_v34  ;;  %v1892_v15 = vpop.f32.mrf.mxu1  ;;  %v1189_v39 = vsel %vm1173_vm0, %v1154_v60, %v1155_v23 }
 0x1bf   : > { %12881 = vst [vmem:[#allocation27_spill] sm:$0xff] %v10624_v44  ;;  %v2401_v53 = vsel %vm1173_vm0, %v2321_v27, %v2322_v14  ;;  %v1302_v57 = vadd.f32 %v1189_v39, %v821_v51  ;;  %v823_v5 = vpop.f32.mrf.mxu0 }
 0x1c0   : > { %v2418_v28 = vadd.f32 %v2401_v53, %v10264_v56  ;;  %v1894_v33 = vpop.f32.mrf.mxu1  ;;  %v1156_v48 = vrot.slane %v823_v5, 7 }
 0x1c1   : > { %v2323_v21 = vrot.slane %v1894_v33, 7  ;;  %v10640_v34 = vadd.f32 %v10403_v16, %v1302_v57  ;;  %v825_v60 = vpop.f32.mrf.mxu0 }
 0x1c2   : > { %v10642_v30 = vadd.f32 %v2418_v28, %v1892_v15  ;;  %v1896_v44 = vpop.f32.mrf.mxu1  ;;  %v1188_v27 = vsel %vm1173_vm0, %v1155_v23, %v1156_v48 }
 0x1c3   : > { %v2400_v56 = vsel %vm1173_vm0, %v2322_v14, %v2323_v21  ;;  %v1303_v51 = vadd.f32 %v1188_v27, %v825_v60  ;;  %v829_v53 = vpop.f32.mrf.mxu0  ;;  %3086 = vmatmul.mubr.bf16.gmra.mxu0 %v10544_v19 }
 0x1c4   : > { %v2419_v39 = vadd.f32 %v2400_v56, %v10285_v26  ;;  %v1900_v5 = vpop.f32.mrf.mxu1  ;;  %9024 = vmatmul.mubr.bf16.gmra.mxu1 %v10634_v7  ;;  %v1157_v16 = vrot.slane %v829_v53, 7  ;;  %3095 = vmatprep.mubr.bf16.mxu0 %v12873_v6  ;;  %v10664_v53 = vld [vmem:[%s9979_s7 + $0x80] sm:$0xff]  }
 0x1c5   : > { %v2324_v15 = vrot.slane %v1900_v5, 7  ;;  %9027 = vmatprep.mubr.bf16.mxu1 %v10637_v11  ;;  %v10654_v23 = vadd.f32 %v10407_v25, %v1303_v51  ;;  %v831_v26 = vpop.f32.mrf.mxu0  ;;  %v10667_v51 = vld [vmem:[%s9979_s7 + $0x88] sm:$0xff]  }
 0x1c6   : > { %v10656_v14 = vadd.f32 %v2419_v39, %v1896_v44  ;;  %v1902_v57 = vpop.f32.mrf.mxu1  ;;  %v1187_v19 = vsel %vm1173_vm0, %v1156_v48, %v1157_v16 }
 0x1c7   : > { %12882 = vst [vmem:[#allocation28_spill] sm:$0xff] %v10654_v23  ;;  %v2399_v28 = vsel %vm1173_vm0, %v2323_v21, %v2324_v15  ;;  %v1304_v33 = vadd.f32 %v1187_v19, %v831_v26  ;;  %v833_v27 = vpop.f32.mrf.mxu0 }
 0x1c8   : > { %v2420_v60 = vadd.f32 %v2399_v28, %v10297_v9  ;;  %v1904_v56 = vpop.f32.mrf.mxu1  ;;  %v1158_v5 = vrot.slane %v833_v27, 7 }
 0x1c9   : > { %v2325_v25 = vrot.slane %v1904_v56, 7  ;;  %v10670_v44 = vadd.f32 %v10397_v10, %v1304_v33  ;;  %v835_v48 = vpop.f32.mrf.mxu0 }
 0x1ca   : > { %v10672_v39 = vadd.f32 %v2420_v60, %v1902_v57  ;;  %v1906_v23 = vpop.f32.mrf.mxu1  ;;  %v1186_v21 = vsel %vm1173_vm0, %v1157_v16, %v1158_v5 }
 0x1cb   : > { %v2398_v9 = vsel %vm1173_vm0, %v2324_v15, %v2325_v25  ;;  %v1305_v26 = vadd.f32 %v1186_v21, %v835_v48  ;;  %v839_v28 = vpop.f32.mrf.mxu0  ;;  %3096 = vmatmul.mubr.bf16.gmra.mxu0 %v10547_v52 }
 0x1cc   : > { %v2421_v19 = vadd.f32 %v2398_v9, %v10318_v62  ;;  %v1910_v27 = vpop.f32.mrf.mxu1  ;;  %9028 = vmatmul.mubr.bf16.gmra.mxu1 %v10664_v53  ;;  %v1159_v10 = vrot.slane %v839_v28, 7  ;;  %3105 = vmatprep.mubr.bf16.mxu0 %v12873_v6  ;;  %v10694_v28 = vld [vmem:[%s9979_s7 + $0x90] sm:$0xff]  }
 0x1cd   : > { %v2326_v57 = vrot.slane %v1910_v27, 7  ;;  %9031 = vmatprep.mubr.bf16.mxu1 %v10667_v51  ;;  %v10684_v16 = vadd.f32 %v10417_v20, %v1305_v26  ;;  %v841_v62 = vpop.f32.mrf.mxu0  ;;  %v10697_v26 = vld [vmem:[%s9979_s7 + $0x98] sm:$0xff]  }
 0x1ce   : > { %v10686_v15 = vadd.f32 %v2421_v19, %v1906_v23  ;;  %v1912_v33 = vpop.f32.mrf.mxu1  ;;  %v1185_v52 = vsel %vm1173_vm0, %v1158_v5, %v1159_v10 }
 0x1cf   : > { %12883 = vst [vmem:[#allocation29_spill] sm:$0xff] %v10684_v16  ;;  %v2397_v60 = vsel %vm1173_vm0, %v2325_v25, %v2326_v57  ;;  %v1306_v56 = vadd.f32 %v1185_v52, %v841_v62  ;;  %v843_v21 = vpop.f32.mrf.mxu0 }
 0x1d0   : > { %v2422_v48 = vadd.f32 %v2397_v60, %v10330_v32  ;;  %v1914_v9 = vpop.f32.mrf.mxu1  ;;  %v1160_v27 = vrot.slane %v843_v21, 7 }
 0x1d1   : > { %v2327_v20 = vrot.slane %v1914_v9, 7  ;;  %v10700_v23 = vadd.f32 %v10431_v12, %v1306_v56  ;;  %v845_v5 = vpop.f32.mrf.mxu0 }
 0x1d2   : > { %v10702_v19 = vadd.f32 %v2422_v48, %v1912_v33  ;;  %v1916_v16 = vpop.f32.mrf.mxu1  ;;  %v1184_v25 = vsel %vm1173_vm0, %v1159_v10, %v1160_v27 }
 0x1d3   : > { %v2396_v32 = vsel %vm1173_vm0, %v2326_v57, %v2327_v20  ;;  %v1307_v62 = vadd.f32 %v1184_v25, %v845_v5  ;;  %v849_v60 = vpop.f32.mrf.mxu0  ;;  %3106 = vmatmul.mubr.bf16.gmra.mxu0 %v10574_v36 }
 0x1d4   : > { %v2423_v52 = vadd.f32 %v2396_v32, %v10351_v24  ;;  %v1920_v21 = vpop.f32.mrf.mxu1  ;;  %9032 = vmatmul.mubr.bf16.gmra.mxu1 %v10694_v28  ;;  %v1161_v12 = vrot.slane %v849_v60, 7  ;;  %3115 = vmatprep.mubr.bf16.mxu0 %v12873_v6  ;;  %v10724_v60 = vld [vmem:[%s9979_s7 + $0xa0] sm:$0xff]  }
 0x1d5   : > { %v2328_v33 = vrot.slane %v1920_v21, 7  ;;  %9035 = vmatprep.mubr.bf16.mxu1 %v10697_v26  ;;  %v10714_v10 = vadd.f32 %v10435_v45, %v1307_v62  ;;  %v851_v24 = vpop.f32.mrf.mxu0  ;;  %v10727_v62 = vld [vmem:[%s9979_s7 + $0xa8] sm:$0xff]  }
 0x1d6   : > { %v10716_v57 = vadd.f32 %v2423_v52, %v1916_v16  ;;  %v1922_v56 = vpop.f32.mrf.mxu1  ;;  %v1183_v36 = vsel %vm1173_vm0, %v1160_v27, %v1161_v12 }
 0x1d7   : > { %12884 = vst [vmem:[#allocation30_spill] sm:$0xff] %v10714_v10  ;;  %v2395_v48 = vsel %vm1173_vm0, %v2327_v20, %v2328_v33  ;;  %v1308_v9 = vadd.f32 %v1183_v36, %v851_v24  ;;  %v853_v25 = vpop.f32.mrf.mxu0 }
 0x1d8   : > { %v2424_v5 = vadd.f32 %v2395_v48, %v10361_v50  ;;  %v1924_v32 = vpop.f32.mrf.mxu1  ;;  %v1162_v21 = vrot.slane %v853_v25, 7 }
 0x1d9   : > { %v2329_v45 = vrot.slane %v1924_v32, 7  ;;  %v10730_v16 = vadd.f32 %v10426_v22, %v1308_v9  ;;  %v855_v27 = vpop.f32.mrf.mxu0 }
 0x1da   : > { %v10732_v52 = vadd.f32 %v2424_v5, %v1922_v56  ;;  %v1926_v10 = vpop.f32.mrf.mxu1  ;;  %v1182_v20 = vsel %vm1173_vm0, %v1161_v12, %v1162_v21 }
 0x1db   : > { %v2394_v50 = vsel %vm1173_vm0, %v2328_v33, %v2329_v45  ;;  %v1309_v24 = vadd.f32 %v1182_v20, %v855_v27  ;;  %v859_v48 = vpop.f32.mrf.mxu0  ;;  %3116 = vmatmul.mubr.bf16.gmra.mxu0 %v10577_v43 }
 0x1dc   : > { %v2425_v36 = vadd.f32 %v2394_v50, %v10381_v31  ;;  %v1930_v25 = vpop.f32.mrf.mxu1  ;;  %9036 = vmatmul.mubr.bf16.gmra.mxu1 %v10724_v60  ;;  %v1163_v22 = vrot.slane %v859_v48, 7  ;;  %3125 = vmatprep.mubr.bf16.mxu0 %v12873_v6  ;;  %v10754_v48 = vld [vmem:[%s9979_s7 + $0xb0] sm:$0xff]  }
 0x1dd   : > { %v2330_v56 = vrot.slane %v1930_v25, 7  ;;  %9039 = vmatprep.mubr.bf16.mxu1 %v10727_v62  ;;  %v10744_v12 = vadd.f32 %v10446_v63, %v1309_v24  ;;  %v861_v31 = vpop.f32.mrf.mxu0  ;;  %v10757_v24 = vld [vmem:[%s9979_s7 + $0xb8] sm:$0xff]  }
 0x1de   : > { %v10746_v33 = vadd.f32 %v2425_v36, %v1926_v10  ;;  %v1932_v9 = vpop.f32.mrf.mxu1  ;;  %v1181_v43 = vsel %vm1173_vm0, %v1162_v21, %v1163_v22 }
 0x1df   : > { %12885 = vst [vmem:[#allocation31_spill] sm:$0xff] %v10744_v12  ;;  %v2393_v5 = vsel %vm1173_vm0, %v2329_v45, %v2330_v56  ;;  %v1310_v32 = vadd.f32 %v1181_v43, %v861_v31  ;;  %v863_v20 = vpop.f32.mrf.mxu0 }
 0x1e0   : > { %v2426_v27 = vadd.f32 %v2393_v5, %v10391_v2  ;;  %v1934_v50 = vpop.f32.mrf.mxu1  ;;  %v1164_v25 = vrot.slane %v863_v20, 7 }
 0x1e1   : > { %v2331_v63 = vrot.slane %v1934_v50, 7  ;;  %v10760_v10 = vadd.f32 %v10460_v59, %v1310_v32  ;;  %v865_v21 = vpop.f32.mrf.mxu0 }
 0x1e2   : > { %v10762_v36 = vadd.f32 %v2426_v27, %v1932_v9  ;;  %v10764_v12 = vpop.f32.mrf.mxu1  ;;  %v1180_v45 = vsel %vm1173_vm0, %v1163_v22, %v1164_v25 }
 0x1e3   : > { %12886 = vst [vmem:[#allocation32_spill] sm:$0xff] %v10760_v10  ;;  %v2392_v2 = vsel %vm1173_vm0, %v2330_v56, %v2331_v63  ;;  %v1311_v31 = vadd.f32 %v1180_v45, %v865_v21  ;;  %v869_v5 = vpop.f32.mrf.mxu0  ;;  %3126 = vmatmul.mubr.bf16.gmra.mxu0 %v10604_v55  ;;  %v10789_v10 = vld [vmem:[%s9979_s7 + $0xc8] sm:$0xff]  }
 0x1e4   : > { %v10771_v43 = vadd.f32 %v2392_v2, %v10410_v8  ;;  %v1940_v20 = vpop.f32.mrf.mxu1  ;;  %9040 = vmatmul.mubr.bf16.gmra.mxu1 %v10754_v48  ;;  %v1165_v59 = vrot.slane %v869_v5, 7  ;;  %3135 = vmatprep.mubr.bf16.mxu0 %v12873_v6  ;;  %v10786_v2 = vld [vmem:[%s9979_s7 + $0xc0] sm:$0xff]   ;;  %12889 = vst [vmem:[#allocation35_spill] sm:$0xff] %v10789_v10 }
 0x1e5   : > { %v2332_v9 = vrot.slane %v1940_v20, 7  ;;  %9043 = vmatprep.mubr.bf16.mxu1 %v10757_v24  ;;  %v10778_v22 = vadd.f32 %v10464_v58, %v1311_v31  ;;  %v871_v56 = vpop.f32.mrf.mxu0  ;;  %12888 = vst [vmem:[#allocation34_spill] sm:$0xff] %v10786_v2 }
 0x1e6   : > { %v1942_v8 = vpop.f32.mrf.mxu1  ;;  %v1179_v32 = vsel %vm1173_vm0, %v1164_v25, %v1165_v59 }
 0x1e7   : > { %12887 = vst [vmem:[#allocation33_spill] sm:$0xff] %v10778_v22  ;;  %v2391_v55 = vsel %vm1173_vm0, %v2331_v63, %v2332_v9  ;;  %v1312_v27 = vadd.f32 %v1179_v32, %v871_v56  ;;  %v873_v21 = vpop.f32.mrf.mxu0 }
 0x1e8   : > { %v2428_v50 = vadd.f32 %v2391_v55, %v10420_v18  ;;  %v1944_v45 = vpop.f32.mrf.mxu1  ;;  %v1166_v5 = vrot.slane %v873_v21, 7 }
 0x1e9   : > { %v2333_v20 = vrot.slane %v1944_v45, 7  ;;  %v10792_v58 = vadd.f32 %v10455_v54, %v1312_v27  ;;  %v875_v25 = vpop.f32.mrf.mxu0  ;;  %v12892_v45 = vld [vmem:[#allocation16_spill] sm:$0xff] }
 0x1ea   : > { %v10794_v31 = vadd.f32 %v2428_v50, %v1942_v8  ;;  %v10796_v22 = vpop.f32.mrf.mxu1  ;;  %v1178_v63 = vsel %vm1173_vm0, %v1165_v59, %v1166_v5 }
 0x1eb   : > { %12890 = vst [vmem:[#allocation36_spill] sm:$0xff] %v10792_v58  ;;  %v2390_v18 = vsel %vm1173_vm0, %v2332_v9, %v2333_v20  ;;  %v1313_v56 = vadd.f32 %v1178_v63, %v875_v25  ;;  %v879_v55 = vpop.f32.mrf.mxu0  ;;  %3136 = vmatmul.mubr.bf16.gmra.mxu0 %v10607_v41 }
 0x1ec   : > { %v10803_v32 = vadd.f32 %v2390_v18, %v10438_v13  ;;  %v1950_v21 = vpop.f32.mrf.mxu1  ;;  %9044 = vmatmul.mubr.bf16.gmra.mxu1 %v10786_v2  ;;  %v1167_v54 = vrot.slane %v879_v55, 7  ;;  %3145 = vmatprep.mubr.bf16.mxu0 %v12873_v6  ;;  %v10818_v55 = vld [vmem:[%s9979_s7 + $0xd0] sm:$0xff]   ;;  %s9737_s7 = scalar_lea.vmem %s12784_s10, 2048 }
 0x1ed   : > { %v2334_v8 = vrot.slane %v1950_v21, 7  ;;  %9047 = vmatprep.mubr.bf16.mxu1 %v10789_v10  ;;  %v10810_v59 = vadd.f32 %v10477_v38, %v1313_v56  ;;  %v881_v9 = vpop.f32.mrf.mxu0  ;;  %12893 = vst [vmem:[#allocation16_spill] sm:$0xff] %v10818_v55  ;;  %p9738_p11 = scmp.ne.s32.totalorder %s12784_s10, %s9737_s7  ;;  %p9745_p12 = scmp.lt.s32.totalorder %s9743_s26, %s9737_s7 }
 0x1ee   : > { %v1952_v27 = vpop.f32.mrf.mxu1  ;;  %v1177_v13 = vsel %vm1173_vm0, %v1166_v5, %v1167_v54 }
 0x1ef   : > { %12891 = vst [vmem:[#allocation37_spill] sm:$0xff] %v10810_v59  ;;  %v2389_v50 = vsel %vm1173_vm0, %v2333_v20, %v2334_v8  ;;  %v1314_v41 = vadd.f32 %v1177_v13, %v881_v9  ;;  %v883_v63 = vpop.f32.mrf.mxu0  ;;  %p9739_p1 = pnand %p9738_p11, %p12976_p10  ;;  %p9746_p7 = por %p9745_p12, %p9744_p6 }
 0x1f0   : > { %v2430_v25 = vadd.f32 %v2389_v50, %v12892_v45  ;;  %v1954_v18 = vpop.f32.mrf.mxu1  ;;  %v1168_v21 = vrot.slane %v883_v63, 7 }
 0x1f1   : > { %v2335_v10 = vrot.slane %v1954_v18, 7  ;;  %v10821_v38 = vadd.f32 %v10500_v40, %v1314_v41  ;;  %v885_v59 = vpop.f32.mrf.mxu0  ;;  %p9740_p2 = pneg %p9739_p1 }
 0x1f2   : > { %v10823_v56 = vadd.f32 %v2430_v25, %v1952_v27  ;;  %v10825_v58 = vpop.f32.mrf.mxu1  ;;  %v1176_v5 = vsel %vm1173_vm0, %v1167_v54, %v1168_v21  ;;  %v12896_v25 = vld [vmem:[#allocation17_spill] sm:$0xff] }
 0x1f3   : > { %12894 = vst [vmem:[#allocation38_spill] sm:$0xff] %v10821_v38  ;;  %v2388_v20 = vsel %vm1173_vm0, %v2334_v8, %v2335_v10  ;;  %v1315_v9 = vadd.f32 %v1176_v5, %v885_v59  ;;  %v889_v50 = vpop.f32.mrf.mxu0  ;;  %3146 = vmatmul.mubr.bf16.gmra.mxu0 %v10634_v7  ;;  %v12899_v38 = vld [vmem:[#allocation13_spill] sm:$0xff]  ;;  %p9747_p9 = pnand %p9746_p7, %p9740_p2 }
 0x1f4   : > { %v10832_v13 = vadd.f32 %v2388_v20, %v10467_v4  ;;  %v1960_v45 = vpop.f32.mrf.mxu1  ;;  %9048 = vmatmul.mubr.bf16.gmra.mxu1 %v10818_v55  ;;  %v1169_v40 = vrot.slane %v889_v50, 7  ;;  %3155 = vmatprep.mubr.bf16.mxu0 %v12873_v6 }
 0x1f5   : > { %v2336_v27 = vrot.slane %v1960_v45, 7  ;;  %4647 = vmatprep.mubr.bf16.mxu1 %v12873_v6  ;;  %v10839_v54 = vadd.f32 %v10504_v35, %v1315_v9  ;;  %v891_v8 = vpop.f32.mrf.mxu0  ;;  %v12897_v45 = vld [vmem:[#allocation18_spill] sm:$0xff] }
 0x1f6   : > { %v1962_v59 = vpop.f32.mrf.mxu1  ;;  %v1175_v4 = vsel %vm1173_vm0, %v1168_v21, %v1169_v40  ;;  %v12900_v21 = vrot.slane %v12899_v38, 7 }
 0x1f7   : > { %12895 = vst [vmem:[#allocation39_spill] sm:$0xff] %v10839_v54  ;;  %v2387_v41 = vsel %vm1173_vm0, %v2335_v10, %v2336_v27  ;;  %v1316_v7 = vadd.f32 %v1175_v4, %v891_v8  ;;  %v893_v18 = vpop.f32.mrf.mxu0 }
 0x1f8   : > { %v2432_v63 = vadd.f32 %v2387_v41, %v12896_v25  ;;  %v1964_v5 = vpop.f32.mrf.mxu1  ;;  %v1170_v20 = vrot.slane %v893_v18, 7  ;;  %v12901_v41 = vld [vmem:[#allocation14_spill] sm:$0xff]  ;;  %v12902_v18 = vld [vmem:[#allocation21_spill] sm:$0xff] }
 0x1f9   : > { %v2337_v50 = vrot.slane %v1964_v5, 7  ;;  %v10847_v55 = vadd.f32 %v12897_v45, %v1316_v7  ;;  %v895_v9 = vpop.f32.mrf.mxu0  ;;  %v12903_v45 = vld [vmem:[#allocation19_spill] sm:$0xff] }
 0x1fa   : > { %v10849_v35 = vadd.f32 %v2432_v63, %v1962_v59  ;;  %v10851_v54 = vpop.f32.mrf.mxu1  ;;  %v1221_v10 = vsel %vm1173_vm0, %v1170_v20, %v12900_v21  ;;  %v1174_v8 = vsel %vm1173_vm0, %v1169_v40, %v1170_v20 }
 0x1fb   : > { %12898 = vst [vmem:[#allocation17_spill] sm:$0xff] %v10847_v55  ;;  %v2386_v4 = vsel %vm1173_vm0, %v2336_v27, %v2337_v50  ;;  %v1270_v25 = vadd.f32 %v1221_v10, %v12901_v41  ;;  %v1317_v7 = vadd.f32 %v1174_v8, %v895_v9  ;;  %v8941_v5 = vpop.f32.mrf.mxu0  ;;  %3156 = vmatmul.mubr.bf16.gmra.mxu0 %v10637_v11  ;;  %v12906_v27 = vld [vmem:[#allocation15_spill] sm:$0xff] }
 0x1fc   : > { %v10863_v59 = vadd.f32 %v2386_v4, %v12902_v18  ;;  %v1970_v63 = vpop.f32.mrf.mxu1  ;;  %3165 = vmatprep.mubr.bf16.mxu0 %v12873_v6  ;;  %v12908_v10 = vld [vmem:[#allocation23_spill] sm:$0xff]  ;;  %v2508_v11 = vrot.slane %v8941_v5, 1 }
 0x1fd   : > { %v2338_v38 = vrot.slane %v1970_v63, 7  ;;  %v10868_v21 = vadd.f32 %v12903_v45, %v1317_v7  ;;  %v10870_v20 = vpop.f32.mrf.mxu0  ;;  %v10873_v55 = vadd.f32 %v12906_v27, %v1270_v25 }
 0x1fe   : > { %v1972_v40 = vpop.f32.mrf.mxu1  ;;  %12905 = vst [vmem:[#allocation13_spill] sm:$0xff] %v10870_v20 }
 0x1ff   : > { %12904 = vst [vmem:[#allocation18_spill] sm:$0xff] %v10868_v21  ;;  %12907 = vst [vmem:[#allocation14_spill] sm:$0xff] %v10873_v55  ;;  %v2385_v9 = vsel %vm1173_vm0, %v2337_v50, %v2338_v38  ;;  %v8942_v41 = vpop.f32.mrf.mxu0  ;;  %v12848_v21 = vrot.slane %v10870_v20, 1 }
 0x200   : > { %v2434_v8 = vadd.f32 %v2385_v9, %v12908_v10  ;;  %v1974_v4 = vpop.f32.mrf.mxu1  ;;  %v2509_v63 = vrot.slane %v8942_v41, 1 }
 0x201   : > { %v2339_v18 = vrot.slane %v1974_v4, 7  ;;  %v2126_v45 = vpop.f32.mrf.mxu0 }
 0x202   : > { %v10878_v2 = vadd.f32 %v2434_v8, %v1972_v40  ;;  %v10880_v7 = vpop.f32.mrf.mxu1  ;;  %v2598_v25 = vsel %vm1366_vm1, %v2508_v11, %v2509_v63  ;;  %v2507_v27 = vrot.slane %v2126_v45, 1  ;;  %v12911_v45 = vld [vmem:[#allocation24_spill] sm:$0xff] }
 0x203   : > { %v2384_v50 = vsel %vm1173_vm0, %v2338_v38, %v2339_v18  ;;  %v8945_v10 = vpop.f32.mrf.mxu0  ;;  %3166 = vmatmul.mubr.bf16.gmra.mxu0 %v10664_v53  ;;  %v10892_v40 = vadd.f32 %v2598_v25, %v10552_v29 }
 0x204   : > { %v10888_v9 = vadd.f32 %v2384_v50, %v10534_v49  ;;  %v1980_v5 = vpop.f32.mrf.mxu1  ;;  %v2599_v8 = vsel %vm1366_vm1, %v2507_v27, %v2508_v11  ;;  %v10900_v4 = vsel %vm1366_vm1, %v12848_v21, %v2507_v27  ;;  %3175 = vmatprep.mubr.bf16.mxu0 %v12873_v6  ;;  %v2512_v20 = vrot.slane %v8945_v10, 1 }
 0x205   : > { %12909 = vst [vmem:[#allocation21_spill] sm:$0xff] %v10892_v40  ;;  %12910 = vst [vmem:[#allocation19_spill] sm:$0xff] %v10900_v4  ;;  %v2340_v38 = vrot.slane %v1980_v5, 7  ;;  %v2139_v41 = vpop.f32.mrf.mxu0  ;;  %v10904_v50 = vadd.f32 %v2599_v8, %v12911_v45 }
 0x206   : > { %v1982_v49 = vpop.f32.mrf.mxu1  ;;  %v2510_v53 = vrot.slane %v2139_v41, 1  ;;  %v12913_v41 = vld [vmem:[#allocation25_spill] sm:$0xff] }
 0x207   : > { %v2383_v29 = vsel %vm1173_vm0, %v2339_v18, %v2340_v38  ;;  %v8946_v40 = vpop.f32.mrf.mxu0 }
 0x208   : > { %v2436_v11 = vadd.f32 %v2383_v29, %v10550_v42  ;;  %v1984_v25 = vpop.f32.mrf.mxu1  ;;  %v2597_v27 = vsel %vm1366_vm1, %v2509_v63, %v2510_v53  ;;  %v2513_v21 = vrot.slane %v8946_v40, 1 }
 0x209   : > { %v2341_v5 = vrot.slane %v1984_v25, 7  ;;  %v2142_v8 = vpop.f32.mrf.mxu0  ;;  %v10916_v45 = vadd.f32 %v2597_v27, %v10566_v0 }
 0x20a   : > { %v10911_v4 = vadd.f32 %v2436_v11, %v1982_v49  ;;  %v10913_v55 = vpop.f32.mrf.mxu1  ;;  %v2594_v18 = vsel %vm1366_vm1, %v2512_v20, %v2513_v21  ;;  %v2511_v10 = vrot.slane %v2142_v8, 1 }
 0x20b   : > { %12912 = vst [vmem:[#allocation15_spill] sm:$0xff] %v10916_v45  ;;  %v2382_v42 = vsel %vm1173_vm0, %v2340_v38, %v2341_v5  ;;  %v8949_v40 = vpop.f32.mrf.mxu0  ;;  %3176 = vmatmul.mubr.bf16.gmra.mxu0 %v10667_v51  ;;  %v10927_v49 = vadd.f32 %v2594_v18, %v10612_v17 }
 0x20c   : > { %v10923_v29 = vadd.f32 %v2382_v42, %v12913_v41  ;;  %v1990_v63 = vpop.f32.mrf.mxu1  ;;  %v2595_v0 = vsel %vm1366_vm1, %v2511_v10, %v2512_v20  ;;  %3185 = vmatprep.mubr.bf16.mxu0 %v12873_v6  ;;  %v2596_v38 = vsel %vm1366_vm1, %v2510_v53, %v2511_v10 }
 0x20d   : > { %12914 = vst [vmem:[#allocation23_spill] sm:$0xff] %v10927_v49  ;;  %v2342_v11 = vrot.slane %v1990_v63, 7  ;;  %v2155_v27 = vpop.f32.mrf.mxu0  ;;  %v10935_v8 = vadd.f32 %v2596_v38, %v10582_v61  ;;  %v10938_v42 = vadd.f32 %v2595_v0, %v10596_v3  ;;  %v2516_v63 = vrot.slane %v8949_v40, 1  ;;  %v12915_v38 = vld [vmem:[#allocation26_spill] sm:$0xff] }
 0x20e   : > { %v1992_v25 = vpop.f32.mrf.mxu1  ;;  %v2514_v51 = vrot.slane %v2155_v27, 1 }
 0x20f   : > { %v2381_v17 = vsel %vm1173_vm0, %v2341_v5, %v2342_v11  ;;  %v8950_v41 = vpop.f32.mrf.mxu0 }
 0x210   : > { %v2438_v20 = vadd.f32 %v2381_v17, %v10580_v47  ;;  %v1994_v18 = vpop.f32.mrf.mxu1  ;;  %v2593_v53 = vsel %vm1366_vm1, %v2513_v21, %v2514_v51  ;;  %v2517_v49 = vrot.slane %v8950_v41, 1 }
 0x211   : > { %v2343_v10 = vrot.slane %v1994_v18, 7  ;;  %v2158_v3 = vpop.f32.mrf.mxu0  ;;  %v10950_v0 = vadd.f32 %v2593_v53, %v10626_v1 }
 0x212   : > { %v10945_v45 = vadd.f32 %v2438_v20, %v1992_v25  ;;  %v10947_v61 = vpop.f32.mrf.mxu1  ;;  %v2590_v5 = vsel %vm1366_vm1, %v2516_v63, %v2517_v49  ;;  %v2515_v40 = vrot.slane %v2158_v3, 1 }
 0x213   : > { %v2380_v47 = vsel %vm1173_vm0, %v2342_v11, %v2343_v10  ;;  %v8953_v17 = vpop.f32.mrf.mxu0  ;;  %3186 = vmatmul.mubr.bf16.gmra.mxu0 %v10694_v28  ;;  %v10961_v25 = vadd.f32 %v2590_v5, %v10672_v39 }
 0x214   : > { %v10957_v27 = vadd.f32 %v2380_v47, %v12915_v38  ;;  %v2000_v21 = vpop.f32.mrf.mxu1  ;;  %v2591_v1 = vsel %vm1366_vm1, %v2515_v40, %v2516_v63  ;;  %3195 = vmatprep.mubr.bf16.mxu0 %v12873_v6  ;;  %v2592_v11 = vsel %vm1366_vm1, %v2514_v51, %v2515_v40  ;;  %v2520_v38 = vrot.slane %v8953_v17, 1 }
 0x215   : > { %12916 = vst [vmem:[#allocation24_spill] sm:$0xff] %v10961_v25  ;;  %v2344_v20 = vrot.slane %v2000_v21, 7  ;;  %v2171_v41 = vpop.f32.mrf.mxu0  ;;  %v10969_v53 = vadd.f32 %v2592_v11, %v10642_v30  ;;  %v10972_v3 = vadd.f32 %v2591_v1, %v10656_v14  ;;  %v12917_v11 = vld [vmem:[#allocation27_spill] sm:$0xff] }
 0x216   : > { %v2002_v18 = vpop.f32.mrf.mxu1  ;;  %v2518_v28 = vrot.slane %v2171_v41, 1 }
 0x217   : > { %v2379_v39 = vsel %vm1173_vm0, %v2343_v10, %v2344_v20  ;;  %v8954_v47 = vpop.f32.mrf.mxu0 }
 0x218   : > { %v2440_v63 = vadd.f32 %v2379_v39, %v10610_v46  ;;  %v2004_v5 = vpop.f32.mrf.mxu1  ;;  %v2589_v51 = vsel %vm1366_vm1, %v2517_v49, %v2518_v28  ;;  %v2521_v21 = vrot.slane %v8954_v47, 1 }
 0x219   : > { %v2345_v40 = vrot.slane %v2004_v5, 7  ;;  %v2174_v14 = vpop.f32.mrf.mxu0  ;;  %v10984_v1 = vadd.f32 %v2589_v51, %v10686_v15 }
 0x21a   : > { %v10979_v25 = vadd.f32 %v2440_v63, %v2002_v18  ;;  %v10981_v30 = vpop.f32.mrf.mxu1  ;;  %v2586_v10 = vsel %vm1366_vm1, %v2520_v38, %v2521_v21  ;;  %v2519_v17 = vrot.slane %v2174_v14, 1 }
 0x21b   : > { %v2378_v46 = vsel %vm1173_vm0, %v2344_v20, %v2345_v40  ;;  %v8957_v39 = vpop.f32.mrf.mxu0  ;;  %3196 = vmatmul.mubr.bf16.gmra.mxu0 %v10697_v26  ;;  %v10995_v18 = vadd.f32 %v2586_v10, %v10732_v52 }
 0x21c   : > { %v10991_v41 = vadd.f32 %v2378_v46, %v12917_v11  ;;  %v2010_v49 = vpop.f32.mrf.mxu1  ;;  %v2587_v15 = vsel %vm1366_vm1, %v2519_v17, %v2520_v38  ;;  %3205 = vmatprep.mubr.bf16.mxu0 %v12873_v6  ;;  %v2588_v20 = vsel %vm1366_vm1, %v2518_v28, %v2519_v17  ;;  %v2524_v11 = vrot.slane %v8957_v39, 1 }
 0x21d   : > { %12918 = vst [vmem:[#allocation25_spill] sm:$0xff] %v10995_v18  ;;  %v2346_v63 = vrot.slane %v2010_v49, 7  ;;  %v2187_v47 = vpop.f32.mrf.mxu0  ;;  %v11003_v51 = vadd.f32 %v2588_v20, %v10702_v19  ;;  %v11006_v14 = vadd.f32 %v2587_v15, %v10716_v57  ;;  %v12919_v20 = vld [vmem:[#allocation28_spill] sm:$0xff] }
 0x21e   : > { %v2012_v5 = vpop.f32.mrf.mxu1  ;;  %v2522_v52 = vrot.slane %v2187_v47, 1 }
 0x21f   : > { %v2377_v26 = vsel %vm1173_vm0, %v2345_v40, %v2346_v63  ;;  %v8958_v46 = vpop.f32.mrf.mxu0 }
 0x220   : > { %v2442_v38 = vadd.f32 %v2377_v26, %v10640_v34  ;;  %v2014_v10 = vpop.f32.mrf.mxu1  ;;  %v2585_v28 = vsel %vm1366_vm1, %v2521_v21, %v2522_v52  ;;  %v2525_v49 = vrot.slane %v8958_v46, 1  ;;  %v2475_v21 = vadd.f32 %v10771_v43, %v10764_v12 }
 0x221   : > { %v2347_v17 = vrot.slane %v2014_v10, 7  ;;  %v2190_v57 = vpop.f32.mrf.mxu0  ;;  %v11018_v15 = vadd.f32 %v2585_v28, %v10746_v33 }
 0x222   : > { %v11013_v18 = vadd.f32 %v2442_v38, %v2012_v5  ;;  %v11015_v19 = vpop.f32.mrf.mxu1  ;;  %v2582_v40 = vsel %vm1366_vm1, %v2524_v11, %v2525_v49  ;;  %v2523_v39 = vrot.slane %v2190_v57, 1 }
 0x223   : > { %v2376_v34 = vsel %vm1173_vm0, %v2346_v63, %v2347_v17  ;;  %v8961_v26 = vpop.f32.mrf.mxu0  ;;  %3206 = vmatmul.mubr.bf16.gmra.mxu0 %v10724_v60  ;;  %v11031_v33 = vadd.f32 %v2582_v40, %v10794_v31 }
 0x224   : > { %v11027_v47 = vadd.f32 %v2376_v34, %v12919_v20  ;;  %v2020_v5 = vpop.f32.mrf.mxu1  ;;  %v2583_v38 = vsel %vm1366_vm1, %v2523_v39, %v2524_v11  ;;  %3215 = vmatprep.mubr.bf16.mxu0 %v12873_v6  ;;  %v2584_v63 = vsel %vm1366_vm1, %v2522_v52, %v2523_v39  ;;  %v2477_v11 = vadd.f32 %v10803_v32, %v10796_v22 }
 0x225   : > { %v2348_v10 = vrot.slane %v2020_v5, 7  ;;  %v2203_v43 = vpop.f32.mrf.mxu0  ;;  %v11039_v46 = vadd.f32 %v2584_v63, %v10762_v36  ;;  %v11041_v28 = vadd.f32 %v2583_v38, %v2475_v21  ;;  %v2528_v20 = vrot.slane %v8961_v26, 1 }
 0x226   : > { %v2022_v12 = vpop.f32.mrf.mxu1  ;;  %v2526_v31 = vrot.slane %v2203_v43, 1  ;;  %v2479_v26 = vadd.f32 %v10832_v13, %v10825_v58 }
 0x227   : > { %v2375_v60 = vsel %vm1173_vm0, %v2347_v17, %v2348_v10  ;;  %v8962_v34 = vpop.f32.mrf.mxu0 }
 0x228   : > { %v2444_v57 = vadd.f32 %v2375_v60, %v10670_v44  ;;  %v2024_v40 = vpop.f32.mrf.mxu1  ;;  %v2581_v52 = vsel %vm1366_vm1, %v2525_v49, %v2526_v31  ;;  %v2529_v36 = vrot.slane %v8962_v34, 1  ;;  %v12920_v49 = vld [vmem:[#allocation29_spill] sm:$0xff] }
 0x229   : > { %v2349_v39 = vrot.slane %v2024_v40, 7  ;;  %v2206_v38 = vpop.f32.mrf.mxu0  ;;  %v11054_v17 = vadd.f32 %v2581_v52, %v2477_v11 }
 0x22a   : > { %v11050_v5 = vadd.f32 %v2444_v57, %v2022_v12  ;;  %v11052_v21 = vpop.f32.mrf.mxu1  ;;  %v2578_v22 = vsel %vm1366_vm1, %v2528_v20, %v2529_v36  ;;  %v2527_v32 = vrot.slane %v2206_v38, 1 }
 0x22b   : > { %v2374_v44 = vsel %vm1173_vm0, %v2348_v10, %v2349_v39  ;;  %v8965_v43 = vpop.f32.mrf.mxu0  ;;  %3216 = vmatmul.mubr.bf16.gmra.mxu0 %v10727_v62  ;;  %v11067_v60 = vadd.f32 %v2578_v22, %v10849_v35 }
 0x22c   : > { %v11063_v63 = vadd.f32 %v2374_v44, %v12920_v49  ;;  %v2030_v12 = vpop.f32.mrf.mxu1  ;;  %v2579_v11 = vsel %vm1366_vm1, %v2527_v32, %v2528_v20  ;;  %3225 = vmatprep.mubr.bf16.mxu0 %v12873_v6  ;;  %v2580_v10 = vsel %vm1366_vm1, %v2526_v31, %v2527_v32  ;;  %v2481_v20 = vadd.f32 %v10863_v59, %v10851_v54 }
 0x22d   : > { %v2350_v57 = vrot.slane %v2030_v12, 7  ;;  %v2219_v13 = vpop.f32.mrf.mxu0  ;;  %v11075_v40 = vadd.f32 %v2580_v10, %v10823_v56  ;;  %v11077_v34 = vadd.f32 %v2579_v11, %v2479_v26  ;;  %v2532_v44 = vrot.slane %v8965_v43, 1 }
 0x22e   : > { %v2032_v58 = vpop.f32.mrf.mxu1  ;;  %v2530_v35 = vrot.slane %v2219_v13, 1  ;;  %v2483_v43 = vadd.f32 %v10888_v9, %v10880_v7 }
 0x22f   : > { %v2373_v62 = vsel %vm1173_vm0, %v2349_v39, %v2350_v57  ;;  %v8966_v22 = vpop.f32.mrf.mxu0 }
 0x230   : > { %v2446_v52 = vadd.f32 %v2373_v62, %v10700_v23  ;;  %v2034_v38 = vpop.f32.mrf.mxu1  ;;  %v2577_v31 = vsel %vm1366_vm1, %v2529_v36, %v2530_v35  ;;  %v2533_v56 = vrot.slane %v8966_v22, 1  ;;  %v12921_v36 = vld [vmem:[#allocation30_spill] sm:$0xff]  ;;  %v2485_v22 = vadd.f32 %v10923_v29, %v10913_v55 }
 0x231   : > { %v2351_v32 = vrot.slane %v2034_v38, 7  ;;  %v2222_v12 = vpop.f32.mrf.mxu0  ;;  %v11090_v39 = vadd.f32 %v2577_v31, %v2481_v20 }
 0x232   : > { %v11086_v49 = vadd.f32 %v2446_v52, %v2032_v58  ;;  %v11088_v26 = vpop.f32.mrf.mxu1  ;;  %v2574_v54 = vsel %vm1366_vm1, %v2532_v44, %v2533_v56  ;;  %v2531_v59 = vrot.slane %v2222_v12, 1 }
 0x233   : > { %v2372_v23 = vsel %vm1173_vm0, %v2350_v57, %v2351_v32  ;;  %v8969_v58 = vpop.f32.mrf.mxu0  ;;  %3226 = vmatmul.mubr.bf16.gmra.mxu0 %v10754_v48  ;;  %v11103_v13 = vadd.f32 %v2574_v54, %v10911_v4 }
 0x234   : > { %v11099_v11 = vadd.f32 %v2372_v23, %v12921_v36  ;;  %v2040_v10 = vpop.f32.mrf.mxu1  ;;  %v2575_v62 = vsel %vm1366_vm1, %v2531_v59, %v2532_v44  ;;  %3235 = vmatprep.mubr.bf16.mxu0 %v12873_v6  ;;  %v2576_v57 = vsel %vm1366_vm1, %v2530_v35, %v2531_v59  ;;  %v2536_v54 = vrot.slane %v8969_v58, 1 }
 0x235   : > { %v2352_v20 = vrot.slane %v2040_v10, 7  ;;  %v2235_v9 = vpop.f32.mrf.mxu0  ;;  %v11111_v52 = vadd.f32 %v2576_v57, %v10878_v2  ;;  %v11113_v38 = vadd.f32 %v2575_v62, %v2483_v43  ;;  %v2487_v10 = vadd.f32 %v10957_v27, %v10947_v61 }
 0x236   : > { %v2042_v7 = vpop.f32.mrf.mxu1  ;;  %v2534_v4 = vrot.slane %v2235_v9, 1 }
 0x237   : > { %v2371_v48 = vsel %vm1173_vm0, %v2351_v32, %v2352_v20  ;;  %v8970_v12 = vpop.f32.mrf.mxu0 }
 0x238   : > { %v2448_v44 = vadd.f32 %v2371_v48, %v10730_v16  ;;  %v2044_v31 = vpop.f32.mrf.mxu1  ;;  %v2573_v35 = vsel %vm1366_vm1, %v2533_v56, %v2534_v4  ;;  %v2537_v2 = vrot.slane %v8970_v12, 1  ;;  %v12922_v56 = vld [vmem:[#allocation31_spill] sm:$0xff]  ;;  %v12923_v12 = vld [vmem:[#allocation32_spill] sm:$0xff] }
 0x239   : > { %v2353_v23 = vrot.slane %v2044_v31, 7  ;;  %v2238_v36 = vpop.f32.mrf.mxu0  ;;  %v11126_v32 = vadd.f32 %v2573_v35, %v2485_v22  ;;  %v2489_v31 = vadd.f32 %v10991_v41, %v10981_v30 }
 0x23a   : > { %v11122_v59 = vadd.f32 %v2448_v44, %v2042_v7  ;;  %v11124_v43 = vpop.f32.mrf.mxu1  ;;  %v2570_v55 = vsel %vm1366_vm1, %v2536_v54, %v2537_v2  ;;  %v2535_v29 = vrot.slane %v2238_v36, 1 }
 0x23b   : > { %v2370_v16 = vsel %vm1173_vm0, %v2352_v20, %v2353_v23  ;;  %v8973_v57 = vpop.f32.mrf.mxu0  ;;  %3236 = vmatmul.mubr.bf16.gmra.mxu0 %v10757_v24  ;;  %v11139_v7 = vadd.f32 %v2570_v55, %v10979_v25 }
 0x23c   : > { %v11135_v58 = vadd.f32 %v2370_v16, %v12922_v56  ;;  %v2050_v62 = vpop.f32.mrf.mxu1  ;;  %v2571_v9 = vsel %vm1366_vm1, %v2535_v29, %v2536_v54  ;;  %3245 = vmatprep.mubr.bf16.mxu0 %v12873_v6  ;;  %v2572_v20 = vsel %vm1366_vm1, %v2534_v4, %v2535_v29  ;;  %v2540_v55 = vrot.slane %v8973_v57, 1 }
 0x23d   : > { %v2354_v48 = vrot.slane %v2050_v62, 7  ;;  %v2251_v27 = vpop.f32.mrf.mxu0  ;;  %v11147_v22 = vadd.f32 %v2572_v20, %v10945_v45  ;;  %v11149_v44 = vadd.f32 %v2571_v9, %v2487_v10  ;;  %v2491_v57 = vadd.f32 %v11027_v47, %v11015_v19 }
 0x23e   : > { %v2052_v61 = vpop.f32.mrf.mxu1  ;;  %v2538_v25 = vrot.slane %v2251_v27, 1  ;;  %v12925_v27 = vld [vmem:[#allocation34_spill] sm:$0xff] }
 0x23f   : > { %v2369_v24 = vsel %vm1173_vm0, %v2353_v23, %v2354_v48  ;;  %v8974_v36 = vpop.f32.mrf.mxu0 }
 0x240   : > { %v2450_v54 = vadd.f32 %v2369_v24, %v12923_v12  ;;  %v2054_v35 = vpop.f32.mrf.mxu1  ;;  %v2569_v4 = vsel %vm1366_vm1, %v2537_v2, %v2538_v25  ;;  %v2541_v45 = vrot.slane %v8974_v36, 1  ;;  %v12924_v2 = vld [vmem:[#allocation33_spill] sm:$0xff] }
 0x241   : > { %v2355_v16 = vrot.slane %v2054_v35, 7  ;;  %v2254_v56 = vpop.f32.mrf.mxu0  ;;  %v11162_v23 = vadd.f32 %v2569_v4, %v2489_v31  ;;  %v12926_v4 = vld [vmem:[#allocation36_spill] sm:$0xff] }
 0x242   : > { %v11158_v29 = vadd.f32 %v2450_v54, %v2052_v61  ;;  %v11160_v10 = vpop.f32.mrf.mxu1  ;;  %v2566_v30 = vsel %vm1366_vm1, %v2540_v55, %v2541_v45  ;;  %v2539_v62 = vrot.slane %v2254_v56, 1 }
 0x243   : > { %v2368_v41 = vsel %vm1173_vm0, %v2354_v48, %v2355_v16  ;;  %v8977_v61 = vpop.f32.mrf.mxu0  ;;  %3246 = vmatmul.mubr.bf16.gmra.mxu0 %v12925_v27  ;;  %v11173_v24 = vadd.f32 %v2566_v30, %v11050_v5 }
 0x244   : > { %v2451_v9 = vadd.f32 %v2368_v41, %v12924_v2  ;;  %v2060_v20 = vpop.f32.mrf.mxu1  ;;  %v2567_v31 = vsel %vm1366_vm1, %v2539_v62, %v2540_v55  ;;  %3255 = vmatprep.mubr.bf16.mxu0 %v12873_v6  ;;  %v2568_v48 = vsel %vm1366_vm1, %v2538_v25, %v2539_v62  ;;  %v2493_v55 = vadd.f32 %v11063_v63, %v11052_v21 }
 0x245   : > { %v2356_v12 = vrot.slane %v2060_v20, 7  ;;  %v2267_v19 = vpop.f32.mrf.mxu0  ;;  %v11181_v47 = vadd.f32 %v2568_v48, %v11013_v18  ;;  %v11183_v35 = vadd.f32 %v2567_v31, %v2491_v57  ;;  %v2544_v2 = vrot.slane %v8977_v61, 1  ;;  %v12927_v48 = vld [vmem:[#allocation37_spill] sm:$0xff] }
 0x246   : > { %v2062_v54 = vpop.f32.mrf.mxu1  ;;  %v2542_v36 = vrot.slane %v2267_v19, 1  ;;  %v2495_v61 = vadd.f32 %v11099_v11, %v11088_v26 }
 0x247   : > { %v2367_v5 = vsel %vm1173_vm0, %v2355_v16, %v2356_v12  ;;  %v8978_v41 = vpop.f32.mrf.mxu0 }
 0x248   : > { %v2452_v56 = vadd.f32 %v2367_v5, %v12926_v4  ;;  %v2064_v30 = vpop.f32.mrf.mxu1  ;;  %v2565_v25 = vsel %vm1366_vm1, %v2541_v45, %v2542_v36  ;;  %v2545_v18 = vrot.slane %v8978_v41, 1  ;;  %v12928_v4 = vld [vmem:[#allocation35_spill] sm:$0xff] }
 0x249   : > { %v2357_v62 = vrot.slane %v2064_v30, 7  ;;  %v2270_v27 = vpop.f32.mrf.mxu0  ;;  %v11192_v31 = vadd.f32 %v2565_v25, %v2493_v55 }
 0x24a   : > { %v2500_v20 = vadd.f32 %v2452_v56, %v2062_v54  ;;  %v2066_v57 = vpop.f32.mrf.mxu1  ;;  %v2562_v16 = vsel %vm1366_vm1, %v2544_v2, %v2545_v18  ;;  %v2543_v63 = vrot.slane %v2270_v27, 1  ;;  %v12929_v27 = vld [vmem:[#allocation38_spill] sm:$0xff] }
 0x24b   : > { %v2366_v21 = vsel %vm1173_vm0, %v2356_v12, %v2357_v62  ;;  %v8981_v5 = vpop.f32.mrf.mxu0  ;;  %3256 = vmatmul.mubr.bf16.gmra.mxu0 %v12928_v4  ;;  %v11203_v54 = vadd.f32 %v2562_v16, %v11122_v59 }
 0x24c   : > { %v2453_v19 = vadd.f32 %v2366_v21, %v12927_v48  ;;  %v2070_v45 = vpop.f32.mrf.mxu1  ;;  %v2563_v55 = vsel %vm1366_vm1, %v2543_v63, %v2544_v2  ;;  %3265 = vmatprep.mubr.bf16.mxu0 %v12873_v6  ;;  %v2564_v12 = vsel %vm1366_vm1, %v2542_v36, %v2543_v63  ;;  %v2497_v2 = vadd.f32 %v11135_v58, %v11124_v43 }
 0x24d   : > { %v2358_v56 = vrot.slane %v2070_v45, 7  ;;  %v2283_v26 = vpop.f32.mrf.mxu0  ;;  %v11211_v11 = vadd.f32 %v2564_v12, %v11086_v49  ;;  %v11213_v41 = vadd.f32 %v2563_v55, %v2495_v61  ;;  %v2548_v45 = vrot.slane %v8981_v5, 1  ;;  %v12931_v5 = vld [vmem:[#allocation39_spill] sm:$0xff] }
 0x24e   : > { %v2072_v30 = vpop.f32.mrf.mxu1  ;;  %v2546_v25 = vrot.slane %v2283_v26, 1  ;;  %v2499_v26 = vadd.f32 %v2451_v9, %v11160_v10  ;;  %v9491_v10 = vld [vmem:[#allocation8 + $0xb0] ss:$12 sps:$4 sm:$0xff]  }
 0x24f   : > { %v2365_v59 = vsel %vm1173_vm0, %v2357_v62, %v2358_v56  ;;  %v8982_v48 = vpop.f32.mrf.mxu0  ;;  %9051 = vmatprep.subr.bf16.mxu0 %v9491_v10 }
 0x250   : > { %v2454_v16 = vadd.f32 %v2365_v59, %v12929_v27  ;;  %v2074_v21 = vpop.f32.mrf.mxu1  ;;  %v2561_v36 = vsel %vm1366_vm1, %v2545_v18, %v2546_v25  ;;  %v2549_v49 = vrot.slane %v8982_v48, 1  ;;  %v9488_v48 = vld [vmem:[#allocation8 + $0xa8] ss:$12 sps:$4 sm:$0xff]   ;;  %9052 = vmatpush3.bf16.msra.mxu0 %v9491_v10 }
 0x251   : > { %v2359_v63 = vrot.slane %v2074_v21, 7  ;;  %v2286_v55 = vpop.f32.mrf.mxu0  ;;  %v11222_v12 = vadd.f32 %v2561_v36, %v2497_v2  ;;  %v12932_v21 = vld [vmem:[#allocation16_spill] sm:$0xff] }
 0x252   : > { %v2502_v4 = vadd.f32 %v2454_v16, %v2072_v30  ;;  %v2076_v61 = vpop.f32.mrf.mxu1  ;;  %v2558_v62 = vsel %vm1366_vm1, %v2548_v45, %v2549_v49  ;;  %v2547_v58 = vrot.slane %v2286_v55, 1  ;;  %v9490_v36 = vld [vmem:[#allocation8 + $0xac] ss:$12 sps:$4 sm:$0xff]  }
 0x253   : > { %12930 = vst [vmem:[#allocation26_spill] sm:$0xff] %v11222_v12  ;;  %v2364_v43 = vsel %vm1173_vm0, %v2358_v56, %v2359_v63  ;;  %v8985_v18 = vpop.f32.mrf.mxu0  ;;  %3266 = vmatmul.mubr.bf16.gmra.mxu0 %v12932_v21  ;;  %v11231_v30 = vadd.f32 %v2558_v62, %v2500_v20  ;;  %4615 = vmatprep.subr.bf16.mxu1 %v9490_v36 }
 0x254   : > { %v2455_v59 = vadd.f32 %v2364_v43, %v12931_v5  ;;  %v2080_v27 = vpop.f32.mrf.mxu1  ;;  %v2559_v2 = vsel %vm1366_vm1, %v2547_v58, %v2548_v45  ;;  %v2560_v56 = vsel %vm1366_vm1, %v2546_v25, %v2547_v58  ;;  %v2501_v45 = vadd.f32 %v2453_v19, %v2066_v57  ;;  %v12935_v5 = vld [vmem:[#allocation17_spill] sm:$0xff]  ;;  %4616 = vmatpush1.bf16.msra.mxu1 %v9488_v48  ;;  %v12936_v57 = vld [vmem:[#allocation20_spill] sm:$0xff] }
 0x255   : > { %12933 = vst [vmem:[#allocation27_spill] sm:$0xff] %v11231_v30  ;;  %v2360_v16 = vrot.slane %v2080_v27, 7  ;;  %v2299_v12 = vpop.f32.mrf.mxu0  ;;  %v11238_v9 = vadd.f32 %v2560_v56, %v11158_v29  ;;  %v11240_v43 = vadd.f32 %v2559_v2, %v2499_v26  ;;  %v2552_v25 = vrot.slane %v8985_v18, 1 }
 0x256   : > { %v2082_v55 = vpop.f32.mrf.mxu1  ;;  %v2550_v62 = vrot.slane %v2299_v12, 1  ;;  %v2503_v26 = vadd.f32 %v2455_v59, %v2076_v61  ;;  %v12937_v19 = vrot.slane %v12936_v57, 7  ;;  %v12939_v61 = vld [vmem:[#allocation18_spill] sm:$0xff] }
 0x257   : > { %12934 = vst [vmem:[#allocation28_spill] sm:$0xff] %v11240_v43  ;;  %v2363_v20 = vsel %vm1173_vm0, %v2359_v63, %v2360_v16  ;;  %v8986_v30 = vpop.f32.mrf.mxu0 }
 0x258   : > { %v2456_v27 = vadd.f32 %v2363_v20, %v12935_v5  ;;  %v2084_v21 = vpop.f32.mrf.mxu1  ;;  %v2557_v58 = vsel %vm1366_vm1, %v2549_v49, %v2550_v62  ;;  %v2553_v56 = vrot.slane %v8986_v30, 1  ;;  %v12938_v30 = vld [vmem:[#allocation14_spill] sm:$0xff] }
 0x259   : > { %v2361_v29 = vrot.slane %v2084_v21, 7  ;;  %v2302_v43 = vpop.f32.mrf.mxu0  ;;  %v11247_v12 = vadd.f32 %v2557_v58, %v2501_v45  ;;  %v12944_v58 = vld [vmem:[#allocation22_spill] sm:$0xff] }
 0x25a   : > { %v2504_v2 = vadd.f32 %v2456_v27, %v2082_v55  ;;  %v2086_v63 = vpop.f32.mrf.mxu1  ;;  %v2554_v18 = vsel %vm1366_vm1, %v2552_v25, %v2553_v56  ;;  %v2551_v48 = vrot.slane %v2302_v43, 1  ;;  %v12940_v55 = vld [vmem:[#allocation13_spill] sm:$0xff] }
 0x25b   : > { %v2409_v36 = vsel %vm1173_vm0, %v2361_v29, %v12937_v19  ;;  %v2362_v49 = vsel %vm1173_vm0, %v2360_v16, %v2361_v29  ;;  %v12941_v20 = vrot.slane %v12940_v55, 1  ;;  %v11263_v5 = vpop.f32.mrf.mxu0 }
 0x25c   : > { %v2410_v10 = vadd.f32 %v2409_v36, %v12938_v30  ;;  %v2457_v59 = vadd.f32 %v2362_v49, %v12939_v61  ;;  %12942 = vst [vmem:[#allocation29_spill] sm:$0xff] %v11263_v5  ;;  %v9005_v27 = vpop.f32.mrf.mxu1  ;;  %v11265_v21 = vadd.f32 %v2554_v18, %v2504_v2  ;;  %v2555_v43 = vsel %vm1366_vm1, %v2551_v48, %v2552_v25  ;;  %v12950_v61 = vld [vmem:[#allocation19_spill] sm:$0xff] }
 0x25d   : > { %v2601_v45 = vsel %vm1366_vm1, %v2553_v56, %v12941_v20  ;;  %v2556_v16 = vsel %vm1366_vm1, %v2550_v62, %v2551_v48  ;;  %v11272_v19 = vpop.f32.mrf.mxu0  ;;  %v11278_v56 = vadd.f32 %v2555_v43, %v2503_v26  ;;  %v12849_v62 = vrot.slane %v11263_v5, 7 }
 0x25e   : > { %12943 = vst [vmem:[#allocation30_spill] sm:$0xff] %v11265_v21  ;;  %v2458_v29 = vadd.f32 %v2410_v10, %v12944_v58  ;;  %v2505_v57 = vadd.f32 %v2457_v59, %v2086_v63  ;;  %12945 = vst [vmem:[#allocation31_spill] sm:$0xff] %v11272_v19  ;;  %v11274_v36 = vpop.f32.mrf.mxu1  ;;  %v11276_v49 = vadd.f32 %v2556_v16, %v2502_v4  ;;  %v3695_v10 = vrot.slane %v9005_v27, 1 }
 0x25f   : > { %12946 = vst [vmem:[#allocation32_spill] sm:$0xff] %v11274_v36  ;;  %12948 = vst [vmem:[#allocation34_spill] sm:$0xff] %v11278_v56  ;;  %v3041_v2 = vpop.f32.mrf.mxu0  ;;  %v12851_v63 = vrot.slane %v11274_v36, 1 }
 0x260   : > { %12947 = vst [vmem:[#allocation33_spill] sm:$0xff] %v11276_v49  ;;  %v11280_v30 = vadd.f32 %v2601_v45, %v2505_v57  ;;  %v9006_v18 = vpop.f32.mrf.mxu1  ;;  %v11283_v25 = vadd.f32 %v12950_v61, %v2458_v29  ;;  %v3502_v48 = vrot.slane %v3041_v2, 7  ;;  %v9492_v29 = vld [vmem:[#allocation8 + $0x90] ss:$12 sps:$4 sm:$0xff]   ;;  %v9494_v57 = vld [vmem:[#allocation8 + $0x94] ss:$12 sps:$4 sm:$0xff]  }
 0x261   : > { %v3043_v59 = vpop.f32.mrf.mxu0  ;;  %v3696_v16 = vrot.slane %v9006_v18, 1  ;;  %4617 = vmatprep.subr.bf16.mxu1 %v9494_v57  ;;  %v12953_v18 = vld [vmem:[#allocation21_spill] sm:$0xff] }
 0x262   : > { %12949 = vst [vmem:[#allocation36_spill] sm:$0xff] %v11280_v30  ;;  %12951 = vst [vmem:[#allocation37_spill] sm:$0xff] %v11283_v25  ;;  %v3313_v55 = vpop.f32.mrf.mxu1  ;;  %v3595_v4 = vsel %vm1173_vm0, %v12849_v62, %v3502_v48  ;;  %4618 = vmatpush1.bf16.msra.mxu1 %v9492_v29 }
 0x263   : > { %v3694_v26 = vrot.slane %v3313_v55, 1  ;;  %v3598_v20 = vadd.f32 %v3595_v4, %v10904_v50  ;;  %v3047_v45 = vpop.f32.mrf.mxu0 }
 0x264   : > { %v11292_v43 = vpop.f32.mrf.mxu1  ;;  %v3503_v58 = vrot.slane %v3047_v45, 7 }
 0x265   : > { %v11298_v27 = vsel %vm1366_vm1, %v12851_v63, %v3694_v26  ;;  %v3646_v2 = vadd.f32 %v3598_v20, %v3043_v59  ;;  %v3786_v61 = vsel %vm1366_vm1, %v3694_v26, %v3695_v10  ;;  %v3049_v55 = vpop.f32.mrf.mxu0  ;;  %v11312_v26 = vld [vmem:[%s12830_s2] ss:$0 sm:$0xff] }
 0x266   : > { %12952 = vst [vmem:[#allocation35_spill] sm:$0xff] %v11298_v27  ;;  %v3326_v62 = vpop.f32.mrf.mxu1  ;;  %v3594_v50 = vsel %vm1173_vm0, %v3502_v48, %v3503_v58  ;;  %v3785_v27 = vsel %vm1366_vm1, %v3695_v10, %v3696_v16 }
 0x267   : > { %v3599_v4 = vadd.f32 %v3594_v50, %v12953_v18  ;;  %v3051_v45 = vpop.f32.mrf.mxu0  ;;  %v3790_v63 = vadd.f32 %v3786_v61, %v3646_v2  ;;  %v3697_v20 = vrot.slane %v3326_v62, 1  ;;  %v11315_v50 = vadd.s32 16, %v10136_v37  ;;  %v12954_v61 = vld [vmem:[#allocation15_spill] sm:$0xff] }
 0x268   : > { %v11305_v36 = vpop.f32.mrf.mxu1  ;;  %v3504_v59 = vrot.slane %v3051_v45, 7 }
 0x269   : > { %v3647_v19 = vadd.f32 %v3599_v4, %v3049_v55  ;;  %v3053_v48 = vpop.f32.mrf.mxu0  ;;  %v3845_v62 = vadd.f32 %v11312_v26, %v3790_v63  ;;  %v3784_v30 = vsel %vm1366_vm1, %v3696_v16, %v3697_v20  ;;  %v9495_v55 = vld [vmem:[#allocation8 + $0x78] ss:$12 sps:$4 sm:$0xff]   ;;  %v9497_v4 = vld [vmem:[#allocation8 + $0x7c] ss:$12 sps:$4 sm:$0xff]   ;;  %vm3947_vm2 = vcmp.le.s32.totalorder %v11315_v50, 16 }
 0x26a   : > { %v3329_v57 = vpop.f32.mrf.mxu1  ;;  %v3593_v29 = vsel %vm1173_vm0, %v3503_v58, %v3504_v59  ;;  %v9498_v58 = vld [vmem:[#allocation8 + $0x98] ss:$12 sps:$4 sm:$0xff]   ;;  %4619 = vmatprep.subr.bf16.mxu1 %v9497_v4 }
 0x26b   : > { %v3791_v2 = vadd.f32 %v3785_v27, %v3647_v19  ;;  %v3600_v18 = vadd.f32 %v3593_v29, %v12954_v61  ;;  %v3057_v10 = vpop.f32.mrf.mxu0  ;;  %v3698_v25 = vrot.slane %v3329_v57, 1  ;;  %4620 = vmatpush1.bf16.msra.mxu1 %v9495_v55  ;;  %9053 = vmatprep.subr.bf16.mxu0 %v9498_v58  ;;  %v3893_v29 = vmax.f32 %v3845_v62, 0.0  ;;  %v9550_v50 = vld [vmem:[#allocation8 + $0x138] ss:$12 sps:$4 sm:$0xff]  }
 0x26c   : > { %v3505_v45 = vrot.slane %v3057_v10, 7  ;;  %v11324_v49 = vpop.f32.mrf.mxu1  ;;  %9054 = vmatpush3.bf16.msra.mxu0 %v9498_v58 }
 0x26d   : > { %v3846_v5 = vadd.f32 %v11312_v26, %v3791_v2  ;;  %v3648_v21 = vadd.f32 %v3600_v18, %v3053_v48  ;;  %v3059_v56 = vpop.f32.mrf.mxu0  ;;  %v3699_v48 = vrot.slane %v11292_v43, 1  ;;  %v3783_v61 = vsel %vm1366_vm1, %v3697_v20, %v3698_v25 }
 0x26e   : > { %v3592_v19 = vsel %vm1173_vm0, %v3504_v59, %v3505_v45  ;;  %v3700_v20 = vrot.slane %v11305_v36, 1  ;;  %v12955_v36 = vld [vmem:[#allocation23_spill] sm:$0xff] }
 0x26f   : > { %v3894_v63 = vmax.f32 %v3846_v5, 0.0  ;;  %v3792_v27 = vadd.f32 %v3784_v30, %v3648_v21  ;;  %v3601_v16 = vadd.f32 %v3592_v19, %v10935_v8  ;;  %v3061_v57 = vpop.f32.mrf.mxu0  ;;  %v3342_v30 = vpop.f32.mrf.mxu1  ;;  %v3782_v58 = vsel %vm1366_vm1, %v3698_v25, %v3699_v48 }
 0x270   : > { %v3506_v2 = vrot.slane %v3061_v57, 7  ;;  %v9501_v57 = vld [vmem:[#allocation8 + $0x64] ss:$12 sps:$4 sm:$0xff]  }
 0x271   : > { %v3953_v18 = vsel %vm3947_vm2, %v3894_v63, 0.0  ;;  %v3847_v59 = vadd.f32 %v11312_v26, %v3792_v27  ;;  %v3649_v5 = vadd.f32 %v3601_v16, %v3059_v56  ;;  %v3063_v21 = vpop.f32.mrf.mxu0  ;;  %v11344_v16 = vpop.f32.mrf.mxu1  ;;  %4621 = vmatprep.subr.bf16.mxu1 %v9501_v57 }
 0x272   : > { %v8437_v8 = vpack.c.bf16 %v3953_v18, %v3893_v29  ;;  %v3591_v10 = vsel %vm1173_vm0, %v3505_v45, %v3506_v2  ;;  %v9499_v45 = vld [vmem:[#allocation8 + $0x60] ss:$12 sps:$4 sm:$0xff]  }
 0x273   : > { %v3793_v62 = vadd.f32 %v3783_v61, %v3649_v5  ;;  %v3602_v43 = vadd.f32 %v3591_v10, %v10938_v42  ;;  %v3067_v55 = vpop.f32.mrf.mxu0  ;;  %v3895_v4 = vmax.f32 %v3847_v59, 0.0  ;;  %v3781_v5 = vsel %vm1366_vm1, %v3699_v48, %v3700_v20  ;;  %4622 = vmatpush1.bf16.msra.mxu1 %v9499_v45 }
 0x274   : > { %8629 = vst [vmem:[#allocation2 + $0x10] sm:$0xff] %v8437_v8   ;;  %v3507_v19 = vrot.slane %v3067_v55, 7  ;;  %v3345_v55 = vpop.f32.mrf.mxu1 }
 0x275   : > { %v3848_v56 = vadd.f32 %v11312_v26, %v3793_v62  ;;  %v3650_v63 = vadd.f32 %v3602_v43, %v3063_v21  ;;  %v3069_v27 = vpop.f32.mrf.mxu0  ;;  %v3954_v25 = vsel %vm3942_vm3, %v3895_v4, 0.0 }
 0x276   : > { %v3590_v42 = vsel %vm1173_vm0, %v3506_v2, %v3507_v19  ;;  %v3701_v2 = vrot.slane %v3342_v30, 1  ;;  %v11360_v30 = vpop.f32.mrf.mxu1 }
 0x277   : > { %v3896_v29 = vmax.f32 %v3848_v56, 0.0  ;;  %v3794_v61 = vadd.f32 %v3782_v58, %v3650_v63  ;;  %v3603_v18 = vadd.f32 %v3590_v42, %v12955_v36  ;;  %v3071_v59 = vpop.f32.mrf.mxu0  ;;  %v3702_v42 = vrot.slane %v3345_v55, 1 }
 0x278   : > { %v3508_v21 = vrot.slane %v3071_v59, 7  ;;  %v3703_v59 = vrot.slane %v11324_v49, 1 }
 0x279   : > { %v8442_v8 = vpack.c.bf16 %v3896_v29, %v3954_v25  ;;  %v3849_v10 = vadd.f32 %v11312_v26, %v3794_v61  ;;  %v3651_v62 = vadd.f32 %v3603_v18, %v3069_v27  ;;  %v3073_v43 = vpop.f32.mrf.mxu0  ;;  %v3780_v27 = vsel %vm1366_vm1, %v3700_v20, %v3701_v2 }
 0x27a   : > { %v3589_v58 = vsel %vm1173_vm0, %v3507_v19, %v3508_v21 }
 0x27b   : > { %8630 = vst [vmem:[#allocation2 + $0x18] sm:$0xff] %v8442_v8   ;;  %v3795_v56 = vadd.f32 %v3781_v5, %v3651_v62  ;;  %v3604_v63 = vadd.f32 %v3589_v58, %v10950_v0  ;;  %v3077_v4 = vpop.f32.mrf.mxu0  ;;  %v3897_v48 = vmax.f32 %v3849_v10, 0.0  ;;  %v3779_v8 = vsel %vm1366_vm1, %v3701_v2, %v3702_v42 }
 0x27c   : > { %v3509_v57 = vrot.slane %v3077_v4, 7  ;;  %v3778_v4 = vsel %vm1366_vm1, %v3702_v42, %v3703_v59 }
 0x27d   : > { %v3850_v45 = vadd.f32 %v11312_v26, %v3795_v56  ;;  %v3652_v29 = vadd.f32 %v3604_v63, %v3073_v43  ;;  %v3079_v61 = vpop.f32.mrf.mxu0  ;;  %v3956_v20 = vsel %vm3947_vm2, %v3897_v48, 0.0  ;;  %v3704_v63 = vrot.slane %v11344_v16, 1  ;;  %v12956_v16 = vld [vmem:[#allocation24_spill] sm:$0xff] }
 0x27e   : > { %v3588_v19 = vsel %vm1173_vm0, %v3508_v21, %v3509_v57  ;;  %v3358_v21 = vpop.f32.mrf.mxu1 }
 0x27f   : > { %v3898_v36 = vmax.f32 %v3850_v45, 0.0  ;;  %v3605_v18 = vadd.f32 %v3588_v19, %v10969_v53  ;;  %v3081_v0 = vpop.f32.mrf.mxu0  ;;  %v3796_v25 = vadd.f32 %v3780_v27, %v3652_v29  ;;  %v9502_v45 = vld [vmem:[#allocation8 + $0x48] ss:$12 sps:$4 sm:$0xff]   ;;  %v9504_v29 = vld [vmem:[#allocation8 + $0x4c] ss:$12 sps:$4 sm:$0xff]  }
 0x280   : > { %v3510_v5 = vrot.slane %v3081_v0, 7  ;;  %4623 = vmatprep.subr.bf16.mxu1 %v9504_v29 }
 0x281   : > { %v3957_v10 = vsel %vm3942_vm3, %v3898_v36, 0.0  ;;  %v3653_v62 = vadd.f32 %v3605_v18, %v3079_v61  ;;  %v3083_v43 = vpop.f32.mrf.mxu0  ;;  %v3851_v2 = vadd.f32 %v11312_v26, %v3796_v25  ;;  %v9505_v36 = vld [vmem:[#allocation8 + $0x80] ss:$12 sps:$4 sm:$0xff]   ;;  %4624 = vmatpush1.bf16.msra.mxu1 %v9502_v45 }
 0x282   : > { %v8447_v55 = vpack.c.bf16 %v3957_v10, %v3956_v20  ;;  %v3587_v53 = vsel %vm1173_vm0, %v3509_v57, %v3510_v5  ;;  %v11380_v57 = vpop.f32.mrf.mxu1  ;;  %9055 = vmatprep.subr.bf16.mxu0 %v9505_v36  ;;  %v3777_v20 = vsel %vm1366_vm1, %v3703_v59, %v3704_v63 }
 0x283   : > { %v3797_v58 = vadd.f32 %v3779_v8, %v3653_v62  ;;  %v3606_v49 = vadd.f32 %v3587_v53, %v10972_v3  ;;  %v3087_v56 = vpop.f32.mrf.mxu0  ;;  %v3899_v42 = vmax.f32 %v3851_v2, 0.0  ;;  %v3705_v62 = vrot.slane %v3358_v21, 1  ;;  %9056 = vmatpush3.bf16.msra.mxu0 %v9505_v36 }
 0x284   : > { %8631 = vst [vmem:[#allocation2 + $0x20] sm:$0xff] %v8447_v55   ;;  %v3511_v48 = vrot.slane %v3087_v56, 7 }
 0x285   : > { %v3852_v27 = vadd.f32 %v11312_v26, %v3797_v58  ;;  %v3654_v61 = vadd.f32 %v3606_v49, %v3083_v43  ;;  %v3089_v19 = vpop.f32.mrf.mxu0  ;;  %v3361_v58 = vpop.f32.mrf.mxu1  ;;  %v3776_v29 = vsel %vm1366_vm1, %v3704_v63, %v3705_v62 }
 0x286   : > { %v3586_v3 = vsel %vm1173_vm0, %v3510_v5, %v3511_v48 }
 0x287   : > { %v3900_v18 = vmax.f32 %v3852_v27, 0.0  ;;  %v3798_v0 = vadd.f32 %v3778_v4, %v3654_v61  ;;  %v3607_v25 = vadd.f32 %v3586_v3, %v12956_v16  ;;  %v3091_v8 = vpop.f32.mrf.mxu0  ;;  %v3706_v27 = vrot.slane %v3361_v58, 1  ;;  %v11396_v3 = vpop.f32.mrf.mxu1 }
 0x288   : > { %v3512_v10 = vrot.slane %v3091_v8, 7 }
 0x289   : > { %v3959_v43 = vsel %vm3947_vm2, %v3900_v18, 0.0  ;;  %v3853_v5 = vadd.f32 %v11312_v26, %v3798_v0  ;;  %v3655_v55 = vadd.f32 %v3607_v25, %v3089_v19  ;;  %v3093_v53 = vpop.f32.mrf.mxu0  ;;  %v3775_v63 = vsel %vm1366_vm1, %v3705_v62, %v3706_v27 }
 0x28a   : > { %v8452_v49 = vpack.c.bf16 %v3959_v43, %v3899_v42  ;;  %v3585_v56 = vsel %vm1173_vm0, %v3511_v48, %v3512_v10  ;;  %v3708_v62 = vrot.slane %v11380_v57, 1 }
 0x28b   : > { %v3799_v4 = vadd.f32 %v3777_v20, %v3655_v55  ;;  %v3608_v2 = vadd.f32 %v3585_v56, %v10984_v1  ;;  %v3097_v45 = vpop.f32.mrf.mxu0  ;;  %v3901_v59 = vmax.f32 %v3853_v5, 0.0  ;;  %v3707_v20 = vrot.slane %v11360_v30, 1  ;;  %v9508_v56 = vld [vmem:[#allocation8 + $0x34] ss:$12 sps:$4 sm:$0xff]  }
 0x28c   : > { %8632 = vst [vmem:[#allocation2 + $0x28] sm:$0xff] %v8452_v49   ;;  %v3513_v21 = vrot.slane %v3097_v45, 7  ;;  %4625 = vmatprep.subr.bf16.mxu1 %v9508_v56 }
 0x28d   : > { %v3854_v61 = vadd.f32 %v11312_v26, %v3799_v4  ;;  %v3656_v19 = vadd.f32 %v3608_v2, %v3093_v53  ;;  %v3099_v36 = vpop.f32.mrf.mxu0  ;;  %v3960_v25 = vsel %vm3942_vm3, %v3901_v59, 0.0  ;;  %v9506_v2 = vld [vmem:[#allocation8 + $0x30] ss:$12 sps:$4 sm:$0xff]  }
 0x28e   : > { %v3584_v48 = vsel %vm1173_vm0, %v3512_v10, %v3513_v21  ;;  %v11407_v10 = vpop.f32.mrf.mxu1  ;;  %4626 = vmatpush1.bf16.msra.mxu1 %v9506_v2 }
 0x28f   : > { %v3902_v18 = vmax.f32 %v3854_v61, 0.0  ;;  %v3800_v0 = vadd.f32 %v3776_v29, %v3656_v19  ;;  %v3609_v1 = vadd.f32 %v3584_v48, %v11003_v51  ;;  %v3101_v16 = vpop.f32.mrf.mxu0  ;;  %v3774_v29 = vsel %vm1366_vm1, %v3706_v27, %v3707_v20 }
 0x290   : > { %v3514_v8 = vrot.slane %v3101_v16, 7  ;;  %v11416_v19 = vpop.f32.mrf.mxu1  ;;  %v3709_v27 = vrot.slane %v11407_v10, 1 }
 0x291   : > { %v8457_v42 = vpack.c.bf16 %v3902_v18, %v3960_v25  ;;  %v3855_v43 = vadd.f32 %v11312_v26, %v3800_v0  ;;  %v3657_v5 = vadd.f32 %v3609_v1, %v3099_v36  ;;  %v3103_v55 = vpop.f32.mrf.mxu0  ;;  %v12957_v36 = vld [vmem:[#allocation25_spill] sm:$0xff]  ;;  %v9511_v18 = vld [vmem:[#allocation8 + $0x1c] ss:$12 sps:$4 sm:$0xff]   ;;  %v3773_v1 = vsel %vm1366_vm1, %v3707_v20, %v3708_v62 }
 0x292   : > { %v3583_v51 = vsel %vm1173_vm0, %v3513_v21, %v3514_v8  ;;  %v9509_v25 = vld [vmem:[#allocation8 + $0x18] ss:$12 sps:$4 sm:$0xff]   ;;  %4627 = vmatprep.subr.bf16.mxu1 %v9511_v18  ;;  %v3772_v2 = vsel %vm1366_vm1, %v3708_v62, %v3709_v27 }
 0x293   : > { %8633 = vst [vmem:[#allocation2 + $0x30] sm:$0xff] %v8457_v42   ;;  %v3801_v53 = vadd.f32 %v3775_v63, %v3657_v5  ;;  %v3610_v58 = vadd.f32 %v3583_v51, %v11006_v14  ;;  %v3107_v49 = vpop.f32.mrf.mxu0  ;;  %v3903_v30 = vmax.f32 %v3855_v43, 0.0  ;;  %v3377_v5 = vpop.f32.mrf.mxu1  ;;  %4628 = vmatpush1.bf16.msra.mxu1 %v9509_v25 }
 0x294   : > { %v3515_v4 = vrot.slane %v3107_v49, 7 }
 0x295   : > { %v3856_v45 = vadd.f32 %v11312_v26, %v3801_v53  ;;  %v3658_v59 = vadd.f32 %v3610_v58, %v3103_v55  ;;  %v3109_v61 = vpop.f32.mrf.mxu0  ;;  %v3962_v63 = vsel %vm3947_vm2, %v3903_v30, 0.0  ;;  %v9515_v58 = vld [vmem:[#allocation8 + $0x4] ss:$12 sps:$4 sm:$0xff]   ;;  %v3710_v30 = vrot.slane %v3377_v5, 1 }
 0x296   : > { %v3582_v14 = vsel %vm1173_vm0, %v3514_v8, %v3515_v4  ;;  %4629 = vmatprep.subr.bf16.mxu1 %v9515_v58 }
 0x297   : > { %v3904_v21 = vmax.f32 %v3856_v45, 0.0  ;;  %v3611_v57 = vadd.f32 %v3582_v14, %v12957_v36  ;;  %v3111_v48 = vpop.f32.mrf.mxu0  ;;  %v3802_v0 = vadd.f32 %v3774_v29, %v3658_v59  ;;  %v9512_v45 = vld [vmem:[#allocation8 + $0x68] ss:$12 sps:$4 sm:$0xff]   ;;  %v9513_v59 = vld [vmem:[#allocation8] ss:$12 sps:$4 sm:$0xff]   ;;  %v11435_v14 = vpop.f32.mrf.mxu1  ;;  %v3771_v25 = vsel %vm1366_vm1, %v3709_v27, %v3710_v30 }
 0x298   : > { %v3516_v16 = vrot.slane %v3111_v48, 7  ;;  %9057 = vmatprep.subr.bf16.mxu0 %v9512_v45  ;;  %4630 = vmatpush1.bf16.msra.mxu1 %v9513_v59  ;;  %v9516_v48 = vld [vmem:[#allocation2] sm:$0xff]   ;;  %v3712_v27 = vrot.slane %v11416_v19, 1 }
 0x299   : > { %v3963_v8 = vsel %vm3942_vm3, %v3904_v21, 0.0  ;;  %v3659_v42 = vadd.f32 %v3611_v57, %v3109_v61  ;;  %v3113_v43 = vpop.f32.mrf.mxu0  ;;  %v3857_v49 = vadd.f32 %v11312_v26, %v3802_v0  ;;  %9058 = vmatpush3.bf16.msra.mxu0 %v9512_v45  ;;  %v3711_v0 = vrot.slane %v11396_v3, 1  ;;  %v11446_v5 = vpop.f32.mrf.mxu1  ;;  %9067 = vmatprep.mubr.bf16.mxu0 %v9516_v48 }
 0x29a   : > { %v8462_v55 = vpack.c.bf16 %v3963_v8, %v3962_v63  ;;  %v3581_v51 = vsel %vm1173_vm0, %v3515_v4, %v3516_v16  ;;  %v9517_v63 = vld [vmem:[#allocation8 + $0x50] ss:$12 sps:$4 sm:$0xff]  }
 0x29b   : > { %v3803_v20 = vadd.f32 %v3773_v1, %v3659_v42  ;;  %v3612_v53 = vadd.f32 %v3581_v51, %v11018_v15  ;;  %v3117_v10 = vpop.f32.mrf.mxu0  ;;  %v3905_v18 = vmax.f32 %v3857_v49, 0.0  ;;  %4648 = vmatmul.mubr.bf16.vlgmr.msra.gmra.mxu1 %v9516_v48  ;;  %9059 = vmatprep.subr.bf16.mxu0 %v9517_v63  ;;  %v9518_v49 = vld [vmem:[#allocation8 + $0x38] ss:$12 sps:$4 sm:$0xff]   ;;  %v11456_v59 = vpop.f32.mrf.mxu1 }
 0x29c   : > { %8634 = vst [vmem:[#allocation2 + $0x38] sm:$0xff] %v8462_v55   ;;  %v3517_v56 = vrot.slane %v3117_v10, 7  ;;  %4657 = vmatprep.mubr.bf16.mxu1 %v12873_v6  ;;  %v3770_v10 = vsel %vm1366_vm1, %v3710_v30, %v3711_v0 }
 0x29d   : > { %v3858_v29 = vadd.f32 %v11312_v26, %v3803_v20  ;;  %v3660_v61 = vadd.f32 %v3612_v53, %v3113_v43  ;;  %v3119_v4 = vpop.f32.mrf.mxu0  ;;  %9060 = vmatpush3.bf16.msra.mxu0 %v9517_v63  ;;  %v3393_v63 = vpop.f32.mrf.mxu1 }
 0x29e   : > { %v3580_v15 = vsel %vm1173_vm0, %v3516_v16, %v3517_v56  ;;  %9061 = vmatprep.subr.bf16.mxu0 %v9518_v49 }
 0x29f   : > { %v3906_v21 = vmax.f32 %v3858_v29, 0.0  ;;  %v3804_v36 = vadd.f32 %v3772_v2, %v3660_v61  ;;  %v3613_v57 = vadd.f32 %v3580_v15, %v11039_v46  ;;  %v3121_v62 = vpop.f32.mrf.mxu0  ;;  %v3769_v15 = vsel %vm1366_vm1, %v3711_v0, %v3712_v27 }
 0x2a0   : > { %v3518_v1 = vrot.slane %v3121_v62, 7 }
 0x2a1   : > { %v3965_v16 = vsel %vm3947_vm2, %v3906_v21, 0.0  ;;  %v3859_v8 = vadd.f32 %v11312_v26, %v3804_v36  ;;  %v3661_v42 = vadd.f32 %v3613_v57, %v3119_v4  ;;  %v3123_v43 = vpop.f32.mrf.mxu0  ;;  %9062 = vmatpush3.bf16.msra.mxu0 %v9518_v49  ;;  %v9519_v36 = vld [vmem:[#allocation8 + $0x20] ss:$12 sps:$4 sm:$0xff]   ;;  %v9520_v57 = vld [vmem:[#allocation8 + $0x170] ss:$12 sps:$4 sm:$0xff]  }
 0x2a2   : > { %v8467_v46 = vpack.c.bf16 %v3965_v16, %v3905_v18  ;;  %v3579_v3 = vsel %vm1173_vm0, %v3517_v56, %v3518_v1  ;;  %9063 = vmatprep.subr.bf16.mxu0 %v9519_v36  ;;  %9115 = vmatprep.subr.bf16.mxu1 %v9520_v57 }
 0x2a3   : > { %v3805_v55 = vadd.f32 %v3771_v25, %v3661_v42  ;;  %v3614_v51 = vadd.f32 %v3579_v3, %v11041_v28  ;;  %v3127_v20 = vpop.f32.mrf.mxu0  ;;  %v3907_v53 = vmax.f32 %v3859_v8, 0.0  ;;  %v3713_v25 = vrot.slane %v11446_v5, 1  ;;  %9116 = vmatpush3.bf16.msra.mxu1 %v9520_v57  ;;  %v11470_v3 = vpop.f32.mrf.mxu1 }
 0x2a4   : > { %8635 = vst [vmem:[#allocation2 + $0x40] sm:$0xff] %v8467_v46   ;;  %v3519_v58 = vrot.slane %v3127_v20, 7  ;;  %v3714_v46 = vrot.slane %v3393_v63, 1  ;;  %v3716_v57 = vrot.slane %v11456_v59, 1 }
 0x2a5   : > { %v3860_v2 = vadd.f32 %v11312_v26, %v3805_v55  ;;  %v3662_v56 = vadd.f32 %v3614_v51, %v3123_v43  ;;  %v3129_v45 = vpop.f32.mrf.mxu0  ;;  %v3966_v30 = vsel %vm3942_vm3, %v3907_v53, 0.0  ;;  %9064 = vmatpush3.bf16.msra.mxu0 %v9519_v36  ;;  %v3768_v20 = vsel %vm1366_vm1, %v3712_v27, %v3713_v25 }
 0x2a6   : > { %v3578_v19 = vsel %vm1173_vm0, %v3518_v1, %v3519_v58 }
 0x2a7   : > { %v3908_v28 = vmax.f32 %v3860_v2, 0.0  ;;  %v3806_v29 = vadd.f32 %v3770_v10, %v3662_v56  ;;  %v3615_v61 = vadd.f32 %v3578_v19, %v11031_v33  ;;  %v3131_v4 = vpop.f32.mrf.mxu0  ;;  %v9521_v33 = vld [vmem:[#allocation8 + $0x8] ss:$12 sps:$4 sm:$0xff]   ;;  %v3715_v2 = vrot.slane %v11435_v14, 1 }
 0x2a8   : > { %v3520_v21 = vrot.slane %v3131_v4, 7  ;;  %9065 = vmatprep.subr.bf16.mxu0 %v9521_v33  ;;  %v3767_v19 = vsel %vm1366_vm1, %v3713_v25, %v3714_v46 }
 0x2a9   : > { %v8472_v62 = vpack.c.bf16 %v3908_v28, %v3966_v30  ;;  %v3861_v48 = vadd.f32 %v11312_v26, %v3806_v29  ;;  %v3663_v18 = vadd.f32 %v3615_v61, %v3129_v45  ;;  %v3133_v1 = vpop.f32.mrf.mxu0  ;;  %9066 = vmatpush3.bf16.msra.mxu0 %v9521_v33  ;;  %v3406_v28 = vpop.f32.mrf.mxu1  ;;  %v3765_v59 = vsel %vm1366_vm1, %v3715_v2, %v3716_v57 }
 0x2aa   : > { %v3577_v16 = vsel %vm1173_vm0, %v3519_v58, %v3520_v21 }
 0x2ab   : > { %8636 = vst [vmem:[#allocation2 + $0x48] sm:$0xff] %v8472_v62   ;;  %v3807_v8 = vadd.f32 %v3769_v15, %v3663_v18  ;;  %v3616_v0 = vadd.f32 %v3577_v16, %v11054_v17  ;;  %v3137_v42 = vpop.f32.mrf.mxu0  ;;  %v3909_v5 = vmax.f32 %v3861_v48, 0.0  ;;  %v3766_v62 = vsel %vm1366_vm1, %v3714_v46, %v3715_v2  ;;  %v11492_v18 = vpop.f32.mrf.mxu1 }
 0x2ac   : > { %v3521_v43 = vrot.slane %v3137_v42, 7  ;;  %v3717_v46 = vrot.slane %v3406_v28, 1 }
 0x2ad   : > { %v3862_v55 = vadd.f32 %v11312_v26, %v3807_v8  ;;  %v3664_v51 = vadd.f32 %v3616_v0, %v3133_v1  ;;  %v3139_v53 = vpop.f32.mrf.mxu0  ;;  %v3968_v27 = vsel %vm3947_vm2, %v3909_v5, 0.0  ;;  %v3409_v5 = vpop.f32.mrf.mxu1 }
 0x2ae   : > { %v3576_v10 = vsel %vm1173_vm0, %v3520_v21, %v3521_v43 }
 0x2af   : > { %v3910_v17 = vmax.f32 %v3862_v55, 0.0  ;;  %v3617_v58 = vadd.f32 %v3576_v10, %v11075_v40  ;;  %v3141_v49 = vpop.f32.mrf.mxu0  ;;  %v3808_v56 = vadd.f32 %v3768_v20, %v3664_v51 }
 0x2b0   : > { %v3522_v45 = vrot.slane %v3141_v49, 7 }
 0x2b1   : > { %v3969_v29 = vsel %vm3942_vm3, %v3910_v17, 0.0  ;;  %v3665_v61 = vadd.f32 %v3617_v58, %v3139_v53  ;;  %v3143_v4 = vpop.f32.mrf.mxu0  ;;  %v3863_v36 = vadd.f32 %v11312_v26, %v3808_v56  ;;  %v3718_v56 = vrot.slane %v3409_v5, 1 }
 0x2b2   : > { %v8477_v30 = vpack.c.bf16 %v3969_v29, %v3968_v27  ;;  %v3575_v40 = vsel %vm1173_vm0, %v3521_v43, %v3522_v45 }
 0x2b3   : > { %v3809_v15 = vadd.f32 %v3767_v19, %v3665_v61  ;;  %v3618_v14 = vadd.f32 %v3575_v40, %v11077_v34  ;;  %v3147_v21 = vpop.f32.mrf.mxu0  ;;  %v3911_v42 = vmax.f32 %v3863_v36, 0.0  ;;  %v3764_v19 = vsel %vm1366_vm1, %v3716_v57, %v3717_v46  ;;  %v11509_v61 = vpop.f32.mrf.mxu1 }
 0x2b4   : > { %8637 = vst [vmem:[#allocation2 + $0x50] sm:$0xff] %v8477_v30   ;;  %v3523_v48 = vrot.slane %v3147_v21, 7  ;;  %v3763_v36 = vsel %vm1366_vm1, %v3717_v46, %v3718_v56 }
 0x2b5   : > { %v3864_v1 = vadd.f32 %v11312_v26, %v3809_v15  ;;  %v3666_v25 = vadd.f32 %v3618_v14, %v3143_v4  ;;  %v3149_v63 = vpop.f32.mrf.mxu0 }
 0x2b6   : > { %v3574_v33 = vsel %vm1173_vm0, %v3522_v45, %v3523_v48 }
 0x2b7   : > { %v3912_v34 = vmax.f32 %v3864_v1, 0.0  ;;  %v3810_v16 = vadd.f32 %v3766_v62, %v3666_v25  ;;  %v3619_v8 = vadd.f32 %v3574_v33, %v11067_v60  ;;  %v3151_v0 = vpop.f32.mrf.mxu0  ;;  %v3719_v62 = vrot.slane %v11470_v3, 1  ;;  %v9527_v33 = vld [vmem:[#allocation8 + $0x158] ss:$12 sps:$4 sm:$0xff]  }
 0x2b8   : > { %v3524_v43 = vrot.slane %v3151_v0, 7  ;;  %9117 = vmatprep.subr.bf16.mxu1 %v9527_v33  ;;  %v3720_v0 = vrot.slane %v11492_v18, 1 }
 0x2b9   : > { %v3971_v55 = vsel %vm3947_vm2, %v3912_v34, 0.0  ;;  %v3865_v51 = vadd.f32 %v11312_v26, %v3810_v16  ;;  %v3667_v20 = vadd.f32 %v3619_v8, %v3149_v63  ;;  %v3153_v53 = vpop.f32.mrf.mxu0  ;;  %v3422_v63 = vpop.f32.mrf.mxu1  ;;  %9118 = vmatpush3.bf16.msra.mxu1 %v9527_v33  ;;  %v3762_v46 = vsel %vm1366_vm1, %v3718_v56, %v3719_v62 }
 0x2ba   : > { %v8482_v10 = vpack.c.bf16 %v3971_v55, %v3911_v42  ;;  %v3573_v17 = vsel %vm1173_vm0, %v3523_v48, %v3524_v43 }
 0x2bb   : > { %v3811_v60 = vadd.f32 %v3765_v59, %v3667_v20  ;;  %v3620_v58 = vadd.f32 %v3573_v17, %v11090_v39  ;;  %v3157_v49 = vpop.f32.mrf.mxu0  ;;  %v3913_v2 = vmax.f32 %v3865_v51, 0.0  ;;  %v11527_v55 = vpop.f32.mrf.mxu1 }
 0x2bc   : > { %8638 = vst [vmem:[#allocation2 + $0x58] sm:$0xff] %v8482_v10   ;;  %v3525_v45 = vrot.slane %v3157_v49, 7  ;;  %v3761_v10 = vsel %vm1366_vm1, %v3719_v62, %v3720_v0 }
 0x2bd   : > { %v3866_v28 = vadd.f32 %v11312_v26, %v3811_v60  ;;  %v3668_v27 = vadd.f32 %v3620_v58, %v3153_v53  ;;  %v3159_v29 = vpop.f32.mrf.mxu0  ;;  %v3972_v14 = vsel %vm3942_vm3, %v3913_v2, 0.0  ;;  %v3721_v60 = vrot.slane %v3422_v63, 1 }
 0x2be   : > { %v3572_v4 = vsel %vm1173_vm0, %v3524_v43, %v3525_v45  ;;  %v3723_v63 = vrot.slane %v11509_v61, 1 }
 0x2bf   : > { %v3914_v30 = vmax.f32 %v3866_v28, 0.0  ;;  %v3812_v40 = vadd.f32 %v3764_v19, %v3668_v27  ;;  %v3621_v39 = vadd.f32 %v3572_v4, %v11111_v52  ;;  %v3161_v15 = vpop.f32.mrf.mxu0 }
 0x2c0   : > { %v3526_v21 = vrot.slane %v3161_v15, 7 }
 0x2c1   : > { %v8487_v57 = vpack.c.bf16 %v3914_v30, %v3972_v14  ;;  %v3867_v48 = vadd.f32 %v11312_v26, %v3812_v40  ;;  %v3669_v1 = vadd.f32 %v3621_v39, %v3159_v29  ;;  %v3163_v25 = vpop.f32.mrf.mxu0  ;;  %v3760_v40 = vsel %vm1366_vm1, %v3720_v0, %v3721_v60 }
 0x2c2   : > { %v3571_v52 = vsel %vm1173_vm0, %v3525_v45, %v3526_v21  ;;  %v3425_v45 = vpop.f32.mrf.mxu1 }
 0x2c3   : > { %8639 = vst [vmem:[#allocation2 + $0x60] sm:$0xff] %v8487_v57   ;;  %v3813_v34 = vadd.f32 %v3763_v36, %v3669_v1  ;;  %v3622_v16 = vadd.f32 %v3571_v52, %v11113_v38  ;;  %v3167_v8 = vpop.f32.mrf.mxu0  ;;  %v3915_v3 = vmax.f32 %v3867_v48, 0.0  ;;  %v3722_v39 = vrot.slane %v3425_v45, 1 }
 0x2c4   : > { %v3527_v42 = vrot.slane %v3167_v8, 7  ;;  %v11545_v36 = vpop.f32.mrf.mxu1 }
 0x2c5   : > { %v3868_v59 = vadd.f32 %v11312_v26, %v3813_v34  ;;  %v3670_v43 = vadd.f32 %v3622_v16, %v3163_v25  ;;  %v3169_v5 = vpop.f32.mrf.mxu0  ;;  %v3974_v58 = vsel %vm3947_vm2, %v3915_v3, 0.0  ;;  %v3759_v52 = vsel %vm1366_vm1, %v3721_v60, %v3722_v39 }
 0x2c6   : > { %v3570_v51 = vsel %vm1173_vm0, %v3526_v21, %v3527_v42 }
 0x2c7   : > { %v3916_v38 = vmax.f32 %v3868_v59, 0.0  ;;  %v3623_v20 = vadd.f32 %v3570_v51, %v11103_v13  ;;  %v3171_v53 = vpop.f32.mrf.mxu0  ;;  %v3814_v18 = vadd.f32 %v3762_v46, %v3670_v43  ;;  %v3724_v59 = vrot.slane %v11527_v55, 1 }
 0x2c8   : > { %v3528_v17 = vrot.slane %v3171_v53, 7  ;;  %v3758_v51 = vsel %vm1366_vm1, %v3722_v39, %v3723_v63 }
 0x2c9   : > { %v3975_v49 = vsel %vm3942_vm3, %v3916_v38, 0.0  ;;  %v3671_v56 = vadd.f32 %v3623_v20, %v3169_v5  ;;  %v3173_v2 = vpop.f32.mrf.mxu0  ;;  %v3869_v4 = vadd.f32 %v11312_v26, %v3814_v18 }
 0x2ca   : > { %v8492_v19 = vpack.c.bf16 %v3975_v49, %v3974_v58  ;;  %v3569_v13 = vsel %vm1173_vm0, %v3527_v42, %v3528_v17  ;;  %v3438_v42 = vpop.f32.mrf.mxu1 }
 0x2cb   : > { %v3815_v28 = vadd.f32 %v3761_v10, %v3671_v56  ;;  %v3624_v27 = vadd.f32 %v3569_v13, %v11126_v32  ;;  %v3177_v29 = vpop.f32.mrf.mxu0  ;;  %v3917_v25 = vmax.f32 %v3869_v4, 0.0  ;;  %v3757_v56 = vsel %vm1366_vm1, %v3723_v63, %v3724_v59  ;;  %v9534_v4 = vld [vmem:[#allocation8 + $0x140] ss:$12 sps:$4 sm:$0xff]  }
 0x2cc   : > { %8640 = vst [vmem:[#allocation2 + $0x68] sm:$0xff] %v8492_v19   ;;  %v3529_v30 = vrot.slane %v3177_v29, 7  ;;  %v11563_v10 = vpop.f32.mrf.mxu1  ;;  %9119 = vmatprep.subr.bf16.mxu1 %v9534_v4 }
 0x2cd   : > { %v3870_v15 = vadd.f32 %v11312_v26, %v3815_v28  ;;  %v3672_v14 = vadd.f32 %v3624_v27, %v3173_v2  ;;  %v3179_v21 = vpop.f32.mrf.mxu0  ;;  %v3725_v27 = vrot.slane %v3438_v42, 1  ;;  %9120 = vmatpush3.bf16.msra.mxu1 %v9534_v4 }
 0x2ce   : > { %v3568_v57 = vsel %vm1173_vm0, %v3528_v17, %v3529_v30  ;;  %v3441_v29 = vpop.f32.mrf.mxu1 }
 0x2cf   : > { %v3918_v62 = vmax.f32 %v3870_v15, 0.0  ;;  %v3816_v32 = vadd.f32 %v3760_v40, %v3672_v14  ;;  %v3625_v48 = vadd.f32 %v3568_v57, %v11147_v22  ;;  %v3181_v1 = vpop.f32.mrf.mxu0  ;;  %v3726_v14 = vrot.slane %v3441_v29, 1  ;;  %v11581_v57 = vld [vmem:[%s12830_s2] ss:$0 sm:$0xff] }
 0x2d0   : > { %v3530_v33 = vrot.slane %v3181_v1, 7 }
 0x2d1   : > { %v3977_v34 = vsel %vm3947_vm2, %v3918_v62, 0.0  ;;  %v3871_v16 = vadd.f32 %v11312_v26, %v3816_v32  ;;  %v3673_v8 = vadd.f32 %v3625_v48, %v3179_v21  ;;  %v3183_v0 = vpop.f32.mrf.mxu0  ;;  %v11576_v21 = vpop.f32.mrf.mxu1  ;;  %v3756_v48 = vsel %vm1366_vm1, %v3724_v59, %v3725_v27 }
 0x2d2   : > { %v8497_v3 = vpack.c.bf16 %v3977_v34, %v3917_v25  ;;  %v3567_v22 = vsel %vm1173_vm0, %v3529_v30, %v3530_v33 }
 0x2d3   : > { %v3817_v43 = vadd.f32 %v3759_v52, %v3673_v8  ;;  %v3626_v61 = vadd.f32 %v3567_v22, %v11149_v44  ;;  %v3187_v46 = vpop.f32.mrf.mxu0  ;;  %v3919_v5 = vmax.f32 %v3871_v16, 0.0  ;;  %v3727_v52 = vrot.slane %v11545_v36, 1 }
 0x2d4   : > { %8641 = vst [vmem:[#allocation2 + $0x70] sm:$0xff] %v8497_v3   ;;  %v3531_v38 = vrot.slane %v3187_v46, 7  ;;  %v3755_v8 = vsel %vm1366_vm1, %v3725_v27, %v3726_v14 }
 0x2d5   : > { %v3872_v20 = vadd.f32 %v11312_v26, %v3817_v43  ;;  %v3674_v53 = vadd.f32 %v3626_v61, %v3183_v0  ;;  %v3189_v18 = vpop.f32.mrf.mxu0  ;;  %v3978_v49 = vsel %vm3942_vm3, %v3919_v5, 0.0  ;;  %v3454_v0 = vpop.f32.mrf.mxu1 }
 0x2d6   : > { %v3566_v17 = vsel %vm1173_vm0, %v3530_v33, %v3531_v38 }
 0x2d7   : > { %v3920_v55 = vmax.f32 %v3872_v20, 0.0  ;;  %v3818_v60 = vadd.f32 %v3758_v51, %v3674_v53  ;;  %v3627_v44 = vadd.f32 %v3566_v17, %v11139_v7  ;;  %v3191_v58 = vpop.f32.mrf.mxu0  ;;  %v3728_v51 = vrot.slane %v11563_v10, 1  ;;  %v11603_v53 = vpop.f32.mrf.mxu1 }
 0x2d8   : > { %v3532_v2 = vrot.slane %v3191_v58, 7 }
 0x2d9   : > { %v8502_v45 = vpack.c.bf16 %v3920_v55, %v3978_v49  ;;  %v3873_v19 = vadd.f32 %v11312_v26, %v3818_v60  ;;  %v3675_v13 = vadd.f32 %v3627_v44, %v3189_v18  ;;  %v3193_v28 = vpop.f32.mrf.mxu0  ;;  %v3753_v10 = vsel %vm1366_vm1, %v3727_v52, %v3728_v51 }
 0x2da   : > { %v3565_v30 = vsel %vm1173_vm0, %v3531_v38, %v3532_v2  ;;  %v3754_v38 = vsel %vm1366_vm1, %v3726_v14, %v3727_v52 }
 0x2db   : > { %8642 = vst [vmem:[#allocation2 + $0x78] sm:$0xff] %v8502_v45   ;;  %v3819_v7 = vadd.f32 %v3757_v56, %v3675_v13  ;;  %v3628_v40 = vadd.f32 %v3565_v30, %v11162_v23  ;;  %v3197_v39 = vpop.f32.mrf.mxu0  ;;  %v3921_v26 = vmax.f32 %v3873_v19, 0.0  ;;  %v3729_v45 = vrot.slane %v3454_v0, 1  ;;  %v3457_v19 = vpop.f32.mrf.mxu1 }
 0x2dc   : > { %v3533_v15 = vrot.slane %v3197_v39, 7  ;;  %v3730_v39 = vrot.slane %v3457_v19, 1 }
 0x2dd   : > { %v3874_v62 = vadd.f32 %v11581_v57, %v3819_v7  ;;  %v3676_v32 = vadd.f32 %v3628_v40, %v3193_v28  ;;  %v3199_v23 = vpop.f32.mrf.mxu0  ;;  %v3980_v42 = vsel %vm3947_vm2, %v3921_v26, 0.0  ;;  %v3752_v26 = vsel %vm1366_vm1, %v3728_v51, %v3729_v45 }
 0x2de   : > { %v3564_v1 = vsel %vm1173_vm0, %v3532_v2, %v3533_v15 }
 0x2df   : > { %v3922_v25 = vmax.f32 %v3874_v62, 0.0  ;;  %v3629_v63 = vadd.f32 %v3564_v1, %v11181_v47  ;;  %v3201_v33 = vpop.f32.mrf.mxu0  ;;  %v3820_v34 = vadd.f32 %v3756_v48, %v3676_v32 }
 0x2e0   : > { %v3534_v16 = vrot.slane %v3201_v33, 7 }
 0x2e1   : > { %v3981_v3 = vsel %vm3942_vm3, %v3922_v25, 0.0  ;;  %v3677_v22 = vadd.f32 %v3629_v63, %v3199_v23  ;;  %v3203_v59 = vpop.f32.mrf.mxu0  ;;  %v3875_v5 = vadd.f32 %v11581_v57, %v3820_v34  ;;  %v11620_v23 = vpop.f32.mrf.mxu1 }
 0x2e2   : > { %v8507_v43 = vpack.c.bf16 %v3981_v3, %v3980_v42  ;;  %v3563_v47 = vsel %vm1173_vm0, %v3533_v15, %v3534_v16  ;;  %v3731_v42 = vrot.slane %v11576_v21, 1 }
 0x2e3   : > { %v3821_v61 = vadd.f32 %v3755_v8, %v3677_v22  ;;  %v3630_v36 = vadd.f32 %v3563_v47, %v11183_v35  ;;  %v3207_v46 = vpop.f32.mrf.mxu0  ;;  %v3923_v56 = vmax.f32 %v3875_v5, 0.0  ;;  %v9543_v8 = vld [vmem:[#allocation8 + $0x16c] ss:$12 sps:$4 sm:$0xff]   ;;  %v9544_v47 = vld [vmem:[#allocation8 + $0x128] ss:$12 sps:$4 sm:$0xff]   ;;  %v3732_v5 = vrot.slane %v11603_v53, 1 }
 0x2e4   : > { %8643 = vst [vmem:[#allocation2 + $0x80] sm:$0xff] %v8507_v43   ;;  %v3535_v20 = vrot.slane %v3207_v46, 7  ;;  %v3470_v43 = vpop.f32.mrf.mxu1  ;;  %5706 = vmatprep.subr.bf16.mxu0 %v9543_v8  ;;  %9121 = vmatprep.subr.bf16.mxu1 %v9544_v47 }
 0x2e5   : > { %v3876_v18 = vadd.f32 %v11581_v57, %v3821_v61  ;;  %v3678_v17 = vadd.f32 %v3630_v36, %v3203_v59  ;;  %v3209_v55 = vpop.f32.mrf.mxu0  ;;  %9122 = vmatpush3.bf16.msra.mxu1 %v9544_v47 }
 0x2e6   : > { %v3562_v60 = vsel %vm1173_vm0, %v3534_v16, %v3535_v20  ;;  %v3751_v16 = vsel %vm1366_vm1, %v3729_v45, %v3730_v39 }
 0x2e7   : > { %v3924_v35 = vmax.f32 %v3876_v18, 0.0  ;;  %v3822_v44 = vadd.f32 %v3754_v38, %v3678_v17  ;;  %v3631_v58 = vadd.f32 %v3562_v60, %v11173_v24  ;;  %v3211_v49 = vpop.f32.mrf.mxu0  ;;  %v3750_v18 = vsel %vm1366_vm1, %v3730_v39, %v3731_v42 }
 0x2e8   : > { %v3536_v2 = vrot.slane %v3211_v49, 7 }
 0x2e9   : > { %v3983_v13 = vsel %vm3947_vm2, %v3924_v35, 0.0  ;;  %v3877_v28 = vadd.f32 %v11581_v57, %v3822_v44  ;;  %v3679_v27 = vadd.f32 %v3631_v58, %v3209_v55  ;;  %v3213_v29 = vpop.f32.mrf.mxu0  ;;  %v11638_v55 = vpop.f32.mrf.mxu1  ;;  %v3749_v58 = vsel %vm1366_vm1, %v3731_v42, %v3732_v5 }
 0x2ea   : > { %v8512_v4 = vpack.c.bf16 %v3983_v13, %v3923_v56  ;;  %v3561_v30 = vsel %vm1173_vm0, %v3535_v20, %v3536_v2  ;;  %v3733_v56 = vrot.slane %v3470_v43, 1 }
 0x2eb   : > { %v3823_v24 = vadd.f32 %v3753_v10, %v3679_v27  ;;  %v3632_v7 = vadd.f32 %v3561_v30, %v11192_v31  ;;  %v3217_v40 = vpop.f32.mrf.mxu0  ;;  %v3925_v15 = vmax.f32 %v3877_v28, 0.0  ;;  %v3473_v13 = vpop.f32.mrf.mxu1 }
 0x2ec   : > { %8644 = vst [vmem:[#allocation2 + $0x88] sm:$0xff] %v8512_v4   ;;  %v3537_v14 = vrot.slane %v3217_v40, 7  ;;  %v3748_v40 = vsel %vm1366_vm1, %v3732_v5, %v3733_v56  ;;  %v3734_v39 = vrot.slane %v3473_v13, 1 }
 0x2ed   : > { %v3878_v62 = vadd.f32 %v11581_v57, %v3823_v24  ;;  %v3680_v32 = vadd.f32 %v3632_v7, %v3213_v29  ;;  %v3219_v48 = vpop.f32.mrf.mxu0  ;;  %v3984_v52 = vsel %vm3942_vm3, %v3925_v15, 0.0  ;;  %v12958_v29 = vld [vmem:[#allocation26_spill] sm:$0xff] }
 0x2ee   : > { %v3560_v1 = vsel %vm1173_vm0, %v3536_v2, %v3537_v14 }
 0x2ef   : > { %v3926_v25 = vmax.f32 %v3878_v62, 0.0  ;;  %v3824_v63 = vadd.f32 %v3752_v26, %v3680_v32  ;;  %v3633_v31 = vadd.f32 %v3560_v1, %v11211_v11  ;;  %v3221_v33 = vpop.f32.mrf.mxu0  ;;  %v11656_v62 = vpop.f32.mrf.mxu1 }
 0x2f0   : > { %v3538_v34 = vrot.slane %v3221_v33, 7  ;;  %v3735_v33 = vrot.slane %v11620_v23, 1  ;;  %v12959_v23 = vld [vmem:[#allocation28_spill] sm:$0xff] }
 0x2f1   : > { %v8517_v0 = vpack.c.bf16 %v3926_v25, %v3984_v52  ;;  %v3879_v3 = vadd.f32 %v11581_v57, %v3824_v63  ;;  %v3681_v22 = vadd.f32 %v3633_v31, %v3219_v48  ;;  %v3223_v59 = vpop.f32.mrf.mxu0 }
 0x2f2   : > { %v3559_v11 = vsel %vm1173_vm0, %v3537_v14, %v3538_v34 }
 0x2f3   : > { %8645 = vst [vmem:[#allocation2 + $0x90] sm:$0xff] %v8517_v0   ;;  %v3825_v61 = vadd.f32 %v3751_v16, %v3681_v22  ;;  %v3634_v36 = vadd.f32 %v3559_v11, %v11213_v41  ;;  %v3227_v46 = vpop.f32.mrf.mxu0  ;;  %v3927_v21 = vmax.f32 %v3879_v3, 0.0  ;;  %v3486_v3 = vpop.f32.mrf.mxu1 }
 0x2f4   : > { %v3539_v51 = vrot.slane %v3227_v46, 7 }
 0x2f5   : > { %v3880_v38 = vadd.f32 %v11581_v57, %v3825_v61  ;;  %v3682_v20 = vadd.f32 %v3634_v36, %v3223_v59  ;;  %v3229_v17 = vpop.f32.mrf.mxu0  ;;  %v3986_v10 = vsel %vm3947_vm2, %v3927_v21, 0.0  ;;  %v3736_v59 = vrot.slane %v11638_v55, 1  ;;  %v12960_v55 = vld [vmem:[#allocation27_spill] sm:$0xff] }
 0x2f6   : > { %v3558_v60 = vsel %vm1173_vm0, %v3538_v34, %v3539_v51  ;;  %v3747_v34 = vsel %vm1366_vm1, %v3733_v56, %v3734_v39  ;;  %v3746_v36 = vsel %vm1366_vm1, %v3734_v39, %v3735_v33 }
 0x2f7   : > { %v3928_v41 = vmax.f32 %v3880_v38, 0.0  ;;  %v3635_v35 = vadd.f32 %v3558_v60, %v11203_v54  ;;  %v3231_v44 = vpop.f32.mrf.mxu0  ;;  %v3826_v53 = vadd.f32 %v3750_v18, %v3682_v20  ;;  %v11674_v38 = vpop.f32.mrf.mxu1 }
 0x2f8   : > { %v3540_v49 = vrot.slane %v3231_v44, 7  ;;  %v3745_v44 = vsel %vm1366_vm1, %v3735_v33, %v3736_v59 }
 0x2f9   : > { %v3987_v2 = vsel %vm3942_vm3, %v3928_v41, 0.0  ;;  %v3683_v45 = vadd.f32 %v3635_v35, %v3229_v17  ;;  %v3233_v19 = vpop.f32.mrf.mxu0  ;;  %v3881_v24 = vadd.f32 %v11581_v57, %v3826_v53 }
 0x2fa   : > { %v8522_v28 = vpack.c.bf16 %v3987_v2, %v3986_v10  ;;  %v3557_v54 = vsel %vm1173_vm0, %v3539_v51, %v3540_v49  ;;  %v3737_v2 = vrot.slane %v3486_v3, 1 }
 0x2fb   : > { %v3827_v27 = vadd.f32 %v3749_v58, %v3683_v45  ;;  %v3636_v4 = vadd.f32 %v3557_v54, %v12958_v29  ;;  %v3237_v30 = vpop.f32.mrf.mxu0  ;;  %v3929_v31 = vmax.f32 %v3881_v24, 0.0  ;;  %v3489_v45 = vpop.f32.mrf.mxu1 }
 0x2fc   : > { %8646 = vst [vmem:[#allocation2 + $0x98] sm:$0xff] %v8522_v28   ;;  %v3541_v7 = vrot.slane %v3237_v30, 7 }
 0x2fd   : > { %v3882_v15 = vadd.f32 %v11581_v57, %v3827_v27  ;;  %v3684_v14 = vadd.f32 %v3636_v4, %v3233_v19  ;;  %v3239_v26 = vpop.f32.mrf.mxu0  ;;  %v9569_v19 = vld [vmem:[#allocation8 + $0x110] ss:$12 sps:$4 sm:$0xff]   ;;  %v3738_v4 = vrot.slane %v3489_v45, 1 }
 0x2fe   : > { %v3556_v32 = vsel %vm1173_vm0, %v3540_v49, %v3541_v7  ;;  %9123 = vmatprep.subr.bf16.mxu1 %v9569_v19 }
 0x2ff   : > { %v3930_v48 = vmax.f32 %v3882_v15, 0.0  ;;  %v3828_v1 = vadd.f32 %v3748_v40, %v3684_v14  ;;  %v3637_v25 = vadd.f32 %v3556_v32, %v11238_v9  ;;  %v3241_v63 = vpop.f32.mrf.mxu0  ;;  %9124 = vmatpush3.bf16.msra.mxu1 %v9569_v19  ;;  %v3744_v40 = vsel %vm1366_vm1, %v3736_v59, %v3737_v2 }
 0x300   : > { %v3542_v52 = vrot.slane %v3241_v63, 7  ;;  %v3743_v63 = vsel %vm1366_vm1, %v3737_v2, %v3738_v4  ;;  %v12967_v2 = vld [vmem:[#allocation36_spill] sm:$0xff] }
 0x301   : > { %v3989_v16 = vsel %vm3947_vm2, %v3930_v48, 0.0  ;;  %v3883_v8 = vadd.f32 %v11581_v57, %v3828_v1  ;;  %v3685_v0 = vadd.f32 %v3637_v25, %v3239_v26  ;;  %v3243_v42 = vpop.f32.mrf.mxu0  ;;  %v12961_v26 = vld [vmem:[#allocation33_spill] sm:$0xff]  ;;  %v3739_v48 = vrot.slane %v11656_v62, 1 }
 0x302   : > { %v8527_v22 = vpack.c.bf16 %v3989_v16, %v3929_v31  ;;  %v3555_v9 = vsel %vm1173_vm0, %v3541_v7, %v3542_v52 }
 0x303   : > { %v3829_v43 = vadd.f32 %v3747_v34, %v3685_v0  ;;  %v3638_v47 = vadd.f32 %v3555_v9, %v12959_v23  ;;  %v3247_v11 = vpop.f32.mrf.mxu0  ;;  %v3931_v61 = vmax.f32 %v3883_v8, 0.0  ;;  %v3742_v9 = vsel %vm1366_vm1, %v3738_v4, %v3739_v48  ;;  %v12969_v4 = vld [vmem:[#allocation32_spill] sm:$0xff] }
 0x304   : > { %8647 = vst [vmem:[#allocation2 + $0xa0] sm:$0xff] %v8527_v22   ;;  %v3543_v46 = vrot.slane %v3247_v11, 7  ;;  %v3740_v11 = vrot.slane %v11674_v38, 1 }
 0x305   : > { %v3884_v5 = vadd.f32 %v11581_v57, %v3829_v43  ;;  %v3686_v51 = vadd.f32 %v3638_v47, %v3243_v42  ;;  %v3249_v21 = vpop.f32.mrf.mxu0  ;;  %v3990_v35 = vsel %vm3942_vm3, %v3931_v61, 0.0  ;;  %v12962_v42 = vld [vmem:[#allocation34_spill] sm:$0xff] }
 0x306   : > { %v3554_v20 = vsel %vm1173_vm0, %v3542_v52, %v3543_v46 }
 0x307   : > { %v3932_v18 = vmax.f32 %v3884_v5, 0.0  ;;  %v3830_v17 = vadd.f32 %v3746_v36, %v3686_v51  ;;  %v3639_v60 = vadd.f32 %v3554_v20, %v12960_v55  ;;  %v3251_v41 = vpop.f32.mrf.mxu0  ;;  %v12963_v5 = vld [vmem:[#allocation30_spill] sm:$0xff] }
 0x308   : > { %v3544_v53 = vrot.slane %v3251_v41, 7 }
 0x309   : > { %v8532_v58 = vpack.c.bf16 %v3932_v18, %v3990_v35  ;;  %v3885_v49 = vadd.f32 %v11581_v57, %v3830_v17  ;;  %v3687_v56 = vadd.f32 %v3639_v60, %v3249_v21  ;;  %v3253_v10 = vpop.f32.mrf.mxu0  ;;  %v3741_v18 = vsel %vm1366_vm1, %v3739_v48, %v3740_v11  ;;  %v12964_v35 = vld [vmem:[#allocation29_spill] sm:$0xff] }
 0x30a   : > { %v3553_v13 = vsel %vm1173_vm0, %v3543_v46, %v3544_v53  ;;  %v9576_v48 = vld [vmem:[#allocation8 + $0xf8] ss:$12 sps:$4 sm:$0xff]  }
 0x30b   : > { %8648 = vst [vmem:[#allocation2 + $0xa8] sm:$0xff] %v8532_v58   ;;  %v3831_v28 = vadd.f32 %v3745_v44, %v3687_v56  ;;  %v3640_v54 = vadd.f32 %v3553_v13, %v11247_v12  ;;  %v3257_v27 = vpop.f32.mrf.mxu0  ;;  %v3933_v30 = vmax.f32 %v3885_v49, 0.0  ;;  %v12965_v44 = vrot.slane %v12964_v35, 7  ;;  %v12966_v56 = vld [vmem:[#allocation37_spill] sm:$0xff]  ;;  %9125 = vmatprep.subr.bf16.mxu1 %v9576_v48 }
 0x30c   : > { %v3545_v29 = vrot.slane %v3257_v27, 7  ;;  %9126 = vmatpush3.bf16.msra.mxu1 %v9576_v48  ;;  %v9536_v35 = vld [vmem:[#allocation2 + $0x68] sm:$0xff]  }
 0x30d   : > { %v3886_v24 = vadd.f32 %v11581_v57, %v3831_v28  ;;  %v3688_v7 = vadd.f32 %v3640_v54, %v3253_v10  ;;  %v3259_v39 = vpop.f32.mrf.mxu0  ;;  %v3992_v31 = vsel %vm3947_vm2, %v3933_v30, 0.0  ;;  %v12968_v54 = vld [vmem:[#allocation31_spill] sm:$0xff]  ;;  %v12970_v30 = vrot.slane %v12969_v4, 1  ;;  %v9545_v4 = vld [vmem:[#allocation2 + $0x90] sm:$0xff]   ;;  %v11790_v48 = vld [vmem:[#allocation2 + $0x24] sm:$0xff]  }
 0x30e   : > { %v3552_v15 = vsel %vm1173_vm0, %v3544_v53, %v3545_v29 }
 0x30f   : > { %v3934_v14 = vmax.f32 %v3886_v24, 0.0  ;;  %v3641_v32 = vadd.f32 %v3552_v15, %v12961_v26  ;;  %v3261_v12 = vpop.f32.mrf.mxu0  ;;  %v3832_v1 = vadd.f32 %v3744_v40, %v3688_v7  ;;  %v3788_v24 = vsel %vm1366_vm1, %v3740_v11, %v12970_v30  ;;  %v12971_v40 = vld [vmem:[#allocation35_spill] sm:$0xff]  ;;  %v9528_v11 = vld [vmem:[#allocation2 + $0x30] sm:$0xff]  }
 0x310   : > { %v3546_v25 = vrot.slane %v3261_v12, 7  ;;  %v9549_v30 = vld [vmem:[#allocation2 + $0x98] sm:$0xff]  }
 0x311   : > { %v3993_v33 = vsel %vm3942_vm3, %v3934_v14, 0.0  ;;  %v3689_v52 = vadd.f32 %v3641_v32, %v3259_v39  ;;  %v3263_v34 = vpop.f32.mrf.mxu0  ;;  %v3887_v22 = vadd.f32 %v11581_v57, %v3832_v1 }
 0x312   : > { %v8537_v16 = vpack.c.bf16 %v3993_v33, %v3992_v31  ;;  %v3551_v8 = vsel %vm1173_vm0, %v3545_v29, %v3546_v25 }
 0x313   : > { %v3833_v0 = vadd.f32 %v3743_v63, %v3689_v52  ;;  %v3642_v62 = vadd.f32 %v3551_v8, %v12962_v42  ;;  %v3267_v3 = vpop.f32.mrf.mxu0  ;;  %v3935_v20 = vmax.f32 %v3887_v22, 0.0  ;;  %v9523_v8 = vld [vmem:[#allocation2 + $0x10] sm:$0xff]   ;;  %v9556_v22 = vld [vmem:[#allocation8 + $0x124] ss:$12 sps:$4 sm:$0xff]  }
 0x314   : > { %8649 = vst [vmem:[#allocation2 + $0xb0] sm:$0xff] %v8537_v16   ;;  %v3547_v59 = vrot.slane %v3267_v3, 7  ;;  %v9552_v42 = vld [vmem:[#allocation8 + $0x13c] ss:$12 sps:$4 sm:$0xff]  }
 0x315   : > { %v3888_v43 = vadd.f32 %v11581_v57, %v3833_v0  ;;  %v3690_v23 = vadd.f32 %v3642_v62, %v3263_v34  ;;  %v3269_v47 = vpop.f32.mrf.mxu0  ;;  %v9541_v34 = vld [vmem:[#allocation8 + $0x168] ss:$12 sps:$4 sm:$0xff]   ;;  %v9546_v0 = vld [vmem:[#allocation8 + $0x150] ss:$12 sps:$4 sm:$0xff]  }
 0x316   : > { %v3550_v61 = vsel %vm1173_vm0, %v3546_v25, %v3547_v59  ;;  %v9524_v62 = vld [vmem:[#allocation2 + $0x18] sm:$0xff]   ;;  %v9525_v3 = vld [vmem:[#allocation2 + $0x20] sm:$0xff]  }
 0x317   : > { %v3936_v36 = vmax.f32 %v3888_v43, 0.0  ;;  %v3834_v46 = vadd.f32 %v3742_v9, %v3690_v23  ;;  %v3643_v51 = vadd.f32 %v3550_v61, %v12963_v5  ;;  %v3271_v21 = vpop.f32.mrf.mxu0  ;;  %v9580_v9 = vld [vmem:[#allocation8 + $0xe0] ss:$12 sps:$4 sm:$0xff]   ;;  %v9529_v5 = vld [vmem:[#allocation2 + $0x38] sm:$0xff]  }
 0x318   : > { %v3548_v17 = vrot.slane %v3271_v21, 7  ;;  %9127 = vmatprep.subr.bf16.mxu1 %v9580_v9  ;;  %v9560_v43 = vld [vmem:[#allocation8 + $0x10c] ss:$12 sps:$4 sm:$0xff]   ;;  %v9526_v23 = vld [vmem:[#allocation2 + $0x28] sm:$0xff]  }
 0x319   : > { %v3995_v55 = vsel %vm3947_vm2, %v3936_v36, 0.0  ;;  %v3889_v60 = vadd.f32 %v11581_v57, %v3834_v46  ;;  %v3691_v41 = vadd.f32 %v3643_v51, %v3269_v47  ;;  %v3273_v13 = vpop.f32.mrf.mxu0  ;;  %9128 = vmatpush3.bf16.msra.mxu1 %v9580_v9  ;;  %v9558_v47 = vld [vmem:[#allocation8 + $0x108] ss:$12 sps:$4 sm:$0xff]   ;;  %v9562_v36 = vld [vmem:[#allocation8 + $0xf0] ss:$12 sps:$4 sm:$0xff]  }
 0x31a   : > { %v8542_v38 = vpack.c.bf16 %v3995_v55, %v3935_v20  ;;  %v3596_v53 = vsel %vm1173_vm0, %v3548_v17, %v12965_v44  ;;  %v3549_v58 = vsel %vm1173_vm0, %v3547_v59, %v3548_v17  ;;  %v9554_v59 = vld [vmem:[#allocation8 + $0x120] ss:$12 sps:$4 sm:$0xff]   ;;  %v9568_v46 = vld [vmem:[#allocation8 + $0xdc] ss:$12 sps:$4 sm:$0xff]   ;;  %v9566_v51 = vld [vmem:[#allocation8 + $0xd8] ss:$12 sps:$4 sm:$0xff]  }
 0x31b   : > { %v3835_v49 = vadd.f32 %v3741_v18, %v3691_v41  ;;  %v3597_v10 = vadd.f32 %v3596_v53, %v12966_v56  ;;  %v3644_v45 = vadd.f32 %v3549_v58, %v12967_v2  ;;  %v3937_v19 = vmax.f32 %v3889_v60, 0.0  ;;  %v9564_v61 = vld [vmem:[#allocation8 + $0xf4] ss:$12 sps:$4 sm:$0xff]   ;;  %v9530_v21 = vld [vmem:[#allocation2 + $0x40] sm:$0xff]   ;;  %v9572_v20 = vld [vmem:[#allocation8 + $0xc4] ss:$12 sps:$4 sm:$0xff]  }
 0x31c   : > { %8650 = vst [vmem:[#allocation2 + $0xb8] sm:$0xff] %v8542_v38   ;;  %v9570_v18 = vld [vmem:[#allocation8 + $0xc0] ss:$12 sps:$4 sm:$0xff]   ;;  %v9584_v60 = vld [vmem:[#allocation8 + $0xc8] ss:$12 sps:$4 sm:$0xff]   ;;  %v9535_v38 = vld [vmem:[#allocation2 + $0x60] sm:$0xff]  }
 0x31d   : > { %v3890_v28 = vadd.f32 %v11581_v57, %v3835_v49  ;;  %v3645_v27 = vadd.f32 %v3597_v10, %v12968_v54  ;;  %v3692_v29 = vadd.f32 %v3644_v45, %v3273_v13  ;;  %v3996_v14 = vsel %vm3942_vm3, %v3937_v19, 0.0  ;;  %v9531_v17 = vld [vmem:[#allocation2 + $0x48] sm:$0xff]   ;;  %v9532_v55 = vld [vmem:[#allocation2 + $0x50] sm:$0xff]   ;;  %9129 = vmatprep.subr.bf16.mxu1 %v9584_v60  ;;  %v9533_v41 = vld [vmem:[#allocation2 + $0x58] sm:$0xff]  }
 0x31e   : > { %9130 = vmatpush3.bf16.msra.mxu1 %v9584_v60  ;;  %v9537_v44 = vld [vmem:[#allocation2 + $0x70] sm:$0xff]   ;;  %v9538_v56 = vld [vmem:[#allocation2 + $0x78] sm:$0xff]   ;;  %v9539_v2 = vld [vmem:[#allocation2 + $0x80] sm:$0xff]  }
 0x31f   : > { %v3938_v7 = vmax.f32 %v3890_v28, 0.0  ;;  %v3789_v39 = vadd.f32 %v12971_v40, %v3645_v27  ;;  %v3836_v15 = vadd.f32 %v3788_v24, %v3692_v29  ;;  %v9590_v13 = vld [vmem:[#allocation8 + $0x22c] ss:$12 sps:$4 sm:$0xff]   ;;  %v9591_v28 = vld [vmem:[#allocation8 + $0x230] ss:$12 sps:$4 sm:$0xff]   ;;  %v9540_v29 = vld [vmem:[#allocation2 + $0x88] sm:$0xff]  }
 0x320   : > { %6797 = vmatprep.subr.bf16.mxu1 %v9590_v13  ;;  %v11759_v24 = vld [vmem:[#allocation2 + $0xa0] sm:$0xff]   ;;  %v11765_v40 = vld [vmem:[#allocation2 + $0xb0] sm:$0xff]  }
 0x321   : > { %v8547_v26 = vpack.c.bf16 %v3938_v7, %v3996_v14  ;;  %v3844_v32 = vadd.f32 %v11581_v57, %v3789_v39  ;;  %v3891_v12 = vadd.f32 %v11581_v57, %v3836_v15  ;;  %v9548_v57 = vld [vmem:[#allocation8 + $0x154] ss:$12 sps:$4 sm:$0xff]   ;;  %v9601_v14 = vld [vmem:[#allocation8 + $0x218] ss:$12 sps:$4 sm:$0xff]   ;;  %v9600_v9 = vld [vmem:[#allocation8 + $0x1fc] ss:$12 sps:$4 sm:$0xff]  }
 0x322   : > { %v11763_v7 = vld [vmem:[#allocation2 + $0xa8] sm:$0xff]   ;;  %v11851_v60 = vld [vmem:[#allocation2 + $0x74] sm:$0xff]  }
 0x323   : > { %8651 = vst [vmem:[#allocation2 + $0xc0] sm:$0xff] %v8547_v26   ;;  %v3892_v1 = vmax.f32 %v3844_v32, 0.0  ;;  %v3939_v25 = vmax.f32 %v3891_v12, 0.0  ;;  %v11770_v39 = vld [vmem:[#allocation2 + $0xb8] sm:$0xff]   ;;  %v9611_v32 = vld [vmem:[#allocation8 + $0x200] ss:$12 sps:$4 sm:$0xff]  }
 0x324   : > { %v11780_v26 = vld [vmem:[#allocation2 + $0x14] sm:$0xff]   ;;  %v11785_v12 = vld [vmem:[#allocation2 + $0x1c] sm:$0xff]  }
 0x325   : > { %v3951_v63 = vsel %vm3942_vm3, %v3892_v1, 0.0  ;;  %v3998_v31 = vsel %vm3947_vm2, %v3939_v25, 0.0  ;;  %v11795_v1 = vld [vmem:[#allocation2 + $0x2c] sm:$0xff]  }
 0x326   : > { %v8353_v33 = vpack.c.bf16 %v3951_v63, %v3951_v63  ;;  %v8400_v52 = vpack.c.bf16 %v3998_v31, %v3998_v31  ;;  %v9621_v25 = vld [vmem:[#allocation8 + $0x1e8] ss:$12 sps:$4 sm:$0xff]   ;;  %v11800_v63 = vld [vmem:[#allocation2 + $0x34] sm:$0xff]  }
 0x327   : > { %v11805_v31 = vld [vmem:[#allocation2 + $0x3c] sm:$0xff]  }
 0x328   : > { %4215 = vst [vmem:[#allocation2 + $0xc] sm:$0xf] %v8353_v33  ;;  %4262 = vst [vmem:[#allocation2 + $0xc8] sm:$0xf] %v8400_v52  ;;  %v9628_v33 = vld [vmem:[#allocation8 + $0x1d0] ss:$12 sps:$4 sm:$0xff]  }
 0x329   : > { %v9629_v52 = vld [vmem:[#allocation8 + $0x1b8] ss:$12 sps:$4 sm:$0xff]  }
 0x32f   : > { %v9522_v16 = vld [vmem:[#allocation2 + $0x8] sm:$0xff]  }
 0x330   : > { %4658 = vmatmul.mubr.bf16.gmra.mxu1 %v9522_v16  ;;  %9068 = vmatmul.mubr.bf16.vlgmr.msra.gmra.mxu0 %v9522_v16  ;;  %v11775_v15 = vld [vmem:[#allocation2 + $0xc] sm:$0xff]   ;;  %v9631_v16 = vld [vmem:[#allocation8 + $0x1a0] ss:$12 sps:$4 sm:$0xff]  }
 0x331   : > { %9071 = vmatprep.mubr.bf16.mxu0 %v9523_v8  ;;  %4666 = vmatprep.mubr.bf16.mxu1 %v12873_v6 }
 0x332   : > { %5707 = vmatpush1.bf16.msra.mxu0 %v9541_v34  ;;  %v11810_v34 = vld [vmem:[#allocation2 + $0x44] sm:$0xff]  }
 0x333   : > { %5708 = vmatprep.subr.bf16.mxu0 %v9548_v57  ;;  %v11816_v57 = vld [vmem:[#allocation2 + $0x4c] sm:$0xff]  }
 0x336   : > { %5709 = vmatpush1.bf16.msra.mxu0 %v9546_v0  ;;  %v11822_v0 = vld [vmem:[#allocation2 + $0x54] sm:$0xff]  }
 0x337   : > { %5710 = vmatprep.subr.bf16.mxu0 %v9552_v42  ;;  %v11828_v42 = vld [vmem:[#allocation2 + $0x5c] sm:$0xff]  }
 0x338   : > { %4667 = vmatmul.mubr.bf16.gmra.mxu1 %v9523_v8  ;;  %9072 = vmatmul.mubr.bf16.gmra.mxu0 %v9524_v62  ;;  %v9632_v8 = vld [vmem:[#allocation8 + $0x188] ss:$12 sps:$4 sm:$0xff]  }
 0x339   : > { %9075 = vmatprep.mubr.bf16.mxu0 %v9525_v3  ;;  %4675 = vmatprep.mubr.bf16.mxu1 %v12873_v6 }
 0x33a   : > { %5711 = vmatpush1.bf16.msra.mxu0 %v9550_v50  ;;  %v11834_v50 = vld [vmem:[#allocation2 + $0x64] sm:$0xff]  }
 0x33b   : > { %5712 = vmatprep.subr.bf16.mxu0 %v9556_v22  ;;  %v9593_v22 = vld [vmem:[#allocation8 + $0x210] ss:$12 sps:$4 sm:$0xff]  }
 0x33e   : > { %5713 = vmatpush1.bf16.msra.mxu0 %v9554_v59  ;;  %v11840_v59 = vld [vmem:[#allocation2 + $0x6c] sm:$0xff]  }
 0x33f   : > { %5714 = vmatprep.subr.bf16.mxu0 %v9560_v43  ;;  %v9598_v43 = vld [vmem:[#allocation8 + $0x1f8] ss:$12 sps:$4 sm:$0xff]  }
 0x340   : > { %4676 = vmatmul.mubr.bf16.gmra.mxu1 %v9524_v62  ;;  %9076 = vmatmul.mubr.bf16.gmra.mxu0 %v9526_v23  ;;  %v9588_v62 = vld [vmem:[#allocation8 + $0x228] ss:$12 sps:$4 sm:$0xff]  }
 0x341   : > { %9079 = vmatprep.mubr.bf16.mxu0 %v9528_v11  ;;  %4685 = vmatprep.mubr.bf16.mxu1 %v12873_v6 }
 0x342   : > { %5715 = vmatpush1.bf16.msra.mxu0 %v9558_v47 }
 0x343   : > { %5716 = vmatprep.subr.bf16.mxu0 %v9564_v61 }
 0x346   : > { %5717 = vmatpush1.bf16.msra.mxu0 %v9562_v36 }
 0x347   : > { %5718 = vmatprep.subr.bf16.mxu0 %v9568_v46  ;;  %v9603_v46 = vld [vmem:[#allocation8 + $0x1e0] ss:$12 sps:$4 sm:$0xff]  }
 0x348   : > { %4686 = vmatmul.mubr.bf16.gmra.mxu1 %v9525_v3  ;;  %9080 = vmatmul.mubr.bf16.gmra.mxu0 %v9529_v5  ;;  %v9595_v3 = vld [vmem:[#allocation8 + $0x214] ss:$12 sps:$4 sm:$0xff]  }
 0x349   : > { %9083 = vmatprep.mubr.bf16.mxu0 %v9530_v21  ;;  %4694 = vmatprep.mubr.bf16.mxu1 %v12873_v6 }
 0x34a   : > { %5719 = vmatpush1.bf16.msra.mxu0 %v9566_v51  ;;  %v9610_v51 = vld [vmem:[#allocation8 + $0x1cc] ss:$12 sps:$4 sm:$0xff]  }
 0x34b   : > { %5720 = vmatprep.subr.bf16.mxu0 %v9572_v20 }
 0x34e   : > { %5721 = vmatpush1.bf16.msra.mxu0 %v9570_v18 }
 0x34f   : > { %9179 = vmatprep.subr.bf16.mxu0 %v9591_v28 }
 0x350   : > { %4695 = vmatmul.mubr.bf16.gmra.mxu1 %v9526_v23  ;;  %9084 = vmatmul.mubr.bf16.gmra.mxu0 %v9531_v17  ;;  %v9605_v23 = vld [vmem:[#allocation8 + $0x1e4] ss:$12 sps:$4 sm:$0xff]  }
 0x351   : > { %9087 = vmatprep.mubr.bf16.mxu0 %v9532_v55  ;;  %4703 = vmatprep.mubr.bf16.mxu1 %v12873_v6 }
 0x358   : > { %4704 = vmatmul.mubr.bf16.gmra.mxu1 %v9528_v11  ;;  %9088 = vmatmul.mubr.bf16.gmra.mxu0 %v9533_v41 }
 0x359   : > { %9091 = vmatprep.mubr.bf16.mxu0 %v9535_v38  ;;  %4713 = vmatprep.mubr.bf16.mxu1 %v12873_v6 }
 0x35b   : > { %v4649_v53 = vpop.f32.mrf.mxu1 }
 0x35d   : > { %v4651_v58 = vpop.f32.mrf.mxu1 }
 0x35e   : > { %v5129_v45 = vrot.slane %v4651_v58, 1 }
 0x35f   : > { %v11746_v49 = vpop.f32.mrf.mxu1 }
 0x360   : > { %4714 = vmatmul.mubr.bf16.gmra.mxu1 %v9529_v5  ;;  %9092 = vmatmul.mubr.bf16.gmra.mxu0 %v9536_v35 }
 0x361   : > { %9095 = vmatprep.mubr.bf16.mxu0 %v9537_v44  ;;  %4722 = vmatprep.mubr.bf16.mxu1 %v12873_v6  ;;  %v11748_v10 = vpop.f32.mrf.mxu1 }
 0x362   : > { %v5130_v19 = vrot.slane %v11748_v10, 1 }
 0x364   : > { %v5208_v54 = vsel %vm1366_vm1, %v5129_v45, %v5130_v19 }
 0x365   : > { %v11756_v27 = vadd.f32 %v5208_v54, %v4649_v53  ;;  %v9615_v53 = vld [vmem:[#allocation8 + $0x1b4] ss:$12 sps:$4 sm:$0xff]  }
 0x368   : > { %4723 = vmatmul.mubr.bf16.gmra.mxu1 %v9530_v21  ;;  %9096 = vmatmul.mubr.bf16.gmra.mxu0 %v9538_v56 }
 0x369   : > { %9099 = vmatprep.mubr.bf16.mxu0 %v9539_v2  ;;  %4731 = vmatprep.mubr.bf16.mxu1 %v12873_v6 }
 0x370   : > { %4732 = vmatmul.mubr.bf16.gmra.mxu1 %v9531_v17  ;;  %9100 = vmatmul.mubr.bf16.gmra.mxu0 %v9540_v29 }
 0x371   : > { %9103 = vmatprep.mubr.bf16.mxu0 %v9545_v4  ;;  %4741 = vmatprep.mubr.bf16.mxu1 %v12873_v6 }
 0x378   : > { %4742 = vmatmul.mubr.bf16.gmra.mxu1 %v9532_v55  ;;  %9104 = vmatmul.mubr.bf16.gmra.mxu0 %v9549_v30 }
 0x379   : > { %9107 = vmatprep.mubr.bf16.mxu0 %v11759_v24  ;;  %4750 = vmatprep.mubr.bf16.mxu1 %v12873_v6 }
 0x380   : > { %4751 = vmatmul.mubr.bf16.gmra.mxu1 %v9533_v41  ;;  %9108 = vmatmul.mubr.bf16.gmra.mxu0 %v11763_v7  ;;  %v9608_v41 = vld [vmem:[#allocation8 + $0x1c8] ss:$12 sps:$4 sm:$0xff]  }
 0x381   : > { %9111 = vmatprep.mubr.bf16.mxu0 %v11765_v40  ;;  %4759 = vmatprep.mubr.bf16.mxu1 %v12873_v6 }
 0x388   : > { %4760 = vmatmul.mubr.bf16.gmra.mxu1 %v9535_v38  ;;  %9112 = vmatmul.mubr.bf16.gmra.mxu0 %v11770_v39 }
 0x389   : > { %4769 = vmatprep.mubr.bf16.mxu1 %v12873_v6  ;;  %5738 = vmatprep.mubr.bf16.mxu0 %v12873_v6 }
 0x390   : > { %4770 = vmatmul.mubr.bf16.gmra.mxu1 %v9536_v35  ;;  %5739 = vmatmul.mubr.bf16.vlgmr.msra.gmra.mxu0 %v11775_v15 }
 0x391   : > { %4778 = vmatprep.mubr.bf16.mxu1 %v12873_v6  ;;  %5748 = vmatprep.mubr.bf16.mxu0 %v12873_v6 }
 0x392   : > { %9180 = vmatpush3.bf16.msra.mxu0 %v9591_v28  ;;  %v9613_v28 = vld [vmem:[#allocation8 + $0x1b0] ss:$12 sps:$4 sm:$0xff]  }
 0x393   : > { %9181 = vmatprep.subr.bf16.mxu0 %v9601_v14 }
 0x396   : > { %9182 = vmatpush3.bf16.msra.mxu0 %v9601_v14 }
 0x397   : > { %9183 = vmatprep.subr.bf16.mxu0 %v9611_v32 }
 0x398   : > { %4779 = vmatmul.mubr.bf16.gmra.mxu1 %v9537_v44  ;;  %5749 = vmatmul.mubr.bf16.gmra.mxu0 %v11780_v26 }
 0x399   : > { %4787 = vmatprep.mubr.bf16.mxu1 %v12873_v6  ;;  %5757 = vmatprep.mubr.bf16.mxu0 %v12873_v6 }
 0x39a   : > { %9184 = vmatpush3.bf16.msra.mxu0 %v9611_v32 }
 0x39b   : > { %9185 = vmatprep.subr.bf16.mxu0 %v9621_v25 }
 0x39e   : > { %9186 = vmatpush3.bf16.msra.mxu0 %v9621_v25 }
 0x39f   : > { %9187 = vmatprep.subr.bf16.mxu0 %v9628_v33 }
 0x3a0   : > { %4788 = vmatmul.mubr.bf16.gmra.mxu1 %v9538_v56  ;;  %5758 = vmatmul.mubr.bf16.gmra.mxu0 %v11785_v12 }
 0x3a1   : > { %4797 = vmatprep.mubr.bf16.mxu1 %v12873_v6  ;;  %5766 = vmatprep.mubr.bf16.mxu0 %v12873_v6 }
 0x3a2   : > { %9188 = vmatpush3.bf16.msra.mxu0 %v9628_v33  ;;  %v9626_v33 = vld [vmem:[#allocation8 + $0x184] ss:$12 sps:$4 sm:$0xff]  }
 0x3a3   : > { %9189 = vmatprep.subr.bf16.mxu0 %v9629_v52 }
 0x3a6   : > { %9190 = vmatpush3.bf16.msra.mxu0 %v9629_v52 }
 0x3a7   : > { %9191 = vmatprep.subr.bf16.mxu0 %v9631_v16 }
 0x3a8   : > { %4798 = vmatmul.mubr.bf16.gmra.mxu1 %v9539_v2  ;;  %5767 = vmatmul.mubr.bf16.gmra.mxu0 %v11790_v48 }
 0x3a9   : > { %4806 = vmatprep.mubr.bf16.mxu1 %v12873_v6  ;;  %5776 = vmatprep.mubr.bf16.mxu0 %v12873_v6 }
 0x3aa   : > { %9192 = vmatpush3.bf16.msra.mxu0 %v9631_v16 }
 0x3ab   : > { %9193 = vmatprep.subr.bf16.mxu0 %v9632_v8 }
 0x3ae   : > { %9194 = vmatpush3.bf16.msra.mxu0 %v9632_v8 }
 0x3b0   : > { %4807 = vmatmul.mubr.bf16.gmra.mxu1 %v9540_v29  ;;  %5777 = vmatmul.mubr.bf16.gmra.mxu0 %v11795_v1 }
 0x3b1   : > { %4815 = vmatprep.mubr.bf16.mxu1 %v12873_v6  ;;  %5785 = vmatprep.mubr.bf16.mxu0 %v12873_v6 }
 0x3b8   : > { %4816 = vmatmul.mubr.bf16.gmra.mxu1 %v9545_v4  ;;  %5786 = vmatmul.mubr.bf16.gmra.mxu0 %v11800_v63 }
 0x3b9   : > { %4825 = vmatprep.mubr.bf16.mxu1 %v12873_v6  ;;  %5794 = vmatprep.mubr.bf16.mxu0 %v12873_v6 }
 0x3c0   : > { %4826 = vmatmul.mubr.bf16.gmra.mxu1 %v9549_v30  ;;  %5795 = vmatmul.mubr.bf16.gmra.mxu0 %v11805_v31 }
 0x3c1   : > { %4834 = vmatprep.mubr.bf16.mxu1 %v12873_v6  ;;  %5804 = vmatprep.mubr.bf16.mxu0 %v12873_v6 }
 0x3c8   : > { %4835 = vmatmul.mubr.bf16.gmra.mxu1 %v11759_v24  ;;  %5805 = vmatmul.mubr.bf16.gmra.mxu0 %v11810_v34 }
 0x3c9   : > { %4843 = vmatprep.mubr.bf16.mxu1 %v12873_v6  ;;  %5813 = vmatprep.mubr.bf16.mxu0 %v12873_v6 }
 0x3d0   : > { %4844 = vmatmul.mubr.bf16.gmra.mxu1 %v11763_v7  ;;  %5814 = vmatmul.mubr.bf16.gmra.mxu0 %v11816_v57  ;;  %v9620_v7 = vld [vmem:[#allocation8 + $0x19c] ss:$12 sps:$4 sm:$0xff]  }
 0x3d1   : > { %4853 = vmatprep.mubr.bf16.mxu1 %v12873_v6  ;;  %5822 = vmatprep.mubr.bf16.mxu0 %v12873_v6 }
 0x3d8   : > { %4854 = vmatmul.mubr.bf16.gmra.mxu1 %v11765_v40  ;;  %5823 = vmatmul.mubr.bf16.gmra.mxu0 %v11822_v0 }
 0x3d9   : > { %4862 = vmatprep.mubr.bf16.mxu1 %v12873_v6  ;;  %5832 = vmatprep.mubr.bf16.mxu0 %v12873_v6 }
 0x3e0   : > { %4863 = vmatmul.mubr.bf16.gmra.mxu1 %v11770_v39  ;;  %5833 = vmatmul.mubr.bf16.gmra.mxu0 %v11828_v42 }
 0x3e1   : > { %9131 = vmatprep.mubr.bf16.mxu1 %v11775_v15  ;;  %5841 = vmatprep.mubr.bf16.mxu0 %v12873_v6 }
 0x3e8   : > { %5842 = vmatmul.mubr.bf16.gmra.mxu0 %v11834_v50  ;;  %9132 = vmatmul.mubr.bf16.vlgmr.msra.gmra.mxu1 %v11780_v26 }
 0x3e9   : > { %9135 = vmatprep.mubr.bf16.mxu1 %v11785_v12  ;;  %6798 = vmatpush1.bf16.msra.mxu1 %v9588_v62 }
 0x3ea   : > { %5850 = vmatprep.mubr.bf16.mxu0 %v12873_v6  ;;  %6799 = vmatprep.subr.bf16.mxu1 %v9595_v3 }
 0x3ed   : > { %6800 = vmatpush1.bf16.msra.mxu1 %v9593_v22 }
 0x3ee   : > { %6801 = vmatprep.subr.bf16.mxu1 %v9600_v9 }
 0x3f0   : > { %v4659_v47 = vpop.f32.mrf.mxu1  ;;  %v9069_v11 = vpop.f32.mrf.mxu0  ;;  %5851 = vmatmul.mubr.bf16.gmra.mxu0 %v11840_v59  ;;  %9136 = vmatmul.mubr.bf16.gmra.mxu1 %v11790_v48  ;;  %v11871_v48 = vld [vmem:[#allocation2 + $0x7c] sm:$0xff]  }
 0x3f1   : > { %9139 = vmatprep.mubr.bf16.mxu1 %v11795_v1  ;;  %5860 = vmatprep.mubr.bf16.mxu0 %v12873_v6  ;;  %v5243_v38 = vrot.slane %v9069_v11, 2  ;;  %v9618_v1 = vld [vmem:[#allocation8 + $0x198] ss:$12 sps:$4 sm:$0xff]  }
 0x3f2   : > { %v4660_v61 = vpop.f32.mrf.mxu1  ;;  %v4906_v36 = vpop.f32.mrf.mxu0  ;;  %6802 = vmatpush1.bf16.msra.mxu1 %v9598_v43 }
 0x3f3   : > { %v5131_v5 = vrot.slane %v4660_v61, 1  ;;  %6803 = vmatprep.subr.bf16.mxu1 %v9605_v23  ;;  %v5241_v35 = vrot.slane %v4906_v36, 2  ;;  %v9624_v23 = vld [vmem:[#allocation8 + $0x180] ss:$12 sps:$4 sm:$0xff]  }
 0x3f4   : > { %v4662_v21 = vpop.f32.mrf.mxu1  ;;  %v9070_v20 = vpop.f32.mrf.mxu0 }
 0x3f5   : > { %v5207_v18 = vsel %vm1366_vm1, %v5130_v19, %v5131_v5 }
 0x3f6   : > { %v4664_v17 = vpop.f32.mrf.mxu1  ;;  %v4909_v55 = vpop.f32.mrf.mxu0  ;;  %6804 = vmatpush1.bf16.msra.mxu1 %v9603_v46  ;;  %v5210_v10 = vadd.f32 %v5207_v18, %v11746_v49  ;;  %v5244_v49 = vrot.slane %v9070_v20, 2  ;;  %v11889_v20 = vld [vmem:[#allocation2 + $0x84] sm:$0xff]  }
 0x3f7   : > { %v5242_v44 = vrot.slane %v4909_v55, 2  ;;  %6805 = vmatprep.subr.bf16.mxu1 %v9610_v51  ;;  %v5132_v4 = vrot.slane %v4664_v17, 1 }
 0x3f8   : > { %v4668_v58 = vpop.f32.mrf.mxu1  ;;  %v9073_v56 = vpop.f32.mrf.mxu0  ;;  %5861 = vmatmul.mubr.bf16.gmra.mxu0 %v11851_v60  ;;  %9140 = vmatmul.mubr.bf16.gmra.mxu1 %v11800_v63 }
 0x3f9   : > { %9143 = vmatprep.mubr.bf16.mxu1 %v11805_v31  ;;  %5869 = vmatprep.mubr.bf16.mxu0 %v12873_v6  ;;  %v5321_v2 = vsel %vm5289_vm4, %v5241_v35, %v5242_v44  ;;  %v5320_v45 = vsel %vm5289_vm4, %v5242_v44, %v5243_v38  ;;  %v5247_v15 = vrot.slane %v9073_v56, 2 }
 0x3fa   : > { %v4670_v19 = vpop.f32.mrf.mxu1  ;;  %v4922_v13 = vpop.f32.mrf.mxu0  ;;  %6806 = vmatpush1.bf16.msra.mxu1 %v9608_v41  ;;  %v11863_v54 = vadd.f32 %v5321_v2, %v11756_v27  ;;  %v11865_v29 = vadd.f32 %v5320_v45, %v5210_v10 }
 0x3fb   : > { %v5133_v30 = vrot.slane %v4670_v19, 1  ;;  %v5245_v24 = vrot.slane %v4922_v13, 2  ;;  %6807 = vmatprep.subr.bf16.mxu1 %v9615_v53 }
 0x3fc   : > { %v4672_v40 = vpop.f32.mrf.mxu1  ;;  %v9074_v39 = vpop.f32.mrf.mxu0 }
 0x3fd   : > { %v5206_v14 = vsel %vm1366_vm1, %v5132_v4, %v5133_v30  ;;  %v5248_v26 = vrot.slane %v9074_v39, 2  ;;  %v5319_v32 = vsel %vm5289_vm4, %v5244_v49, %v5245_v24  ;;  %v9606_v49 = vld [vmem:[#allocation2 + $0x8c] sm:$0xff]  }
 0x3fe   : > { %v4673_v27 = vpop.f32.mrf.mxu1  ;;  %v4925_v12 = vpop.f32.mrf.mxu0  ;;  %6808 = vmatpush1.bf16.msra.mxu1 %v9613_v28  ;;  %v5211_v25 = vadd.f32 %v5206_v14, %v4662_v21 }
 0x3ff   : > { %v5134_v63 = vrot.slane %v4673_v27, 1  ;;  %v5246_v31 = vrot.slane %v4925_v12, 2  ;;  %6809 = vmatprep.subr.bf16.mxu1 %v9620_v7  ;;  %v5317_v52 = vsel %vm5289_vm4, %v5247_v15, %v5248_v26 }
 0x400   : > { %v4677_v16 = vpop.f32.mrf.mxu1  ;;  %v9077_v8 = vpop.f32.mrf.mxu0  ;;  %5870 = vmatmul.mubr.bf16.gmra.mxu0 %v11871_v48  ;;  %9144 = vmatmul.mubr.bf16.gmra.mxu1 %v11810_v34  ;;  %v11877_v62 = vadd.f32 %v5319_v32, %v5211_v25 }
 0x401   : > { %9147 = vmatprep.mubr.bf16.mxu1 %v11816_v57  ;;  %5878 = vmatprep.mubr.bf16.mxu0 %v12873_v6  ;;  %v5205_v3 = vsel %vm1366_vm1, %v5133_v30, %v5134_v63  ;;  %v5318_v22 = vsel %vm5289_vm4, %v5245_v24, %v5246_v31  ;;  %v5251_v57 = vrot.slane %v9077_v8, 2 }
 0x402   : > { %v4679_v9 = vpop.f32.mrf.mxu1  ;;  %v4938_v43 = vpop.f32.mrf.mxu0  ;;  %6810 = vmatpush1.bf16.msra.mxu1 %v9618_v1  ;;  %v5212_v47 = vadd.f32 %v5205_v3, %v4668_v58 }
 0x403   : > { %v5249_v11 = vrot.slane %v4938_v43, 2  ;;  %6811 = vmatprep.subr.bf16.mxu1 %v9626_v33  ;;  %v5135_v18 = vrot.slane %v4679_v9, 1 }
 0x404   : > { %v4681_v34 = vpop.f32.mrf.mxu1  ;;  %v9078_v61 = vpop.f32.mrf.mxu0  ;;  %v11885_v36 = vadd.f32 %v5318_v22, %v5212_v47  ;;  %v9607_v22 = vld [vmem:[#allocation2 + $0x94] sm:$0xff]  }
 0x405   : > { %v5252_v46 = vrot.slane %v9078_v61, 2  ;;  %v5316_v5 = vsel %vm5289_vm4, %v5248_v26, %v5249_v11 }
 0x406   : > { %v4683_v51 = vpop.f32.mrf.mxu1  ;;  %v4941_v21 = vpop.f32.mrf.mxu0  ;;  %6812 = vmatpush1.bf16.msra.mxu1 %v9624_v23 }
 0x407   : > { %v5136_v17 = vrot.slane %v4683_v51, 1  ;;  %v5250_v55 = vrot.slane %v4941_v21, 2  ;;  %v11893_v41 = vsel %vm5289_vm4, %v5251_v57, %v5252_v46 }
 0x408   : > { %v4687_v38 = vpop.f32.mrf.mxu1  ;;  %v9081_v35 = vpop.f32.mrf.mxu0  ;;  %5879 = vmatmul.mubr.bf16.gmra.mxu0 %v11889_v20  ;;  %9148 = vmatmul.mubr.bf16.gmra.mxu1 %v11822_v0 }
 0x409   : > { %9151 = vmatprep.mubr.bf16.mxu1 %v11828_v42  ;;  %5888 = vmatprep.mubr.bf16.mxu0 %v12873_v6  ;;  %v5204_v44 = vsel %vm1366_vm1, %v5135_v18, %v5136_v17  ;;  %v5315_v53 = vsel %vm5289_vm4, %v5250_v55, %v5251_v57  ;;  %v5255_v30 = vrot.slane %v9081_v35, 2 }
 0x40a   : > { %v4688_v58 = vpop.f32.mrf.mxu1  ;;  %v4954_v56 = vpop.f32.mrf.mxu0  ;;  %v5213_v10 = vadd.f32 %v5204_v44, %v4677_v16 }
 0x40b   : > { %v5137_v2 = vrot.slane %v4688_v58, 1  ;;  %v5253_v24 = vrot.slane %v4954_v56, 2  ;;  %v9612_v58 = vld [vmem:[#allocation2 + $0x9c] sm:$0xff]  }
 0x40c   : > { %v4690_v45 = vpop.f32.mrf.mxu1  ;;  %v9082_v19 = vpop.f32.mrf.mxu0  ;;  %v11903_v13 = vadd.f32 %v5317_v52, %v5213_v10 }
 0x40d   : > { %v5203_v0 = vsel %vm1366_vm1, %v5136_v17, %v5137_v2  ;;  %v5256_v12 = vrot.slane %v9082_v19, 2 }
 0x40e   : > { %v4692_v42 = vpop.f32.mrf.mxu1  ;;  %v4957_v28 = vpop.f32.mrf.mxu0  ;;  %v5214_v4 = vadd.f32 %v5203_v0, %v4681_v34 }
 0x40f   : > { %v5254_v7 = vrot.slane %v4957_v28, 2  ;;  %v5138_v1 = vrot.slane %v4692_v42, 1 }
 0x410   : > { %v4696_v40 = vpop.f32.mrf.mxu1  ;;  %v9085_v39 = vpop.f32.mrf.mxu0  ;;  %5889 = vmatmul.mubr.bf16.gmra.mxu0 %v9606_v49  ;;  %9152 = vmatmul.mubr.bf16.gmra.mxu1 %v11834_v50  ;;  %v11908_v15 = vadd.f32 %v5316_v5, %v5214_v4 }
 0x411   : > { %9155 = vmatprep.mubr.bf16.mxu1 %v11840_v59  ;;  %5897 = vmatprep.mubr.bf16.mxu0 %v12873_v6  ;;  %v5313_v14 = vsel %vm5289_vm4, %v5253_v24, %v5254_v7  ;;  %v11916_v26 = vsel %vm5289_vm4, %v5254_v7, %v5255_v30  ;;  %v5259_v33 = vrot.slane %v9085_v39, 2 }
 0x412   : > { %v4698_v32 = vpop.f32.mrf.mxu1  ;;  %v4970_v27 = vpop.f32.mrf.mxu0 }
 0x413   : > { %v5139_v25 = vrot.slane %v4698_v32, 1  ;;  %v5257_v63 = vrot.slane %v4970_v27, 2  ;;  %v9616_v27 = vld [vmem:[#allocation2 + $0xa4] sm:$0xff]  }
 0x414   : > { %v4700_v50 = vpop.f32.mrf.mxu1  ;;  %v9086_v31 = vpop.f32.mrf.mxu0 }
 0x415   : > { %v5202_v59 = vsel %vm1366_vm1, %v5138_v1, %v5139_v25  ;;  %v5260_v52 = vrot.slane %v9086_v31, 2  ;;  %v11922_v16 = vsel %vm5289_vm4, %v5256_v12, %v5257_v63 }
 0x416   : > { %v4701_v8 = vpop.f32.mrf.mxu1  ;;  %v4973_v3 = vpop.f32.mrf.mxu0  ;;  %v5215_v9 = vadd.f32 %v5202_v59, %v4690_v45 }
 0x417   : > { %v5140_v43 = vrot.slane %v4701_v8, 1  ;;  %v5258_v23 = vrot.slane %v4973_v3, 2  ;;  %v11926_v47 = vsel %vm5289_vm4, %v5259_v33, %v5260_v52 }
 0x418   : > { %v4705_v11 = vpop.f32.mrf.mxu1  ;;  %v9089_v34 = vpop.f32.mrf.mxu0  ;;  %5898 = vmatmul.mubr.bf16.gmra.mxu0 %v9607_v22  ;;  %9156 = vmatmul.mubr.bf16.gmra.mxu1 %v11851_v60  ;;  %v11929_v61 = vadd.f32 %v5315_v53, %v5215_v9 }
 0x419   : > { %9159 = vmatprep.mubr.bf16.mxu1 %v11871_v48  ;;  %5906 = vmatprep.mubr.bf16.mxu0 %v12873_v6  ;;  %v5201_v57 = vsel %vm1366_vm1, %v5139_v25, %v5140_v43  ;;  %v11937_v46 = vsel %vm5289_vm4, %v5257_v63, %v5258_v23  ;;  %v5263_v38 = vrot.slane %v9089_v34, 2 }
 0x41a   : > { %v4707_v5 = vpop.f32.mrf.mxu1  ;;  %v4986_v51 = vpop.f32.mrf.mxu0  ;;  %v5216_v21 = vadd.f32 %v5201_v57, %v4696_v40 }
 0x41b   : > { %v5261_v18 = vrot.slane %v4986_v51, 2  ;;  %v5141_v56 = vrot.slane %v4707_v5, 1 }
 0x41c   : > { %v4709_v17 = vpop.f32.mrf.mxu1  ;;  %v9090_v55 = vpop.f32.mrf.mxu0  ;;  %v11940_v60 = vadd.f32 %v11893_v41, %v5216_v21 }
 0x41d   : > { %v5264_v48 = vrot.slane %v9090_v55, 2  ;;  %v11944_v35 = vsel %vm5289_vm4, %v5260_v52, %v5261_v18  ;;  %v9617_v18 = vld [vmem:[#allocation2 + $0xac] sm:$0xff]  }
 0x41e   : > { %v4711_v44 = vpop.f32.mrf.mxu1  ;;  %v4989_v53 = vpop.f32.mrf.mxu0 }
 0x41f   : > { %v5142_v10 = vrot.slane %v4711_v44, 1  ;;  %v5262_v2 = vrot.slane %v4989_v53, 2  ;;  %v11948_v45 = vsel %vm5289_vm4, %v5263_v38, %v5264_v48 }
 0x420   : > { %v4715_v19 = vpop.f32.mrf.mxu1  ;;  %v9093_v0 = vpop.f32.mrf.mxu0  ;;  %5907 = vmatmul.mubr.bf16.gmra.mxu0 %v9612_v58  ;;  %9160 = vmatmul.mubr.bf16.gmra.mxu1 %v11889_v20 }
 0x421   : > { %9163 = vmatprep.mubr.bf16.mxu1 %v9606_v49  ;;  %5916 = vmatprep.mubr.bf16.mxu0 %v12873_v6  ;;  %v5200_v41 = vsel %vm1366_vm1, %v5141_v56, %v5142_v10  ;;  %v11956_v42 = vsel %vm5289_vm4, %v5262_v2, %v5263_v38  ;;  %v5267_v1 = vrot.slane %v9093_v0, 2 }
 0x422   : > { %v4716_v28 = vpop.f32.mrf.mxu1  ;;  %v5002_v4 = vpop.f32.mrf.mxu0  ;;  %v5217_v30 = vadd.f32 %v5200_v41, %v4705_v11 }
 0x423   : > { %v5143_v24 = vrot.slane %v4716_v28, 1  ;;  %v5265_v25 = vrot.slane %v5002_v4, 2 }
 0x424   : > { %v4718_v7 = vpop.f32.mrf.mxu1  ;;  %v9094_v40 = vpop.f32.mrf.mxu0  ;;  %v11958_v39 = vadd.f32 %v5313_v14, %v5217_v30 }
 0x425   : > { %v5199_v20 = vsel %vm1366_vm1, %v5142_v10, %v5143_v24  ;;  %v5268_v3 = vrot.slane %v9094_v40, 2 }
 0x426   : > { %v4720_v49 = vpop.f32.mrf.mxu1  ;;  %v5005_v32 = vpop.f32.mrf.mxu0  ;;  %v5218_v12 = vadd.f32 %v5199_v20, %v4709_v17 }
 0x427   : > { %v5266_v63 = vrot.slane %v5005_v32, 2  ;;  %v5144_v9 = vrot.slane %v4720_v49, 1  ;;  %v9622_v49 = vld [vmem:[#allocation2 + $0xb4] sm:$0xff]  }
 0x428   : > { %v4724_v50 = vpop.f32.mrf.mxu1  ;;  %v9097_v31 = vpop.f32.mrf.mxu0  ;;  %5917 = vmatmul.mubr.bf16.gmra.mxu0 %v9616_v27  ;;  %9164 = vmatmul.mubr.bf16.gmra.mxu1 %v9607_v22  ;;  %v11963_v33 = vadd.f32 %v11916_v26, %v5218_v12 }
 0x429   : > { %9167 = vmatprep.mubr.bf16.mxu1 %v9612_v58  ;;  %5925 = vmatprep.mubr.bf16.mxu0 %v12873_v6  ;;  %v11968_v14 = vsel %vm5289_vm4, %v5265_v25, %v5266_v63  ;;  %v11972_v59 = vsel %vm5289_vm4, %v5266_v63, %v5267_v1  ;;  %v5271_v11 = vrot.slane %v9097_v31, 2  ;;  %v9623_v1 = vld [vmem:[#allocation2 + $0xbc] sm:$0xff]  }
 0x42a   : > { %v4726_v52 = vpop.f32.mrf.mxu1  ;;  %v5018_v8 = vpop.f32.mrf.mxu0 }
 0x42b   : > { %v5145_v43 = vrot.slane %v4726_v52, 1  ;;  %v5269_v22 = vrot.slane %v5018_v8, 2 }
 0x42c   : > { %v4728_v23 = vpop.f32.mrf.mxu1  ;;  %v9098_v26 = vpop.f32.mrf.mxu0 }
 0x42d   : > { %v5198_v34 = vsel %vm1366_vm1, %v5144_v9, %v5145_v43  ;;  %v5272_v57 = vrot.slane %v9098_v26, 2  ;;  %v11978_v5 = vsel %vm5289_vm4, %v5268_v3, %v5269_v22 }
 0x42e   : > { %v4729_v51 = vpop.f32.mrf.mxu1  ;;  %v5021_v21 = vpop.f32.mrf.mxu0  ;;  %v5219_v17 = vadd.f32 %v5198_v34, %v4718_v7 }
 0x42f   : > { %v5146_v55 = vrot.slane %v4729_v51, 1  ;;  %v5270_v38 = vrot.slane %v5021_v21, 2  ;;  %v11982_v48 = vsel %vm5289_vm4, %v5271_v11, %v5272_v57 }
 0x430   : > { %v4733_v44 = vpop.f32.mrf.mxu1  ;;  %v9101_v53 = vpop.f32.mrf.mxu0  ;;  %5926 = vmatmul.mubr.bf16.gmra.mxu0 %v9617_v18  ;;  %9168 = vmatmul.mubr.bf16.gmra.mxu1 %v9616_v27  ;;  %v11985_v58 = vadd.f32 %v11922_v16, %v5219_v17 }
 0x431   : > { %9171 = vmatprep.mubr.bf16.mxu1 %v9617_v18  ;;  %5934 = vmatprep.mubr.bf16.mxu0 %v12873_v6  ;;  %v5197_v56 = vsel %vm1366_vm1, %v5145_v43, %v5146_v55  ;;  %v11992_v10 = vsel %vm5289_vm4, %v5269_v22, %v5270_v38  ;;  %v5275_v16 = vrot.slane %v9101_v53, 2 }
 0x432   : > { %v4735_v2 = vpop.f32.mrf.mxu1  ;;  %v5034_v19 = vpop.f32.mrf.mxu0  ;;  %v5220_v0 = vadd.f32 %v5197_v56, %v4724_v50 }
 0x433   : > { %v5273_v41 = vrot.slane %v5034_v19, 2  ;;  %v5147_v32 = vrot.slane %v4735_v2, 1 }
 0x434   : > { %v4737_v28 = vpop.f32.mrf.mxu1  ;;  %v9102_v4 = vpop.f32.mrf.mxu0  ;;  %v11995_v30 = vadd.f32 %v11937_v46, %v5220_v0 }
 0x435   : > { %v5276_v24 = vrot.slane %v9102_v4, 2  ;;  %v11999_v7 = vsel %vm5289_vm4, %v5272_v57, %v5273_v41  ;;  %v9627_v57 = vld [vmem:[#allocation2 + $0xc4] sm:$0xff]  }
 0x436   : > { %v4739_v40 = vpop.f32.mrf.mxu1  ;;  %v5037_v20 = vpop.f32.mrf.mxu0 }
 0x437   : > { %v5148_v27 = vrot.slane %v4739_v40, 1  ;;  %v5274_v12 = vrot.slane %v5037_v20, 2  ;;  %v12003_v25 = vsel %vm5289_vm4, %v5275_v16, %v5276_v24 }
 0x438   : > { %v4743_v63 = vpop.f32.mrf.mxu1  ;;  %v9105_v46 = vpop.f32.mrf.mxu0  ;;  %5935 = vmatmul.mubr.bf16.gmra.mxu0 %v9622_v49  ;;  %9172 = vmatmul.mubr.bf16.gmra.mxu1 %v9622_v49 }
 0x439   : > { %9175 = vmatprep.mubr.bf16.mxu1 %v9623_v1  ;;  %5944 = vmatprep.mubr.bf16.mxu0 %v12873_v6  ;;  %v5196_v50 = vsel %vm1366_vm1, %v5147_v32, %v5148_v27  ;;  %v12010_v31 = vsel %vm5289_vm4, %v5274_v12, %v5275_v16  ;;  %v5279_v21 = vrot.slane %v9105_v46, 2 }
 0x43a   : > { %v4744_v52 = vpop.f32.mrf.mxu1  ;;  %v5050_v8 = vpop.f32.mrf.mxu0  ;;  %v5221_v3 = vadd.f32 %v5196_v50, %v4733_v44 }
 0x43b   : > { %v5149_v9 = vrot.slane %v4744_v52, 1  ;;  %v5277_v18 = vrot.slane %v5050_v8, 2 }
 0x43c   : > { %v4746_v43 = vpop.f32.mrf.mxu1  ;;  %v9106_v22 = vpop.f32.mrf.mxu0  ;;  %v12013_v23 = vadd.f32 %v11926_v47, %v5221_v3 }
 0x43d   : > { %v5195_v26 = vsel %vm1366_vm1, %v5148_v27, %v5149_v9  ;;  %v5280_v19 = vrot.slane %v9106_v22, 2  ;;  %v9630_v27 = vld [vmem:[#allocation2 + $0x18] sm:$0xff]  }
 0x43e   : > { %v4748_v11 = vpop.f32.mrf.mxu1  ;;  %v5053_v34 = vpop.f32.mrf.mxu0  ;;  %v5222_v51 = vadd.f32 %v5195_v26, %v4737_v28 }
 0x43f   : > { %v5278_v17 = vrot.slane %v5053_v34, 2  ;;  %v5150_v0 = vrot.slane %v4748_v11, 1 }
 0x440   : > { %v4752_v55 = vpop.f32.mrf.mxu1  ;;  %v9109_v38 = vpop.f32.mrf.mxu0  ;;  %5945 = vmatmul.mubr.bf16.gmra.mxu0 %v9623_v1  ;;  %9176 = vmatmul.mubr.bf16.gmra.mxu1 %v9627_v57  ;;  %v12018_v44 = vadd.f32 %v11944_v35, %v5222_v51 }
 0x441   : > { %5953 = vmatprep.mubr.bf16.mxu0 %v12873_v6  ;;  %6829 = vmatprep.mubr.bf16.mxu1 %v12873_v6  ;;  %v12024_v47 = vsel %vm5289_vm4, %v5277_v18, %v5278_v17  ;;  %v12028_v53 = vsel %vm5289_vm4, %v5278_v17, %v5279_v21  ;;  %v5283_v16 = vrot.slane %v9109_v38, 2 }
 0x442   : > { %v4754_v56 = vpop.f32.mrf.mxu1  ;;  %v5066_v2 = vpop.f32.mrf.mxu0 }
 0x443   : > { %v5151_v41 = vrot.slane %v4754_v56, 1  ;;  %v5281_v28 = vrot.slane %v5066_v2, 2  ;;  %v9633_v56 = vld [vmem:[#allocation2 + $0x20] sm:$0xff]  }
 0x444   : > { %v4756_v35 = vpop.f32.mrf.mxu1  ;;  %v9110_v4 = vpop.f32.mrf.mxu0 }
 0x445   : > { %v5194_v24 = vsel %vm1366_vm1, %v5150_v0, %v5151_v41  ;;  %v5284_v40 = vrot.slane %v9110_v4, 2  ;;  %v12034_v20 = vsel %vm5289_vm4, %v5280_v19, %v5281_v28 }
 0x446   : > { %v4757_v49 = vpop.f32.mrf.mxu1  ;;  %v5069_v32 = vpop.f32.mrf.mxu0  ;;  %v5223_v12 = vadd.f32 %v5194_v24, %v4746_v43 }
 0x447   : > { %v5152_v1 = vrot.slane %v4757_v49, 1  ;;  %v5282_v63 = vrot.slane %v5069_v32, 2  ;;  %v12038_v46 = vsel %vm5289_vm4, %v5283_v16, %v5284_v40 }
 0x448   : > { %v4761_v50 = vpop.f32.mrf.mxu1  ;;  %v9113_v52 = vpop.f32.mrf.mxu0  ;;  %5954 = vmatmul.mubr.bf16.gmra.mxu0 %v9627_v57  ;;  %6830 = vmatmul.mubr.bf16.vlgmr.msra.gmra.mxu1 %v9630_v27  ;;  %v12041_v8 = vadd.f32 %v11956_v42, %v5223_v12 }
 0x449   : > { %9195 = vmatprep.mubr.bf16.mxu0 %v9630_v27  ;;  %6839 = vmatprep.mubr.bf16.mxu1 %v12873_v6  ;;  %v5193_v3 = vsel %vm1366_vm1, %v5151_v41, %v5152_v1  ;;  %v12048_v9 = vsel %vm5289_vm4, %v5281_v28, %v5282_v63  ;;  %v5287_v42 = vrot.slane %v9113_v52, 2  ;;  %v9634_v41 = vld [vmem:[#allocation2 + $0x28] sm:$0xff]  }
 0x44a   : > { %v4763_v43 = vpop.f32.mrf.mxu1  ;;  %v5082_v22 = vpop.f32.mrf.mxu0  ;;  %v5224_v26 = vadd.f32 %v5193_v3, %v4752_v55 }
 0x44b   : > { %v5285_v11 = vrot.slane %v5082_v22, 2  ;;  %v5153_v2 = vrot.slane %v4763_v43, 1  ;;  %v9635_v43 = vld [vmem:[#allocation2 + $0x30] sm:$0xff]  }
 0x44c   : > { %v4765_v34 = vpop.f32.mrf.mxu1  ;;  %v9114_v57 = vpop.f32.mrf.mxu0  ;;  %v12051_v51 = vadd.f32 %v11948_v45, %v5224_v26 }
 0x44d   : > { %v5288_v21 = vrot.slane %v9114_v57, 2  ;;  %v12055_v18 = vsel %vm5289_vm4, %v5284_v40, %v5285_v11  ;;  %v9636_v57 = vld [vmem:[#allocation2 + $0x38] sm:$0xff]  }
 0x44e   : > { %v4767_v17 = vpop.f32.mrf.mxu1  ;;  %v5085_v38 = vpop.f32.mrf.mxu0 }
 0x44f   : > { %v5154_v19 = vrot.slane %v4767_v17, 1  ;;  %v5286_v0 = vrot.slane %v5085_v38, 2  ;;  %v12059_v55 = vsel %vm5289_vm4, %v5287_v42, %v5288_v21 }
 0x450   : > { %v4771_v28 = vpop.f32.mrf.mxu1  ;;  %v5740_v45 = vpop.f32.mrf.mxu0  ;;  %6840 = vmatmul.mubr.bf16.gmra.mxu1 %v9633_v56  ;;  %9196 = vmatmul.mubr.bf16.vlgmr.msra.gmra.mxu0 %v9633_v56 }
 0x451   : > { %v6188_v35 = vadd.f32 %v5740_v45, %v11863_v54  ;;  %9199 = vmatprep.mubr.bf16.mxu0 %v9634_v41  ;;  %6848 = vmatprep.mubr.bf16.mxu1 %v12873_v6  ;;  %v5192_v4 = vsel %vm1366_vm1, %v5153_v2, %v5154_v19  ;;  %v12067_v16 = vsel %vm5289_vm4, %v5286_v0, %v5287_v42 }
 0x452   : > { %v4772_v24 = vpop.f32.mrf.mxu1  ;;  %v5742_v40 = vpop.f32.mrf.mxu0  ;;  %v5225_v49 = vadd.f32 %v5192_v4, %v4761_v50 }
 0x453   : > { %v5155_v32 = vrot.slane %v4772_v24, 1  ;;  %v6220_v26 = vrot.slane %v5742_v40, 1  ;;  %v9637_v24 = vld [vmem:[#allocation2 + $0x40] sm:$0xff]  }
 0x454   : > { %v4774_v27 = vpop.f32.mrf.mxu1  ;;  %v5744_v12 = vpop.f32.mrf.mxu0  ;;  %v12070_v1 = vadd.f32 %v11968_v14, %v5225_v49 }
 0x455   : > { %v5191_v54 = vsel %vm1366_vm1, %v5154_v19, %v5155_v32  ;;  %v6189_v63 = vadd.f32 %v5744_v12, %v11865_v29  ;;  %v12090_v32 = vld [vmem:[#allocation2 + $0x48] sm:$0xff]  }
 0x456   : > { %v4776_v52 = vpop.f32.mrf.mxu1  ;;  %v5746_v3 = vpop.f32.mrf.mxu0  ;;  %v5226_v22 = vadd.f32 %v5191_v54, %v4765_v34 }
 0x457   : > { %v6221_v11 = vrot.slane %v5746_v3, 1  ;;  %v5156_v34 = vrot.slane %v4776_v52, 1 }
 0x458   : > { %v4780_v42 = vpop.f32.mrf.mxu1  ;;  %v5750_v50 = vpop.f32.mrf.mxu0  ;;  %6849 = vmatmul.mubr.bf16.gmra.mxu1 %v9634_v41  ;;  %9200 = vmatmul.mubr.bf16.gmra.mxu0 %v9635_v43  ;;  %v12076_v21 = vadd.f32 %v11972_v59, %v5226_v22 }
 0x459   : > { %9203 = vmatprep.mubr.bf16.mxu0 %v9636_v57  ;;  %6857 = vmatprep.mubr.bf16.mxu1 %v12873_v6  ;;  %v6299_v29 = vsel %vm1366_vm1, %v6220_v26, %v6221_v11 }
 0x45a   : > { %v4782_v14 = vpop.f32.mrf.mxu1  ;;  %v5751_v17 = vpop.f32.mrf.mxu0  ;;  %v12081_v38 = vadd.f32 %v6299_v29, %v6188_v35 }
 0x45b   : > { %v5157_v56 = vrot.slane %v4782_v14, 1  ;;  %v6222_v2 = vrot.slane %v5751_v17, 1  ;;  %v12105_v17 = vld [vmem:[#allocation2 + $0x50] sm:$0xff]  }
 0x45c   : > { %v4784_v19 = vpop.f32.mrf.mxu1  ;;  %v5753_v0 = vpop.f32.mrf.mxu0 }
 0x45d   : > { %v5190_v41 = vsel %vm1366_vm1, %v5156_v34, %v5157_v56  ;;  %v6298_v59 = vsel %vm1366_vm1, %v6221_v11, %v6222_v2  ;;  %v6190_v28 = vadd.f32 %v5753_v0, %v11877_v62 }
 0x45e   : > { %v4785_v45 = vpop.f32.mrf.mxu1  ;;  %v5755_v4 = vpop.f32.mrf.mxu0  ;;  %v5227_v40 = vadd.f32 %v5190_v41, %v4774_v27  ;;  %v12088_v49 = vadd.f32 %v6298_v59, %v6189_v63 }
 0x45f   : > { %v5158_v35 = vrot.slane %v4785_v45, 1  ;;  %v6223_v26 = vrot.slane %v5755_v4, 1 }
 0x460   : > { %v4789_v12 = vpop.f32.mrf.mxu1  ;;  %v5759_v54 = vpop.f32.mrf.mxu0  ;;  %6858 = vmatmul.mubr.bf16.gmra.mxu1 %v9635_v43  ;;  %9204 = vmatmul.mubr.bf16.gmra.mxu0 %v9637_v24  ;;  %v12093_v52 = vadd.f32 %v11978_v5, %v5227_v40 }
 0x461   : > { %v6191_v3 = vadd.f32 %v5759_v54, %v11885_v36  ;;  %9207 = vmatprep.mubr.bf16.mxu0 %v12090_v32  ;;  %6867 = vmatprep.mubr.bf16.mxu1 %v12873_v6  ;;  %v5189_v62 = vsel %vm1366_vm1, %v5157_v56, %v5158_v35 }
 0x462   : > { %v4791_v27 = vpop.f32.mrf.mxu1  ;;  %v5761_v63 = vpop.f32.mrf.mxu0  ;;  %v5228_v22 = vadd.f32 %v5189_v62, %v4780_v42  ;;  %v12109_v42 = vld [vmem:[#allocation2 + $0x58] sm:$0xff]  }
 0x463   : > { %v6224_v11 = vrot.slane %v5761_v63, 1  ;;  %v5159_v56 = vrot.slane %v4791_v27, 1 }
 0x464   : > { %v4793_v50 = vpop.f32.mrf.mxu1  ;;  %v5763_v43 = vpop.f32.mrf.mxu0  ;;  %v12101_v29 = vadd.f32 %v11992_v10, %v5228_v22 }
 0x465   : > { %v6297_v36 = vsel %vm1366_vm1, %v6223_v26, %v6224_v11  ;;  %v12127_v43 = vld [vmem:[#allocation2 + $0x60] sm:$0xff]  }
 0x466   : > { %v4795_v5 = vpop.f32.mrf.mxu1  ;;  %v5764_v14 = vpop.f32.mrf.mxu0  ;;  %v12107_v34 = vadd.f32 %v6297_v36, %v6190_v28 }
 0x467   : > { %v5160_v2 = vrot.slane %v4795_v5, 1  ;;  %v6225_v19 = vrot.slane %v5764_v14, 1 }
 0x468   : > { %v4799_v0 = vpop.f32.mrf.mxu1  ;;  %v5768_v41 = vpop.f32.mrf.mxu0  ;;  %6868 = vmatmul.mubr.bf16.gmra.mxu1 %v9636_v57  ;;  %9208 = vmatmul.mubr.bf16.gmra.mxu0 %v12105_v17 }
 0x469   : > { %v6192_v10 = vadd.f32 %v5768_v41, %v11903_v13  ;;  %9211 = vmatprep.mubr.bf16.mxu0 %v12109_v42  ;;  %6876 = vmatprep.mubr.bf16.mxu1 %v12873_v6  ;;  %v5188_v59 = vsel %vm1366_vm1, %v5159_v56, %v5160_v2  ;;  %v6296_v28 = vsel %vm1366_vm1, %v6224_v11, %v6225_v19 }
 0x46a   : > { %v4800_v45 = vpop.f32.mrf.mxu1  ;;  %v5770_v4 = vpop.f32.mrf.mxu0  ;;  %v5229_v40 = vadd.f32 %v5188_v59, %v4789_v12  ;;  %v12119_v35 = vadd.f32 %v6296_v28, %v6191_v3  ;;  %v12129_v3 = vld [vmem:[#allocation2 + $0x68] sm:$0xff]  }
 0x46b   : > { %v5161_v57 = vrot.slane %v4800_v45, 1  ;;  %v6226_v36 = vrot.slane %v5770_v4, 1 }
 0x46c   : > { %v4802_v54 = vpop.f32.mrf.mxu1  ;;  %v5772_v62 = vpop.f32.mrf.mxu0  ;;  %v12122_v13 = vadd.f32 %v11982_v48, %v5229_v40 }
 0x46d   : > { %v5187_v27 = vsel %vm1366_vm1, %v5160_v2, %v5161_v57  ;;  %v6193_v63 = vadd.f32 %v5772_v62, %v11908_v15  ;;  %v12146_v57 = vld [vmem:[#allocation2 + $0x70] sm:$0xff]  }
 0x46e   : > { %v4804_v22 = vpop.f32.mrf.mxu1  ;;  %v5774_v26 = vpop.f32.mrf.mxu0  ;;  %v5230_v11 = vadd.f32 %v5187_v27, %v4793_v50 }
 0x46f   : > { %v6227_v12 = vrot.slane %v5774_v26, 1  ;;  %v5162_v19 = vrot.slane %v4804_v22, 1  ;;  %v12150_v22 = vld [vmem:[#allocation2 + $0x78] sm:$0xff]  }
 0x470   : > { %v4808_v5 = vpop.f32.mrf.mxu1  ;;  %v5778_v14 = vpop.f32.mrf.mxu0  ;;  %6877 = vmatmul.mubr.bf16.gmra.mxu1 %v9637_v24  ;;  %9212 = vmatmul.mubr.bf16.gmra.mxu0 %v12127_v43  ;;  %v12133_v48 = vadd.f32 %v11999_v7, %v5230_v11 }
 0x471   : > { %9215 = vmatprep.mubr.bf16.mxu0 %v12129_v3  ;;  %6885 = vmatprep.mubr.bf16.mxu1 %v12873_v6  ;;  %v6295_v15 = vsel %vm1366_vm1, %v6226_v36, %v6227_v12 }
 0x472   : > { %v4810_v50 = vpop.f32.mrf.mxu1  ;;  %v5779_v56 = vpop.f32.mrf.mxu0  ;;  %v12139_v2 = vadd.f32 %v6295_v15, %v6192_v10 }
 0x473   : > { %v5163_v0 = vrot.slane %v4810_v50, 1  ;;  %v6228_v41 = vrot.slane %v5779_v56, 1 }
 0x474   : > { %v4812_v24 = vpop.f32.mrf.mxu1  ;;  %v5781_v59 = vpop.f32.mrf.mxu0 }
 0x475   : > { %v5186_v7 = vsel %vm1366_vm1, %v5162_v19, %v5163_v0  ;;  %v6294_v28 = vsel %vm1366_vm1, %v6227_v12, %v6228_v41  ;;  %v6194_v45 = vadd.f32 %v5781_v59, %v11929_v61  ;;  %v12167_v24 = vld [vmem:[#allocation2 + $0x80] sm:$0xff]  }
 0x476   : > { %v4813_v4 = vpop.f32.mrf.mxu1  ;;  %v5783_v40 = vpop.f32.mrf.mxu0  ;;  %v5231_v62 = vadd.f32 %v5186_v7, %v4802_v54  ;;  %v12148_v10 = vadd.f32 %v6294_v28, %v6193_v63 }
 0x477   : > { %v5164_v27 = vrot.slane %v4813_v4, 1  ;;  %v6229_v15 = vrot.slane %v5783_v40, 1 }
 0x478   : > { %v4817_v26 = vpop.f32.mrf.mxu1  ;;  %v5787_v11 = vpop.f32.mrf.mxu0  ;;  %6886 = vmatmul.mubr.bf16.gmra.mxu1 %v12090_v32  ;;  %9216 = vmatmul.mubr.bf16.gmra.mxu0 %v12146_v57  ;;  %v12155_v36 = vadd.f32 %v12010_v31, %v5231_v62 }
 0x479   : > { %v6195_v61 = vadd.f32 %v5787_v11, %v11940_v60  ;;  %9219 = vmatprep.mubr.bf16.mxu0 %v12150_v22  ;;  %6895 = vmatprep.mubr.bf16.mxu1 %v12873_v6  ;;  %v5185_v54 = vsel %vm1366_vm1, %v5163_v0, %v5164_v27 }
 0x47a   : > { %v4819_v63 = vpop.f32.mrf.mxu1  ;;  %v5789_v12 = vpop.f32.mrf.mxu0  ;;  %v5232_v14 = vadd.f32 %v5185_v54, %v4808_v5  ;;  %v12171_v5 = vld [vmem:[#allocation2 + $0x88] sm:$0xff]  }
 0x47b   : > { %v6230_v50 = vrot.slane %v5789_v12, 1  ;;  %v5165_v0 = vrot.slane %v4819_v63, 1 }
 0x47c   : > { %v4821_v32 = vpop.f32.mrf.mxu1  ;;  %v5791_v56 = vpop.f32.mrf.mxu0  ;;  %v12163_v19 = vadd.f32 %v12003_v25, %v5232_v14 }
 0x47d   : > { %v6293_v60 = vsel %vm1366_vm1, %v6229_v15, %v6230_v50 }
 0x47e   : > { %v4823_v31 = vpop.f32.mrf.mxu1  ;;  %v5792_v41 = vpop.f32.mrf.mxu0  ;;  %v12169_v59 = vadd.f32 %v6293_v60, %v6194_v45 }
 0x47f   : > { %v5166_v7 = vrot.slane %v4823_v31, 1  ;;  %v6231_v28 = vrot.slane %v5792_v41, 1  ;;  %v12190_v41 = vld [vmem:[#allocation2 + $0x90] sm:$0xff]  }
 0x480   : > { %v4827_v4 = vpop.f32.mrf.mxu1  ;;  %v5796_v40 = vpop.f32.mrf.mxu0  ;;  %6896 = vmatmul.mubr.bf16.gmra.mxu1 %v12105_v17  ;;  %9220 = vmatmul.mubr.bf16.gmra.mxu0 %v12167_v24 }
 0x481   : > { %v6196_v25 = vadd.f32 %v5796_v40, %v11958_v39  ;;  %9223 = vmatprep.mubr.bf16.mxu0 %v12171_v5  ;;  %6904 = vmatprep.mubr.bf16.mxu1 %v12873_v6  ;;  %v5184_v45 = vsel %vm1366_vm1, %v5165_v0, %v5166_v7  ;;  %v6292_v62 = vsel %vm1366_vm1, %v6230_v50, %v6231_v28 }
 0x482   : > { %v4828_v27 = vpop.f32.mrf.mxu1  ;;  %v5798_v11 = vpop.f32.mrf.mxu0  ;;  %v5233_v54 = vadd.f32 %v5184_v45, %v4817_v26  ;;  %v12182_v63 = vadd.f32 %v6292_v62, %v6195_v61  ;;  %v12192_v61 = vld [vmem:[#allocation2 + $0x98] sm:$0xff]  }
 0x483   : > { %v5167_v17 = vrot.slane %v4828_v27, 1  ;;  %v6232_v0 = vrot.slane %v5798_v11, 1 }
 0x484   : > { %v4830_v12 = vpop.f32.mrf.mxu1  ;;  %v5800_v14 = vpop.f32.mrf.mxu0  ;;  %v12185_v39 = vadd.f32 %v12024_v47, %v5233_v54 }
 0x485   : > { %v5183_v15 = vsel %vm1366_vm1, %v5166_v7, %v5167_v17  ;;  %v6197_v56 = vadd.f32 %v5800_v14, %v11963_v33 }
 0x486   : > { %v4832_v60 = vpop.f32.mrf.mxu1  ;;  %v5802_v31 = vpop.f32.mrf.mxu0  ;;  %v5234_v50 = vadd.f32 %v5183_v15, %v4821_v32 }
 0x487   : > { %v6233_v26 = vrot.slane %v5802_v31, 1  ;;  %v5168_v45 = vrot.slane %v4832_v60, 1  ;;  %v12210_v31 = vld [vmem:[#allocation2 + $0xa0] sm:$0xff]  }
 0x488   : > { %v4836_v28 = vpop.f32.mrf.mxu1  ;;  %v5806_v4 = vpop.f32.mrf.mxu0  ;;  %6905 = vmatmul.mubr.bf16.gmra.mxu1 %v12109_v42  ;;  %9224 = vmatmul.mubr.bf16.gmra.mxu0 %v12190_v41  ;;  %v12197_v47 = vadd.f32 %v12028_v53, %v5234_v50 }
 0x489   : > { %9227 = vmatprep.mubr.bf16.mxu0 %v12192_v61  ;;  %6913 = vmatprep.mubr.bf16.mxu1 %v12873_v6  ;;  %v6291_v33 = vsel %vm1366_vm1, %v6232_v0, %v6233_v26  ;;  %v12214_v0 = vld [vmem:[#allocation2 + $0xa8] sm:$0xff]  }
 0x48a   : > { %v4838_v32 = vpop.f32.mrf.mxu1  ;;  %v5807_v7 = vpop.f32.mrf.mxu0  ;;  %v12203_v40 = vadd.f32 %v6291_v33, %v6196_v25 }
 0x48b   : > { %v5169_v62 = vrot.slane %v4838_v32, 1  ;;  %v6234_v27 = vrot.slane %v5807_v7, 1 }
 0x48c   : > { %v4840_v42 = vpop.f32.mrf.mxu1  ;;  %v5809_v11 = vpop.f32.mrf.mxu0 }
 0x48d   : > { %v5182_v53 = vsel %vm1366_vm1, %v5168_v45, %v5169_v62  ;;  %v6290_v54 = vsel %vm1366_vm1, %v6233_v26, %v6234_v27  ;;  %v6198_v17 = vadd.f32 %v5809_v11, %v11985_v58 }
 0x48e   : > { %v4841_v14 = vpop.f32.mrf.mxu1  ;;  %v5811_v15 = vpop.f32.mrf.mxu0  ;;  %v5235_v50 = vadd.f32 %v5182_v53, %v4830_v12  ;;  %v12212_v25 = vadd.f32 %v6290_v54, %v6197_v56  ;;  %v12231_v54 = vld [vmem:[#allocation2 + $0xb0] sm:$0xff]  }
 0x48f   : > { %v5170_v60 = vrot.slane %v4841_v14, 1  ;;  %v6235_v45 = vrot.slane %v5811_v15, 1 }
 0x490   : > { %v4845_v4 = vpop.f32.mrf.mxu1  ;;  %v5815_v33 = vpop.f32.mrf.mxu0  ;;  %6914 = vmatmul.mubr.bf16.gmra.mxu1 %v12127_v43  ;;  %9228 = vmatmul.mubr.bf16.gmra.mxu0 %v12210_v31  ;;  %v12219_v26 = vadd.f32 %v12034_v20, %v5235_v50 }
 0x491   : > { %v6199_v58 = vadd.f32 %v5815_v33, %v11995_v30  ;;  %9231 = vmatprep.mubr.bf16.mxu0 %v12214_v0  ;;  %6923 = vmatprep.mubr.bf16.mxu1 %v12873_v6  ;;  %v5181_v12 = vsel %vm1366_vm1, %v5169_v62, %v5170_v60 }
 0x492   : > { %v4847_v56 = vpop.f32.mrf.mxu1  ;;  %v5817_v32 = vpop.f32.mrf.mxu0  ;;  %v5236_v7 = vadd.f32 %v5181_v12, %v4836_v28  ;;  %v12235_v28 = vld [vmem:[#allocation2 + $0xb8] sm:$0xff]  }
 0x493   : > { %v6236_v27 = vrot.slane %v5817_v32, 1  ;;  %v5171_v62 = vrot.slane %v4847_v56, 1 }
 0x494   : > { %v4849_v43 = vpop.f32.mrf.mxu1  ;;  %v5819_v42 = vpop.f32.mrf.mxu0  ;;  %v12227_v11 = vadd.f32 %v12048_v9, %v5236_v7 }
 0x495   : > { %v6289_v30 = vsel %vm1366_vm1, %v6235_v45, %v6236_v27 }
 0x496   : > { %v4851_v20 = vpop.f32.mrf.mxu1  ;;  %v5820_v53 = vpop.f32.mrf.mxu0  ;;  %v12233_v14 = vadd.f32 %v6289_v30, %v6198_v17 }
 0x497   : > { %v5172_v50 = vrot.slane %v4851_v20, 1  ;;  %v6237_v60 = vrot.slane %v5820_v53, 1 }
 0x498   : > { %v4855_v15 = vpop.f32.mrf.mxu1  ;;  %v5824_v33 = vpop.f32.mrf.mxu0  ;;  %6924 = vmatmul.mubr.bf16.gmra.mxu1 %v12129_v3  ;;  %9232 = vmatmul.mubr.bf16.gmra.mxu0 %v12231_v54 }
 0x499   : > { %v6288_v9 = vsel %vm1366_vm1, %v6236_v27, %v6237_v60  ;;  %v6200_v12 = vadd.f32 %v5824_v33, %v12013_v23  ;;  %9235 = vmatprep.mubr.bf16.mxu0 %v12235_v28  ;;  %6932 = vmatprep.mubr.bf16.mxu1 %v12873_v6  ;;  %v5180_v17 = vsel %vm1366_vm1, %v5171_v62, %v5172_v50  ;;  %v12254_v15 = vld [vmem:[#allocation2 + $0xc0] sm:$0xff]  }
 0x49a   : > { %v4856_v56 = vpop.f32.mrf.mxu1  ;;  %v5826_v32 = vpop.f32.mrf.mxu0  ;;  %v5237_v7 = vadd.f32 %v5180_v17, %v4845_v4  ;;  %v12246_v45 = vadd.f32 %v6288_v9, %v6199_v58  ;;  %v12256_v58 = vld [vmem:[#allocation2 + $0xc8] sm:$0xff]  }
 0x49b   : > { %v5173_v3 = vrot.slane %v4856_v56, 1  ;;  %v6238_v33 = vrot.slane %v5826_v32, 1 }
 0x49c   : > { %v4858_v42 = vpop.f32.mrf.mxu1  ;;  %v5828_v30 = vpop.f32.mrf.mxu0  ;;  %v12249_v20 = vadd.f32 %v12038_v46, %v5237_v7 }
 0x49d   : > { %v5179_v23 = vsel %vm1366_vm1, %v5172_v50, %v5173_v3  ;;  %v6201_v27 = vadd.f32 %v5828_v30, %v12018_v44 }
 0x49e   : > { %v4860_v53 = vpop.f32.mrf.mxu1  ;;  %v5830_v60 = vpop.f32.mrf.mxu0  ;;  %v5238_v62 = vadd.f32 %v5179_v23, %v4849_v43  ;;  %v12269_v23 = vld [vmem:[#allocation2 + $0xd0] sm:$0xff]  }
 0x49f   : > { %v6239_v4 = vrot.slane %v5830_v60, 1  ;;  %v5174_v32 = vrot.slane %v4860_v53, 1 }
 0x4a0   : > { %v4864_v9 = vpop.f32.mrf.mxu1  ;;  %v5834_v17 = vpop.f32.mrf.mxu0  ;;  %6933 = vmatmul.mubr.bf16.gmra.mxu1 %v12146_v57  ;;  %9236 = vmatmul.mubr.bf16.gmra.mxu0 %v12254_v15  ;;  %v12261_v46 = vadd.f32 %v12055_v18, %v5238_v62 }
 0x4a1   : > { %v6287_v44 = vsel %vm1366_vm1, %v6238_v33, %v6239_v4  ;;  %9239 = vmatprep.mubr.bf16.mxu0 %v12256_v58  ;;  %6941 = vmatprep.mubr.bf16.mxu1 %v12873_v6 }
 0x4a2   : > { %12972 = vst [vmem:[#allocation38_spill] sm:$0xff] %v12261_v46  ;;  %v4866_v43 = vpop.f32.mrf.mxu1  ;;  %v5835_v50 = vpop.f32.mrf.mxu0  ;;  %v12267_v56 = vadd.f32 %v6287_v44, %v6200_v12 }
 0x4a3   : > { %v5175_v7 = vrot.slane %v4866_v43, 1  ;;  %v6240_v3 = vrot.slane %v5835_v50, 1 }
 0x4a4   : > { %v4868_v57 = vpop.f32.mrf.mxu1  ;;  %v5837_v30 = vpop.f32.mrf.mxu0 }
 0x4a5   : > { %v5178_v18 = vsel %vm1366_vm1, %v5174_v32, %v5175_v7  ;;  %v6286_v60 = vsel %vm1366_vm1, %v6239_v4, %v6240_v3  ;;  %v6202_v62 = vadd.f32 %v5837_v30, %v12041_v8 }
 0x4a6   : > { %v4869_v33 = vpop.f32.mrf.mxu1  ;;  %v5839_v17 = vpop.f32.mrf.mxu0  ;;  %v5239_v46 = vadd.f32 %v5178_v18, %v4858_v42  ;;  %v12276_v12 = vadd.f32 %v6286_v60, %v6201_v27 }
 0x4a7   : > { %v5176_v53 = vrot.slane %v4869_v33, 1  ;;  %v6241_v3 = vrot.slane %v5839_v17, 1 }
 0x4a8   : > { %v5843_v44 = vpop.f32.mrf.mxu0  ;;  %v9133_v43 = vpop.f32.mrf.mxu1  ;;  %6942 = vmatmul.mubr.bf16.gmra.mxu1 %v12150_v22  ;;  %9240 = vmatmul.mubr.bf16.gmra.mxu0 %v12269_v23  ;;  %v12281_v50 = vadd.f32 %v12067_v16, %v5239_v46 }
 0x4a9   : > { %v6203_v32 = vadd.f32 %v5843_v44, %v12051_v51  ;;  %6951 = vmatprep.mubr.bf16.mxu1 %v12873_v6  ;;  %v5177_v8 = vsel %vm1366_vm1, %v5175_v7, %v5176_v53  ;;  %v6334_v53 = vrot.slane %v9133_v43, 2 }
 0x4aa   : > { %12973 = vst [vmem:[#allocation39_spill] sm:$0xff] %v12281_v50  ;;  %v5845_v42 = vpop.f32.mrf.mxu0  ;;  %v5997_v27 = vpop.f32.mrf.mxu1  ;;  %v5240_v4 = vadd.f32 %v5177_v8, %v4864_v9 }
 0x4ab   : > { %v6242_v57 = vrot.slane %v5845_v42, 1  ;;  %v6332_v33 = vrot.slane %v5997_v27, 2 }
 0x4ac   : > { %v5847_v30 = vpop.f32.mrf.mxu0  ;;  %v9134_v18 = vpop.f32.mrf.mxu1  ;;  %v12288_v22 = vadd.f32 %v12059_v55, %v5240_v4 }
 0x4ad   : > { %v6285_v16 = vsel %vm1366_vm1, %v6241_v3, %v6242_v57 }
 0x4ae   : > { %v5848_v46 = vpop.f32.mrf.mxu0  ;;  %v6000_v51 = vpop.f32.mrf.mxu1  ;;  %v12292_v60 = vadd.f32 %v6285_v16, %v6202_v62 }
 0x4af   : > { %v6243_v44 = vrot.slane %v5848_v46, 1  ;;  %v6333_v7 = vrot.slane %v6000_v51, 2 }
 0x4b0   : > { %v5852_v50 = vpop.f32.mrf.mxu0  ;;  %v9137_v9 = vpop.f32.mrf.mxu1  ;;  %6952 = vmatmul.mubr.bf16.gmra.mxu1 %v12167_v24  ;;  %v6335_v24 = vrot.slane %v9134_v18, 2 }
 0x4b1   : > { %v6284_v17 = vsel %vm1366_vm1, %v6242_v57, %v6243_v44  ;;  %v6204_v55 = vadd.f32 %v5852_v50, %v12070_v1  ;;  %6960 = vmatprep.mubr.bf16.mxu1 %v12873_v6  ;;  %v6411_v8 = vsel %vm5289_vm4, %v6332_v33, %v6333_v7  ;;  %v6410_v43 = vsel %vm5289_vm4, %v6333_v7, %v6334_v53 }
 0x4b2   : > { %v5854_v62 = vpop.f32.mrf.mxu0  ;;  %v6013_v42 = vpop.f32.mrf.mxu1  ;;  %v12302_v27 = vadd.f32 %v6411_v8, %v12081_v38  ;;  %v12306_v4 = vadd.f32 %v6284_v17, %v6203_v32  ;;  %v12309_v57 = vadd.f32 %v6410_v43, %v12088_v49  ;;  %v6338_v30 = vrot.slane %v9137_v9, 2 }
 0x4b3   : > { %v6336_v3 = vrot.slane %v6013_v42, 2  ;;  %v6244_v32 = vrot.slane %v5854_v62, 1 }
 0x4b4   : > { %v5856_v1 = vpop.f32.mrf.mxu0  ;;  %v9138_v50 = vpop.f32.mrf.mxu1 }
 0x4b5   : > { %v6205_v16 = vadd.f32 %v5856_v1, %v12076_v21  ;;  %v6339_v46 = vrot.slane %v9138_v50, 2  ;;  %v6409_v38 = vsel %vm5289_vm4, %v6335_v24, %v6336_v3 }
 0x4b6   : > { %v5858_v51 = vpop.f32.mrf.mxu0  ;;  %v6016_v33 = vpop.f32.mrf.mxu1  ;;  %v12315_v44 = vadd.f32 %v6409_v38, %v12107_v34 }
 0x4b7   : > { %v6245_v18 = vrot.slane %v5858_v51, 1  ;;  %v6337_v7 = vrot.slane %v6016_v33, 2  ;;  %v6407_v49 = vsel %vm5289_vm4, %v6338_v30, %v6339_v46 }
 0x4b8   : > { %v5862_v53 = vpop.f32.mrf.mxu0  ;;  %v9141_v17 = vpop.f32.mrf.mxu1  ;;  %6961 = vmatmul.mubr.bf16.gmra.mxu1 %v12171_v5  ;;  %v12321_v21 = vadd.f32 %v6407_v49, %v12139_v2 }
 0x4b9   : > { %v6283_v9 = vsel %vm1366_vm1, %v6244_v32, %v6245_v18  ;;  %6969 = vmatprep.mubr.bf16.mxu1 %v12873_v6  ;;  %v6408_v34 = vsel %vm5289_vm4, %v6336_v3, %v6337_v7  ;;  %v6342_v1 = vrot.slane %v9141_v17, 2 }
 0x4ba   : > { %v5863_v8 = vpop.f32.mrf.mxu0  ;;  %v6029_v62 = vpop.f32.mrf.mxu1  ;;  %v12329_v42 = vadd.f32 %v6408_v34, %v12119_v35  ;;  %v12331_v43 = vadd.f32 %v6283_v9, %v6204_v55 }
 0x4bb   : > { %v6246_v24 = vrot.slane %v5863_v8, 1  ;;  %v6340_v5 = vrot.slane %v6029_v62, 2 }
 0x4bc   : > { %v5865_v2 = vpop.f32.mrf.mxu0  ;;  %v9142_v50 = vpop.f32.mrf.mxu1 }
 0x4bd   : > { %v6282_v30 = vsel %vm1366_vm1, %v6245_v18, %v6246_v24  ;;  %v6206_v38 = vadd.f32 %v5865_v2, %v12093_v52  ;;  %v6343_v51 = vrot.slane %v9142_v50, 2  ;;  %v6406_v3 = vsel %vm5289_vm4, %v6339_v46, %v6340_v5 }
 0x4be   : > { %v5867_v33 = vpop.f32.mrf.mxu0  ;;  %v6032_v32 = vpop.f32.mrf.mxu1  ;;  %v12339_v35 = vadd.f32 %v6406_v3, %v12148_v10  ;;  %v12341_v55 = vadd.f32 %v6282_v30, %v6205_v16 }
 0x4bf   : > { %v6341_v7 = vrot.slane %v6032_v32, 2  ;;  %v6404_v49 = vsel %vm5289_vm4, %v6342_v1, %v6343_v51  ;;  %v6247_v34 = vrot.slane %v5867_v33, 1 }
 0x4c0   : > { %v5871_v53 = vpop.f32.mrf.mxu0  ;;  %v9145_v17 = vpop.f32.mrf.mxu1  ;;  %6970 = vmatmul.mubr.bf16.gmra.mxu1 %v12190_v41  ;;  %v12347_v52 = vadd.f32 %v6404_v49, %v12182_v63 }
 0x4c1   : > { %v6207_v46 = vadd.f32 %v5871_v53, %v12101_v29  ;;  %6979 = vmatprep.mubr.bf16.mxu1 %v12873_v6  ;;  %v6405_v10 = vsel %vm5289_vm4, %v6341_v7, %v6342_v1  ;;  %v6346_v1 = vrot.slane %v9145_v17, 2 }
 0x4c2   : > { %v5873_v16 = vpop.f32.mrf.mxu0  ;;  %v6045_v18 = vpop.f32.mrf.mxu1  ;;  %v12354_v9 = vadd.f32 %v6405_v10, %v12169_v59 }
 0x4c3   : > { %v6248_v8 = vrot.slane %v5873_v16, 1  ;;  %v6344_v2 = vrot.slane %v6045_v18, 2 }
 0x4c4   : > { %v5875_v62 = vpop.f32.mrf.mxu0  ;;  %v9146_v24 = vpop.f32.mrf.mxu1 }
 0x4c5   : > { %v6281_v63 = vsel %vm1366_vm1, %v6247_v34, %v6248_v8 }
 0x4c6   : > { %v5876_v41 = vpop.f32.mrf.mxu0  ;;  %v6048_v5 = vpop.f32.mrf.mxu1  ;;  %v12358_v29 = vadd.f32 %v6281_v63, %v6206_v38 }
 0x4c7   : > { %v6249_v50 = vrot.slane %v5876_v41, 1  ;;  %v6345_v30 = vrot.slane %v6048_v5, 2 }
 0x4c8   : > { %v5880_v51 = vpop.f32.mrf.mxu0  ;;  %v9149_v3 = vpop.f32.mrf.mxu1  ;;  %6980 = vmatmul.mubr.bf16.gmra.mxu1 %v12192_v61  ;;  %v6347_v61 = vrot.slane %v9146_v24, 2 }
 0x4c9   : > { %v6280_v59 = vsel %vm1366_vm1, %v6248_v8, %v6249_v50  ;;  %v6208_v33 = vadd.f32 %v5880_v51, %v12122_v13  ;;  %6988 = vmatprep.mubr.bf16.mxu1 %v12873_v6  ;;  %v6403_v32 = vsel %vm5289_vm4, %v6344_v2, %v6345_v30  ;;  %v6402_v53 = vsel %vm5289_vm4, %v6345_v30, %v6346_v1 }
 0x4ca   : > { %v5882_v38 = vpop.f32.mrf.mxu0  ;;  %v6061_v7 = vpop.f32.mrf.mxu1  ;;  %v12368_v49 = vadd.f32 %v6403_v32, %v12203_v40  ;;  %v12372_v17 = vadd.f32 %v6280_v59, %v6207_v46  ;;  %v12375_v16 = vadd.f32 %v6402_v53, %v12212_v25  ;;  %v6350_v34 = vrot.slane %v9149_v3, 2 }
 0x4cb   : > { %v6348_v10 = vrot.slane %v6061_v7, 2  ;;  %v6250_v46 = vrot.slane %v5882_v38, 1 }
 0x4cc   : > { %v5884_v13 = vpop.f32.mrf.mxu0  ;;  %v9150_v18 = vpop.f32.mrf.mxu1 }
 0x4cd   : > { %v6209_v8 = vadd.f32 %v5884_v13, %v12133_v48  ;;  %v6351_v62 = vrot.slane %v9150_v18, 2  ;;  %v6401_v40 = vsel %vm5289_vm4, %v6347_v61, %v6348_v10 }
 0x4ce   : > { %v5886_v63 = vpop.f32.mrf.mxu0  ;;  %v6064_v41 = vpop.f32.mrf.mxu1  ;;  %v12381_v5 = vadd.f32 %v6401_v40, %v12233_v14 }
 0x4cf   : > { %v6251_v24 = vrot.slane %v5886_v63, 1  ;;  %v6349_v2 = vrot.slane %v6064_v41, 2  ;;  %v6399_v25 = vsel %vm5289_vm4, %v6350_v34, %v6351_v62 }
 0x4d0   : > { %v5890_v50 = vpop.f32.mrf.mxu0  ;;  %v9153_v30 = vpop.f32.mrf.mxu1  ;;  %6989 = vmatmul.mubr.bf16.gmra.mxu1 %v12210_v31  ;;  %v12387_v48 = vadd.f32 %v6399_v25, %v12267_v56 }
 0x4d1   : > { %v6279_v1 = vsel %vm1366_vm1, %v6250_v46, %v6251_v24  ;;  %6997 = vmatprep.mubr.bf16.mxu1 %v12873_v6  ;;  %v6400_v14 = vsel %vm5289_vm4, %v6348_v10, %v6349_v2  ;;  %v6354_v7 = vrot.slane %v9153_v30, 2 }
 0x4d2   : > { %v5891_v51 = vpop.f32.mrf.mxu0  ;;  %v6077_v3 = vpop.f32.mrf.mxu1  ;;  %v12395_v59 = vadd.f32 %v6400_v14, %v12246_v45  ;;  %v12397_v32 = vadd.f32 %v6279_v1, %v6208_v33 }
 0x4d3   : > { %v6252_v38 = vrot.slane %v5891_v51, 1  ;;  %v6352_v31 = vrot.slane %v6077_v3, 2 }
 0x4d4   : > { %v5893_v56 = vpop.f32.mrf.mxu0  ;;  %v9154_v53 = vpop.f32.mrf.mxu1 }
 0x4d5   : > { %v6278_v61 = vsel %vm1366_vm1, %v6251_v24, %v6252_v38  ;;  %v6210_v13 = vadd.f32 %v5893_v56, %v12155_v36  ;;  %v6355_v18 = vrot.slane %v9154_v53, 2  ;;  %v6398_v10 = vsel %vm5289_vm4, %v6351_v62, %v6352_v31 }
 0x4d6   : > { %v5895_v34 = vpop.f32.mrf.mxu0  ;;  %v6080_v40 = vpop.f32.mrf.mxu1  ;;  %v12405_v45 = vadd.f32 %v6398_v10, %v12276_v12  ;;  %v12407_v33 = vadd.f32 %v6278_v61, %v6209_v8 }
 0x4d7   : > { %v6353_v63 = vrot.slane %v6080_v40, 2  ;;  %v6396_v41 = vsel %vm5289_vm4, %v6354_v7, %v6355_v18  ;;  %v6253_v50 = vrot.slane %v5895_v34, 1 }
 0x4d8   : > { %v5899_v46 = vpop.f32.mrf.mxu0  ;;  %v9157_v2 = vpop.f32.mrf.mxu1  ;;  %6998 = vmatmul.mubr.bf16.gmra.mxu1 %v12214_v0  ;;  %v12413_v36 = vadd.f32 %v6396_v41, %v12306_v4 }
 0x4d9   : > { %v6211_v62 = vadd.f32 %v5899_v46, %v12163_v19  ;;  %7007 = vmatprep.mubr.bf16.mxu1 %v12873_v6  ;;  %v6397_v12 = vsel %vm5289_vm4, %v6353_v63, %v6354_v7  ;;  %v6358_v7 = vrot.slane %v9157_v2, 2 }
 0x4da   : > { %v5901_v8 = vpop.f32.mrf.mxu0  ;;  %v6093_v24 = vpop.f32.mrf.mxu1  ;;  %v12420_v25 = vadd.f32 %v6397_v12, %v12292_v60 }
 0x4db   : > { %v6254_v30 = vrot.slane %v5901_v8, 1  ;;  %v6356_v3 = vrot.slane %v6093_v24, 2 }
 0x4dc   : > { %v5903_v1 = vpop.f32.mrf.mxu0  ;;  %v9158_v14 = vpop.f32.mrf.mxu1 }
 0x4dd   : > { %v6277_v0 = vsel %vm1366_vm1, %v6253_v50, %v6254_v30 }
 0x4de   : > { %v5904_v4 = vpop.f32.mrf.mxu0  ;;  %v6096_v51 = vpop.f32.mrf.mxu1  ;;  %v12424_v19 = vadd.f32 %v6277_v0, %v6210_v13 }
 0x4df   : > { %v6255_v38 = vrot.slane %v5904_v4, 1  ;;  %v6357_v31 = vrot.slane %v6096_v51, 2 }
 0x4e0   : > { %v5908_v56 = vpop.f32.mrf.mxu0  ;;  %v9161_v53 = vpop.f32.mrf.mxu1  ;;  %7008 = vmatmul.mubr.bf16.gmra.mxu1 %v12231_v54  ;;  %v6359_v54 = vrot.slane %v9158_v14, 2 }
 0x4e1   : > { %v6276_v60 = vsel %vm1366_vm1, %v6254_v30, %v6255_v38  ;;  %v6212_v61 = vadd.f32 %v5908_v56, %v12185_v39  ;;  %7016 = vmatprep.mubr.bf16.mxu1 %v12873_v6  ;;  %v6395_v18 = vsel %vm5289_vm4, %v6356_v3, %v6357_v31  ;;  %v6394_v40 = vsel %vm5289_vm4, %v6357_v31, %v6358_v7 }
 0x4e2   : > { %v5910_v13 = vpop.f32.mrf.mxu0  ;;  %v6109_v10 = vpop.f32.mrf.mxu1  ;;  %v12434_v34 = vadd.f32 %v6395_v18, %v12331_v43  ;;  %v6323_v63 = vadd.f32 %v6276_v60, %v6211_v62  ;;  %v12439_v46 = vadd.f32 %v6394_v40, %v12341_v55  ;;  %v6362_v12 = vrot.slane %v9161_v53, 2 }
 0x4e3   : > { %v6360_v41 = vrot.slane %v6109_v10, 2  ;;  %v6256_v62 = vrot.slane %v5910_v13, 1 }
 0x4e4   : > { %v5912_v39 = vpop.f32.mrf.mxu0  ;;  %v9162_v2 = vpop.f32.mrf.mxu1 }
 0x4e5   : > { %v6213_v8 = vadd.f32 %v5912_v39, %v12197_v47  ;;  %v6363_v24 = vrot.slane %v9162_v2, 2  ;;  %v6393_v50 = vsel %vm5289_vm4, %v6359_v54, %v6360_v41 }
 0x4e6   : > { %v5914_v43 = vpop.f32.mrf.mxu0  ;;  %v6112_v30 = vpop.f32.mrf.mxu1  ;;  %v12445_v1 = vadd.f32 %v6393_v50, %v12358_v29 }
 0x4e7   : > { %v6257_v14 = vrot.slane %v5914_v43, 1  ;;  %v6361_v0 = vrot.slane %v6112_v30, 2  ;;  %v6391_v55 = vsel %vm5289_vm4, %v6362_v12, %v6363_v24 }
 0x4e8   : > { %v5918_v4 = vpop.f32.mrf.mxu0  ;;  %v9165_v51 = vpop.f32.mrf.mxu1  ;;  %7017 = vmatmul.mubr.bf16.gmra.mxu1 %v12235_v28  ;;  %v12451_v47 = vadd.f32 %v6391_v55, %v12397_v32 }
 0x4e9   : > { %v6275_v3 = vsel %vm1366_vm1, %v6256_v62, %v6257_v14  ;;  %7025 = vmatprep.mubr.bf16.mxu1 %v12873_v6  ;;  %v6392_v29 = vsel %vm5289_vm4, %v6360_v41, %v6361_v0  ;;  %v6366_v28 = vrot.slane %v9165_v51, 2 }
 0x4ea   : > { %v5919_v38 = vpop.f32.mrf.mxu0  ;;  %v6125_v31 = vpop.f32.mrf.mxu1  ;;  %v12459_v7 = vadd.f32 %v6392_v29, %v12372_v17  ;;  %v6324_v56 = vadd.f32 %v6275_v3, %v6212_v61 }
 0x4eb   : > { %v6258_v53 = vrot.slane %v5919_v38, 1  ;;  %v6364_v60 = vrot.slane %v6125_v31, 2 }
 0x4ec   : > { %v5921_v18 = vpop.f32.mrf.mxu0  ;;  %v9166_v32 = vpop.f32.mrf.mxu1 }
 0x4ed   : > { %v6274_v13 = vsel %vm1366_vm1, %v6257_v14, %v6258_v53  ;;  %v6214_v10 = vadd.f32 %v5921_v18, %v12219_v26  ;;  %v6367_v40 = vrot.slane %v9166_v32, 2  ;;  %v6390_v54 = vsel %vm5289_vm4, %v6363_v24, %v6364_v60 }
 0x4ee   : > { %v5923_v41 = vpop.f32.mrf.mxu0  ;;  %v6128_v39 = vpop.f32.mrf.mxu1  ;;  %v12467_v17 = vadd.f32 %v6390_v54, %v12407_v33  ;;  %v6325_v61 = vadd.f32 %v6274_v13, %v6213_v8 }
 0x4ef   : > { %v6365_v2 = vrot.slane %v6128_v39, 2  ;;  %v6388_v12 = vsel %vm5289_vm4, %v6366_v28, %v6367_v40  ;;  %v6259_v14 = vrot.slane %v5923_v41, 1 }
 0x4f0   : > { %v5927_v50 = vpop.f32.mrf.mxu0  ;;  %v9169_v43 = vpop.f32.mrf.mxu1  ;;  %7026 = vmatmul.mubr.bf16.gmra.mxu1 %v12254_v15  ;;  %v12472_v30 = vadd.f32 %v6388_v12, %v6323_v63 }
 0x4f1   : > { %v6215_v26 = vadd.f32 %v5927_v50, %v12227_v11  ;;  %7035 = vmatprep.mubr.bf16.mxu1 %v12873_v6  ;;  %v6389_v24 = vsel %vm5289_vm4, %v6365_v2, %v6366_v28  ;;  %v6370_v31 = vrot.slane %v9169_v43, 2  ;;  %v12974_v50 = vld [vmem:[#allocation38_spill] sm:$0xff] }
 0x4f2   : > { %v5929_v33 = vpop.f32.mrf.mxu0  ;;  %v6141_v62 = vpop.f32.mrf.mxu1  ;;  %v12479_v8 = vadd.f32 %v6389_v24, %v12424_v19 }
 0x4f3   : > { %v6260_v0 = vrot.slane %v5929_v33, 1  ;;  %v6368_v3 = vrot.slane %v6141_v62, 2 }
 0x4f4   : > { %v5931_v55 = vpop.f32.mrf.mxu0  ;;  %v9170_v4 = vpop.f32.mrf.mxu1 }
 0x4f5   : > { %v6273_v15 = vsel %vm1366_vm1, %v6259_v14, %v6260_v0  ;;  %v6371_v41 = vrot.slane %v9170_v4, 2 }
 0x4f6   : > { %v5932_v63 = vpop.f32.mrf.mxu0  ;;  %v6144_v51 = vpop.f32.mrf.mxu1  ;;  %v6326_v11 = vadd.f32 %v6273_v15, %v6214_v10 }
 0x4f7   : > { %v6261_v29 = vrot.slane %v5932_v63, 1  ;;  %v6369_v38 = vrot.slane %v6144_v51, 2 }
 0x4f8   : > { %v5936_v53 = vpop.f32.mrf.mxu0  ;;  %v9173_v60 = vpop.f32.mrf.mxu1  ;;  %7036 = vmatmul.mubr.bf16.gmra.mxu1 %v12256_v58 }
 0x4f9   : > { %v6272_v19 = vsel %vm1366_vm1, %v6260_v0, %v6261_v29  ;;  %v6216_v28 = vadd.f32 %v5936_v53, %v12249_v20  ;;  %7044 = vmatprep.mubr.bf16.mxu1 %v12873_v6  ;;  %v6387_v18 = vsel %vm5289_vm4, %v6368_v3, %v6369_v38  ;;  %v6386_v40 = vsel %vm5289_vm4, %v6369_v38, %v6370_v31 }
 0x4fa   : > { %v5938_v32 = vpop.f32.mrf.mxu0  ;;  %v6157_v13 = vpop.f32.mrf.mxu1  ;;  %v12490_v10 = vadd.f32 %v6387_v18, %v6324_v56  ;;  %v6327_v54 = vadd.f32 %v6272_v19, %v6215_v26  ;;  %v12494_v39 = vadd.f32 %v6386_v40, %v6325_v61  ;;  %v6374_v20 = vrot.slane %v9173_v60, 2 }
 0x4fb   : > { %v6372_v58 = vrot.slane %v6157_v13, 2  ;;  %v6262_v14 = vrot.slane %v5938_v32, 1  ;;  %v12975_v32 = vld [vmem:[#allocation39_spill] sm:$0xff] }
 0x4fc   : > { %v5940_v2 = vpop.f32.mrf.mxu0  ;;  %v9174_v12 = vpop.f32.mrf.mxu1 }
 0x4fd   : > { %v6217_v6 = vadd.f32 %v5940_v2, %v12974_v50  ;;  %v6375_v43 = vrot.slane %v9174_v12, 2  ;;  %v6385_v24 = vsel %vm5289_vm4, %v6371_v41, %v6372_v58 }
 0x4fe   : > { %v5942_v33 = vpop.f32.mrf.mxu0  ;;  %v6160_v56 = vpop.f32.mrf.mxu1  ;;  %v12499_v62 = vadd.f32 %v6385_v24, %v6326_v11 }
 0x4ff   : > { %v6263_v0 = vrot.slane %v5942_v33, 1  ;;  %v6373_v26 = vrot.slane %v6160_v56, 2  ;;  %v6383_v61 = vsel %vm5289_vm4, %v6374_v20, %v6375_v43 }
 0x500   : > { %v5946_v55 = vpop.f32.mrf.mxu0  ;;  %v9177_v4 = vpop.f32.mrf.mxu1  ;;  %7045 = vmatmul.mubr.bf16.gmra.mxu1 %v12269_v23 }
 0x501   : > { %v6271_v15 = vsel %vm1366_vm1, %v6262_v14, %v6263_v0  ;;  %v6384_v63 = vsel %vm5289_vm4, %v6372_v58, %v6373_v26  ;;  %v6378_v53 = vrot.slane %v9177_v4, 2 }
 0x502   : > { %v5947_v51 = vpop.f32.mrf.mxu0  ;;  %v6173_v3 = vpop.f32.mrf.mxu1  ;;  %v12508_v11 = vadd.f32 %v6384_v63, %v6327_v54  ;;  %v6328_v29 = vadd.f32 %v6271_v15, %v6216_v28 }
 0x503   : > { %v6264_v38 = vrot.slane %v5947_v51, 1  ;;  %v6376_v31 = vrot.slane %v6173_v3, 2 }
 0x504   : > { %v5949_v60 = vpop.f32.mrf.mxu0  ;;  %v9178_v19 = vpop.f32.mrf.mxu1  ;;  %v12510_v18 = vadd.f32 %v6383_v61, %v6328_v29 }
 0x505   : > { %v6270_v23 = vsel %vm1366_vm1, %v6263_v0, %v6264_v38  ;;  %v6218_v13 = vadd.f32 %v5949_v60, %v12975_v32  ;;  %v6379_v40 = vrot.slane %v9178_v19, 2  ;;  %v6382_v41 = vsel %vm5289_vm4, %v6375_v43, %v6376_v31 }
 0x506   : > { %v5951_v58 = vpop.f32.mrf.mxu0  ;;  %v6176_v54 = vpop.f32.mrf.mxu1  ;;  %v6329_v2 = vadd.f32 %v6270_v23, %v6217_v6 }
 0x507   : > { %v6377_v28 = vrot.slane %v6176_v54, 2  ;;  %v6380_v12 = vsel %vm5289_vm4, %v6378_v53, %v6379_v40  ;;  %v6265_v26 = vrot.slane %v5951_v58, 1 }
 0x508   : > { %v5955_v20 = vpop.f32.mrf.mxu0  ;;  %v6831_v50 = vpop.f32.mrf.mxu1  ;;  %v12519_v24 = vadd.f32 %v6382_v41, %v6329_v2 }
 0x509   : > { %v6219_v33 = vadd.f32 %v5955_v20, %v12288_v22  ;;  %v6381_v56 = vsel %vm5289_vm4, %v6377_v28, %v6378_v53  ;;  %v7279_v2 = vadd.f32 %v6831_v50, %v12302_v27  ;;  %v12545_v27 = vld [vmem:[%s12832_s4] ss:$0 sm:$0xff] }
 0x50a   : > { %v5957_v14 = vpop.f32.mrf.mxu0  ;;  %v6833_v0 = vpop.f32.mrf.mxu1 }
 0x50b   : > { %v6266_v43 = vrot.slane %v5957_v14, 1  ;;  %v7311_v23 = vrot.slane %v6833_v0, 1 }
 0x50c   : > { %v5959_v61 = vpop.f32.mrf.mxu0  ;;  %v6835_v55 = vpop.f32.mrf.mxu1 }
 0x50d   : > { %v6269_v6 = vsel %vm1366_vm1, %v6265_v26, %v6266_v43  ;;  %v7280_v28 = vadd.f32 %v6835_v55, %v12309_v57 }
 0x50e   : > { %v5960_v4 = vpop.f32.mrf.mxu0  ;;  %v6837_v15 = vpop.f32.mrf.mxu1  ;;  %v6330_v63 = vadd.f32 %v6269_v6, %v6218_v13 }
 0x50f   : > { %v6267_v51 = vrot.slane %v5960_v4, 1  ;;  %v7312_v31 = vrot.slane %v6837_v15, 1 }
 0x510   : > { %v6841_v3 = vpop.f32.mrf.mxu1  ;;  %v9197_v29 = vpop.f32.mrf.mxu0  ;;  %v12526_v38 = vadd.f32 %v6381_v56, %v6330_v63 }
 0x511   : > { %v6268_v22 = vsel %vm1366_vm1, %v6266_v43, %v6267_v51  ;;  %v7390_v13 = vsel %vm1366_vm1, %v7311_v23, %v7312_v31  ;;  %v7425_v14 = vrot.slane %v9197_v29, 2 }
 0x512   : > { %v6842_v53 = vpop.f32.mrf.mxu1  ;;  %v7088_v60 = vpop.f32.mrf.mxu0  ;;  %v6331_v19 = vadd.f32 %v6268_v22, %v6219_v33  ;;  %v7391_v26 = vadd.f32 %v7390_v13, %v7279_v2 }
 0x513   : > { %v7313_v32 = vrot.slane %v6842_v53, 1  ;;  %v7423_v33 = vrot.slane %v7088_v60, 2 }
 0x514   : > { %v6844_v40 = vpop.f32.mrf.mxu1  ;;  %v9198_v41 = vpop.f32.mrf.mxu0  ;;  %v12530_v58 = vadd.f32 %v6380_v12, %v6331_v19 }
 0x515   : > { %v7389_v54 = vsel %vm1366_vm1, %v7312_v31, %v7313_v32  ;;  %v7281_v29 = vadd.f32 %v6844_v40, %v12315_v44  ;;  %v7426_v19 = vrot.slane %v9198_v41, 2 }
 0x516   : > { %v6846_v20 = vpop.f32.mrf.mxu1  ;;  %v7091_v56 = vpop.f32.mrf.mxu0  ;;  %v7392_v43 = vadd.f32 %v7389_v54, %v7280_v28 }
 0x517   : > { %v7424_v0 = vrot.slane %v7091_v56, 2  ;;  %v7314_v63 = vrot.slane %v6846_v20, 1 }
 0x518   : > { %v6850_v12 = vpop.f32.mrf.mxu1  ;;  %v9201_v61 = vpop.f32.mrf.mxu0 }
 0x519   : > { %v7501_v6 = vsel %vm5289_vm4, %v7424_v0, %v7425_v14  ;;  %v7502_v4 = vsel %vm5289_vm4, %v7423_v33, %v7424_v0  ;;  %v7282_v14 = vadd.f32 %v6850_v12, %v12329_v42 }
 0x51a   : > { %v7503_v57 = vadd.f32 %v7502_v4, %v7391_v26  ;;  %v7504_v50 = vadd.f32 %v7501_v6, %v7392_v43  ;;  %v6852_v55 = vpop.f32.mrf.mxu1  ;;  %v7104_v15 = vpop.f32.mrf.mxu0 }
 0x51b   : > { %v7315_v51 = vrot.slane %v6852_v55, 1  ;;  %v7427_v3 = vrot.slane %v7104_v15, 2 }
 0x51c   : > { %v7542_v22 = vadd.f32 %v12545_v27, %v7503_v57  ;;  %v7543_v31 = vadd.f32 %v12545_v27, %v7504_v50  ;;  %v6854_v53 = vpop.f32.mrf.mxu1  ;;  %v9202_v60 = vpop.f32.mrf.mxu0 }
 0x51d   : > { %v7388_v23 = vsel %vm1366_vm1, %v7314_v63, %v7315_v51  ;;  %v7500_v20 = vsel %vm5289_vm4, %v7426_v19, %v7427_v3  ;;  %v7430_v63 = vrot.slane %v9202_v60, 2 }
 0x51e   : > { %v7574_v32 = vmax.f32 %v7542_v22, 0.0  ;;  %v7575_v13 = vmax.f32 %v7543_v31, 0.0  ;;  %v7393_v54 = vadd.f32 %v7388_v23, %v7281_v29  ;;  %v6855_v2 = vpop.f32.mrf.mxu1  ;;  %v7107_v28 = vpop.f32.mrf.mxu0 }
 0x51f   : > { %v7316_v44 = vrot.slane %v6855_v2, 1  ;;  %v7428_v40 = vrot.slane %v7107_v28, 2 }
 0x520   : > { %v8552_v56 = vpack.c.bf16 %v7575_v13, %v7574_v32  ;;  %v7505_v33 = vadd.f32 %v7500_v20, %v7393_v54  ;;  %v6859_v0 = vpop.f32.mrf.mxu1  ;;  %v12556_v26 = vpop.f32.mrf.mxu0  ;;  %v7429_v32 = vrot.slane %v9201_v61, 2 }
 0x521   : > { %v7387_v41 = vsel %vm1366_vm1, %v7315_v51, %v7316_v44  ;;  %v7499_v4 = vsel %vm5289_vm4, %v7427_v3, %v7428_v40  ;;  %v7283_v53 = vadd.f32 %v6859_v0, %v12321_v21 }
 0x522   : > { %8553 = vst [vmem:[%s12560_s29] sm:$0xff] %v8552_v56   ;;  %v7394_v43 = vadd.f32 %v7387_v41, %v7282_v14  ;;  %v6861_v6 = vpop.f32.mrf.mxu1  ;;  %v7544_v57 = vadd.f32 %v12545_v27, %v7505_v33  ;;  %v7120_v42 = vpop.f32.mrf.mxu0  ;;  %v7498_v28 = vsel %vm5289_vm4, %v7429_v32, %v7430_v63 }
 0x523   : > { %v7317_v51 = vrot.slane %v6861_v6, 1  ;;  %v7431_v60 = vrot.slane %v7120_v42, 2 }
 0x524   : > { %v7506_v50 = vadd.f32 %v7499_v4, %v7394_v43  ;;  %v6863_v12 = vpop.f32.mrf.mxu1  ;;  %v7576_v22 = vmax.f32 %v7544_v57, 0.0  ;;  %v9206_v19 = vpop.f32.mrf.mxu0 }
 0x525   : > { %v7284_v44 = vadd.f32 %v6863_v12, %v12339_v35  ;;  %v7497_v0 = vsel %vm5289_vm4, %v7430_v63, %v7431_v60  ;;  %v7433_v63 = vrot.slane %v12556_v26, 2 }
 0x526   : > { %v7545_v55 = vadd.f32 %v12545_v27, %v7506_v50  ;;  %v6865_v15 = vpop.f32.mrf.mxu1  ;;  %v7123_v56 = vpop.f32.mrf.mxu0 }
 0x527   : > { %v7318_v29 = vrot.slane %v6865_v15, 1  ;;  %v7432_v35 = vrot.slane %v7123_v56, 2 }
 0x528   : > { %v7577_v31 = vmax.f32 %v7545_v55, 0.0  ;;  %v6869_v23 = vpop.f32.mrf.mxu1  ;;  %v9209_v43 = vpop.f32.mrf.mxu0 }
 0x529   : > { %v7386_v3 = vsel %vm1366_vm1, %v7317_v51, %v7318_v29 }
 0x52a   : > { %v8557_v13 = vpack.c.bf16 %v7577_v31, %v7576_v22  ;;  %v7395_v54 = vadd.f32 %v7386_v3, %v7283_v53  ;;  %v6870_v2 = vpop.f32.mrf.mxu1  ;;  %v7136_v51 = vpop.f32.mrf.mxu0  ;;  %v7434_v3 = vrot.slane %v9206_v19, 2 }
 0x52b   : > { %v7319_v20 = vrot.slane %v6870_v2, 1 }
 0x52c   : > { %8652 = vst [vmem:[%s12560_s29 + $0x8] sm:$0xff] %v8557_v13   ;;  %v7507_v40 = vadd.f32 %v7498_v28, %v7395_v54  ;;  %v6872_v21 = vpop.f32.mrf.mxu1  ;;  %v7496_v13 = vsel %vm5289_vm4, %v7432_v35, %v7433_v63  ;;  %v9210_v2 = vpop.f32.mrf.mxu0 }
 0x52d   : > { %v7385_v61 = vsel %vm1366_vm1, %v7318_v29, %v7319_v20  ;;  %v7285_v29 = vadd.f32 %v6872_v21, %v12354_v9 }
 0x52e   : > { %v7396_v14 = vadd.f32 %v7385_v61, %v7284_v44  ;;  %v6874_v33 = vpop.f32.mrf.mxu1  ;;  %v7546_v41 = vadd.f32 %v12545_v27, %v7507_v40  ;;  %v7495_v40 = vsel %vm5289_vm4, %v7433_v63, %v7434_v3  ;;  %v7139_v56 = vpop.f32.mrf.mxu0  ;;  %v7437_v3 = vrot.slane %v9209_v43, 2 }
 0x52f   : > { %v7320_v42 = vrot.slane %v6874_v33, 1 }
 0x530   : > { %v7508_v6 = vadd.f32 %v7497_v0, %v7396_v14  ;;  %v6878_v4 = vpop.f32.mrf.mxu1  ;;  %v7578_v55 = vmax.f32 %v7546_v41, 0.0  ;;  %v7436_v0 = vrot.slane %v7139_v56, 2 }
 0x531   : > { %v7286_v28 = vadd.f32 %v6878_v4, %v12347_v52 }
 0x532   : > { %v7547_v57 = vadd.f32 %v12545_v27, %v7508_v6  ;;  %v6880_v50 = vpop.f32.mrf.mxu1  ;;  %v12594_v6 = vpop.f32.mrf.mxu0 }
 0x533   : > { %v7321_v12 = vrot.slane %v6880_v50, 1 }
 0x534   : > { %v7579_v15 = vmax.f32 %v7547_v57, 0.0  ;;  %v6882_v22 = vpop.f32.mrf.mxu1 }
 0x535   : > { %v7384_v31 = vsel %vm1366_vm1, %v7320_v42, %v7321_v12  ;;  %v7435_v42 = vrot.slane %v7136_v51, 2 }
 0x536   : > { %v8562_v53 = vpack.c.bf16 %v7579_v15, %v7578_v55  ;;  %v7397_v23 = vadd.f32 %v7384_v31, %v7285_v29  ;;  %v6883_v32 = vpop.f32.mrf.mxu1  ;;  %v7152_v31 = vpop.f32.mrf.mxu0 }
 0x537   : > { %v7322_v54 = vrot.slane %v6883_v32, 1  ;;  %v7494_v22 = vsel %vm5289_vm4, %v7435_v42, %v7436_v0 }
 0x538   : > { %8653 = vst [vmem:[%s12560_s29 + $0x10] sm:$0xff] %v8562_v53   ;;  %v7509_v60 = vadd.f32 %v7496_v13, %v7397_v23  ;;  %v6887_v9 = vpop.f32.mrf.mxu1 }
 0x539   : > { %v7383_v26 = vsel %vm1366_vm1, %v7321_v12, %v7322_v54  ;;  %v7287_v50 = vadd.f32 %v6887_v9, %v12368_v49  ;;  %v7493_v54 = vsel %vm5289_vm4, %v7436_v0, %v7437_v3 }
 0x53a   : > { %v7398_v20 = vadd.f32 %v7383_v26, %v7286_v28  ;;  %v6889_v44 = vpop.f32.mrf.mxu1  ;;  %v7548_v19 = vadd.f32 %v12545_v27, %v7509_v60  ;;  %v12607_v28 = vpop.f32.mrf.mxu0 }
 0x53b   : > { %v7323_v52 = vrot.slane %v6889_v44, 1  ;;  %v7439_v44 = vrot.slane %v7152_v31, 2 }
 0x53c   : > { %v7510_v21 = vadd.f32 %v7495_v40, %v7398_v20  ;;  %v6891_v61 = vpop.f32.mrf.mxu1  ;;  %v7580_v4 = vmax.f32 %v7548_v19, 0.0  ;;  %v7155_v56 = vpop.f32.mrf.mxu0 }
 0x53d   : > { %v7288_v53 = vadd.f32 %v6891_v61, %v12375_v16 }
 0x53e   : > { %v7549_v14 = vadd.f32 %v12545_v27, %v7510_v21  ;;  %v6893_v33 = vpop.f32.mrf.mxu1  ;;  %v12616_v42 = vpop.f32.mrf.mxu0 }
 0x53f   : > { %v7324_v41 = vrot.slane %v6893_v33, 1  ;;  %v7438_v33 = vrot.slane %v9210_v2, 2 }
 0x540   : > { %v7581_v57 = vmax.f32 %v7549_v14, 0.0  ;;  %v6897_v35 = vpop.f32.mrf.mxu1 }
 0x541   : > { %v7382_v12 = vsel %vm1366_vm1, %v7323_v52, %v7324_v41 }
 0x542   : > { %v8567_v55 = vpack.c.bf16 %v7581_v57, %v7580_v4  ;;  %v7399_v15 = vadd.f32 %v7382_v12, %v7287_v50  ;;  %v6898_v29 = vpop.f32.mrf.mxu1  ;;  %v7492_v57 = vsel %vm5289_vm4, %v7438_v33, %v7439_v44  ;;  %v7440_v50 = vrot.slane %v7155_v56, 2 }
 0x543   : > { %v7325_v63 = vrot.slane %v6898_v29, 1 }
 0x544   : > { %8654 = vst [vmem:[%s12560_s29 + $0x18] sm:$0xff] %v8567_v55   ;;  %v7511_v23 = vadd.f32 %v7494_v22, %v7399_v15  ;;  %v6900_v32 = vpop.f32.mrf.mxu1  ;;  %v7491_v22 = vsel %vm5289_vm4, %v7439_v44, %v7440_v50 }
 0x545   : > { %v7381_v49 = vsel %vm1366_vm1, %v7324_v41, %v7325_v63  ;;  %v7289_v61 = vadd.f32 %v6900_v32, %v12381_v5  ;;  %v7168_v63 = vpop.f32.mrf.mxu0 }
 0x546   : > { %v7400_v51 = vadd.f32 %v7381_v49, %v7288_v53  ;;  %v6902_v13 = vpop.f32.mrf.mxu1  ;;  %v7550_v60 = vadd.f32 %v12545_v27, %v7511_v23  ;;  %v7443_v56 = vrot.slane %v7168_v63, 2 }
 0x547   : > { %v7326_v40 = vrot.slane %v6902_v13, 1  ;;  %v9218_v13 = vpop.f32.mrf.mxu0 }
 0x548   : > { %v7512_v9 = vadd.f32 %v7493_v54, %v7400_v51  ;;  %v6906_v26 = vpop.f32.mrf.mxu1  ;;  %v7582_v19 = vmax.f32 %v7550_v60, 0.0 }
 0x549   : > { %v7290_v12 = vadd.f32 %v6906_v26, %v12395_v59  ;;  %v7442_v59 = vrot.slane %v12607_v28, 2 }
 0x54a   : > { %v7551_v20 = vadd.f32 %v12545_v27, %v7512_v9  ;;  %v6908_v16 = vpop.f32.mrf.mxu1 }
 0x54b   : > { %v7327_v43 = vrot.slane %v6908_v16, 1 }
 0x54c   : > { %v7583_v21 = vmax.f32 %v7551_v20, 0.0  ;;  %v6910_v14 = vpop.f32.mrf.mxu1  ;;  %v7441_v20 = vrot.slane %v12594_v6, 2 }
 0x54d   : > { %v7380_v0 = vsel %vm1366_vm1, %v7326_v40, %v7327_v43 }
 0x54e   : > { %v8572_v52 = vpack.c.bf16 %v7583_v21, %v7582_v19  ;;  %v7401_v41 = vadd.f32 %v7380_v0, %v7289_v61  ;;  %v6911_v4 = vpop.f32.mrf.mxu1  ;;  %v7490_v28 = vsel %vm5289_vm4, %v7441_v20, %v7442_v59  ;;  %v7171_v21 = vpop.f32.mrf.mxu0 }
 0x54f   : > { %v7328_v35 = vrot.slane %v6911_v4, 1 }
 0x550   : > { %8655 = vst [vmem:[%s12560_s29 + $0x20] sm:$0xff] %v8572_v52   ;;  %v7513_v55 = vadd.f32 %v7492_v57, %v7401_v41  ;;  %v6915_v5 = vpop.f32.mrf.mxu1  ;;  %v7489_v52 = vsel %vm5289_vm4, %v7442_v59, %v7443_v56  ;;  %v12639_v41 = vpop.f32.mrf.mxu0  ;;  %v7446_v59 = vrot.slane %v9218_v13, 2 }
 0x551   : > { %v7379_v2 = vsel %vm1366_vm1, %v7327_v43, %v7328_v35  ;;  %v7291_v9 = vadd.f32 %v6915_v5, %v12387_v48 }
 0x552   : > { %v7402_v15 = vadd.f32 %v7379_v2, %v7290_v12  ;;  %v6917_v29 = vpop.f32.mrf.mxu1  ;;  %v7552_v31 = vadd.f32 %v12545_v27, %v7513_v55  ;;  %v7184_v2 = vpop.f32.mrf.mxu0 }
 0x553   : > { %v7329_v49 = vrot.slane %v6917_v29, 1 }
 0x554   : > { %v7514_v53 = vadd.f32 %v7491_v22, %v7402_v15  ;;  %v6919_v23 = vpop.f32.mrf.mxu1  ;;  %v7584_v54 = vmax.f32 %v7552_v31, 0.0  ;;  %v7445_v31 = vrot.slane %v12616_v42, 2 }
 0x555   : > { %v7292_v61 = vadd.f32 %v6919_v23, %v12405_v45  ;;  %v7444_v45 = vrot.slane %v7171_v21, 2 }
 0x556   : > { %v7553_v32 = vadd.f32 %v12545_v27, %v7514_v53  ;;  %v6921_v3 = vpop.f32.mrf.mxu1 }
 0x557   : > { %v7330_v51 = vrot.slane %v6921_v3, 1 }
 0x558   : > { %v7585_v60 = vmax.f32 %v7553_v32, 0.0  ;;  %v6925_v26 = vpop.f32.mrf.mxu1 }
 0x559   : > { %v7378_v16 = vsel %vm1366_vm1, %v7329_v49, %v7330_v51  ;;  %v7488_v49 = vsel %vm5289_vm4, %v7444_v45, %v7445_v31 }
 0x55a   : > { %v8577_v44 = vpack.c.bf16 %v7585_v60, %v7584_v54  ;;  %v7403_v40 = vadd.f32 %v7378_v16, %v7291_v9  ;;  %v6926_v43 = vpop.f32.mrf.mxu1  ;;  %v9222_v54 = vpop.f32.mrf.mxu0  ;;  %v7487_v16 = vsel %vm5289_vm4, %v7445_v31, %v7446_v59 }
 0x55b   : > { %v7331_v19 = vrot.slane %v6926_v43, 1 }
 0x55c   : > { %8656 = vst [vmem:[%s12560_s29 + $0x28] sm:$0xff] %v8577_v44   ;;  %v7515_v14 = vadd.f32 %v7490_v28, %v7403_v40  ;;  %v6928_v48 = vpop.f32.mrf.mxu1  ;;  %v7187_v44 = vpop.f32.mrf.mxu0 }
 0x55d   : > { %v7377_v6 = vsel %vm1366_vm1, %v7330_v51, %v7331_v19  ;;  %v7293_v22 = vadd.f32 %v6928_v48, %v12420_v25  ;;  %v7448_v19 = vrot.slane %v7187_v44, 2 }
 0x55e   : > { %v7404_v33 = vadd.f32 %v7377_v6, %v7292_v61  ;;  %v6930_v0 = vpop.f32.mrf.mxu1  ;;  %v7554_v4 = vadd.f32 %v12545_v27, %v7515_v14  ;;  %v12657_v61 = vpop.f32.mrf.mxu0 }
 0x55f   : > { %v7332_v55 = vrot.slane %v6930_v0, 1  ;;  %v7447_v0 = vrot.slane %v7184_v2, 2 }
 0x560   : > { %v7516_v57 = vadd.f32 %v7489_v52, %v7404_v33  ;;  %v6934_v50 = vpop.f32.mrf.mxu1  ;;  %v7586_v15 = vmax.f32 %v7554_v4, 0.0  ;;  %v7200_v45 = vpop.f32.mrf.mxu0 }
 0x561   : > { %v7294_v60 = vadd.f32 %v6934_v50, %v12413_v36  ;;  %v7451_v59 = vrot.slane %v7200_v45, 2 }
 0x562   : > { %v7555_v35 = vadd.f32 %v12545_v27, %v7516_v57  ;;  %v6936_v12 = vpop.f32.mrf.mxu1  ;;  %v12671_v31 = vpop.f32.mrf.mxu0 }
 0x563   : > { %v7333_v5 = vrot.slane %v6936_v12, 1 }
 0x564   : > { %v7587_v29 = vmax.f32 %v7555_v35, 0.0  ;;  %v6938_v63 = vpop.f32.mrf.mxu1  ;;  %v7486_v35 = vsel %vm5289_vm4, %v7447_v0, %v7448_v19 }
 0x565   : > { %v7376_v53 = vsel %vm1366_vm1, %v7332_v55, %v7333_v5 }
 0x566   : > { %v8582_v23 = vpack.c.bf16 %v7587_v29, %v7586_v15  ;;  %v7405_v32 = vadd.f32 %v7376_v53, %v7293_v22  ;;  %v6939_v3 = vpop.f32.mrf.mxu1 }
 0x567   : > { %v7334_v51 = vrot.slane %v6939_v3, 1 }
 0x568   : > { %8657 = vst [vmem:[%s12560_s29 + $0x30] sm:$0xff] %v8582_v23   ;;  %v7517_v9 = vadd.f32 %v7488_v49, %v7405_v32  ;;  %v6943_v25 = vpop.f32.mrf.mxu1 }
 0x569   : > { %v7375_v42 = vsel %vm1366_vm1, %v7333_v5, %v7334_v51  ;;  %v7295_v6 = vadd.f32 %v6943_v25, %v12434_v34  ;;  %v7449_v34 = vrot.slane %v12639_v41, 2  ;;  %v7203_v51 = vpop.f32.mrf.mxu0 }
 0x56a   : > { %v7406_v26 = vadd.f32 %v7375_v42, %v7294_v60  ;;  %v6945_v20 = vpop.f32.mrf.mxu1  ;;  %v7556_v13 = vadd.f32 %v12545_v27, %v7517_v9 }
 0x56b   : > { %v7335_v36 = vrot.slane %v6945_v20, 1  ;;  %v7485_v63 = vsel %vm5289_vm4, %v7448_v19, %v7449_v34  ;;  %v7453_v34 = vrot.slane %v12657_v61, 2 }
 0x56c   : > { %v7518_v40 = vadd.f32 %v7487_v16, %v7406_v26  ;;  %v6947_v43 = vpop.f32.mrf.mxu1  ;;  %v7588_v14 = vmax.f32 %v7556_v13, 0.0  ;;  %v7450_v26 = vrot.slane %v9222_v54, 2 }
 0x56d   : > { %v7296_v55 = vadd.f32 %v6947_v43, %v12439_v46  ;;  %v7452_v43 = vrot.slane %v7203_v51, 2 }
 0x56e   : > { %v7557_v28 = vadd.f32 %v12545_v27, %v7518_v40  ;;  %v6949_v56 = vpop.f32.mrf.mxu1  ;;  %v7484_v40 = vsel %vm5289_vm4, %v7450_v26, %v7451_v59 }
 0x56f   : > { %v7336_v21 = vrot.slane %v6949_v56, 1  ;;  %v12680_v56 = vpop.f32.mrf.mxu0 }
 0x570   : > { %v7589_v48 = vmax.f32 %v7557_v28, 0.0  ;;  %v6953_v33 = vpop.f32.mrf.mxu1 }
 0x571   : > { %v7374_v52 = vsel %vm1366_vm1, %v7335_v36, %v7336_v21 }
 0x572   : > { %v8587_v4 = vpack.c.bf16 %v7589_v48, %v7588_v14  ;;  %v7407_v57 = vadd.f32 %v7374_v52, %v7295_v6  ;;  %v6954_v50 = vpop.f32.mrf.mxu1  ;;  %v7483_v48 = vsel %vm5289_vm4, %v7451_v59, %v7452_v43  ;;  %v7216_v6 = vpop.f32.mrf.mxu0 }
 0x573   : > { %v7337_v12 = vrot.slane %v6954_v50, 1 }
 0x574   : > { %8658 = vst [vmem:[%s12560_s29 + $0x38] sm:$0xff] %v8587_v4   ;;  %v7519_v5 = vadd.f32 %v7486_v35, %v7407_v57  ;;  %v6956_v15 = vpop.f32.mrf.mxu1 }
 0x575   : > { %v7373_v2 = vsel %vm1366_vm1, %v7336_v21, %v7337_v12  ;;  %v7297_v25 = vadd.f32 %v6956_v15, %v12445_v1  ;;  %v9230_v12 = vpop.f32.mrf.mxu0 }
 0x576   : > { %v7408_v29 = vadd.f32 %v7373_v2, %v7296_v55  ;;  %v6958_v22 = vpop.f32.mrf.mxu1  ;;  %v7558_v53 = vadd.f32 %v12545_v27, %v7519_v5 }
 0x577   : > { %v7338_v49 = vrot.slane %v6958_v22, 1 }
 0x578   : > { %v7520_v23 = vadd.f32 %v7485_v63, %v7408_v29  ;;  %v6962_v32 = vpop.f32.mrf.mxu1  ;;  %v7590_v60 = vmax.f32 %v7558_v53, 0.0  ;;  %v7455_v53 = vrot.slane %v7216_v6, 2 }
 0x579   : > { %v7298_v19 = vadd.f32 %v6962_v32, %v12459_v7  ;;  %v7454_v7 = vrot.slane %v12671_v31, 2  ;;  %v7219_v32 = vpop.f32.mrf.mxu0 }
 0x57a   : > { %v7559_v46 = vadd.f32 %v12545_v27, %v7520_v23  ;;  %v6964_v3 = vpop.f32.mrf.mxu1 }
 0x57b   : > { %v7339_v41 = vrot.slane %v6964_v3, 1  ;;  %v7482_v31 = vsel %vm5289_vm4, %v7453_v34, %v7454_v7  ;;  %v12703_v51 = vpop.f32.mrf.mxu0 }
 0x57c   : > { %v7591_v9 = vmax.f32 %v7559_v46, 0.0  ;;  %v6966_v42 = vpop.f32.mrf.mxu1 }
 0x57d   : > { %v7372_v20 = vsel %vm1366_vm1, %v7338_v49, %v7339_v41 }
 0x57e   : > { %v8592_v16 = vpack.c.bf16 %v7591_v9, %v7590_v60  ;;  %v7409_v44 = vadd.f32 %v7372_v20, %v7297_v25  ;;  %v6967_v13 = vpop.f32.mrf.mxu1 }
 0x57f   : > { %v7340_v28 = vrot.slane %v6967_v13, 1 }
 0x580   : > { %8659 = vst [vmem:[%s12560_s29 + $0x40] sm:$0xff] %v8592_v16   ;;  %v7521_v36 = vadd.f32 %v7484_v40, %v7409_v44  ;;  %v6971_v1 = vpop.f32.mrf.mxu1  ;;  %v7232_v44 = vpop.f32.mrf.mxu0 }
 0x581   : > { %v7371_v54 = vsel %vm1366_vm1, %v7339_v41, %v7340_v28  ;;  %v7299_v5 = vadd.f32 %v6971_v1, %v12451_v47  ;;  %v7481_v41 = vsel %vm5289_vm4, %v7454_v7, %v7455_v53  ;;  %v7459_v53 = vrot.slane %v7232_v44, 2 }
 0x582   : > { %v7410_v21 = vadd.f32 %v7371_v54, %v7298_v19  ;;  %v6973_v14 = vpop.f32.mrf.mxu1  ;;  %v7560_v33 = vadd.f32 %v12545_v27, %v7521_v36  ;;  %v7457_v19 = vrot.slane %v12680_v56, 2 }
 0x583   : > { %v7341_v50 = vrot.slane %v6973_v14, 1  ;;  %v7458_v14 = vrot.slane %v9230_v12, 2 }
 0x584   : > { %v7522_v0 = vadd.f32 %v7483_v48, %v7410_v21  ;;  %v6975_v52 = vpop.f32.mrf.mxu1  ;;  %v7592_v45 = vmax.f32 %v7560_v33, 0.0  ;;  %v9234_v33 = vpop.f32.mrf.mxu0 }
 0x585   : > { %v7300_v46 = vadd.f32 %v6975_v52, %v12467_v17  ;;  %v7456_v17 = vrot.slane %v7219_v32, 2  ;;  %v7479_v7 = vsel %vm5289_vm4, %v7457_v19, %v7458_v14 }
 0x586   : > { %v7561_v4 = vadd.f32 %v12545_v27, %v7522_v0  ;;  %v6977_v57 = vpop.f32.mrf.mxu1 }
 0x587   : > { %v7342_v35 = vrot.slane %v6977_v57, 1  ;;  %v7480_v48 = vsel %vm5289_vm4, %v7456_v17, %v7457_v19 }
 0x588   : > { %v7593_v55 = vmax.f32 %v7561_v4, 0.0  ;;  %v6981_v15 = vpop.f32.mrf.mxu1 }
 0x589   : > { %v7370_v2 = vsel %vm1366_vm1, %v7341_v50, %v7342_v35  ;;  %v7235_v50 = vpop.f32.mrf.mxu0 }
 0x58a   : > { %v8597_v29 = vpack.c.bf16 %v7593_v55, %v7592_v45  ;;  %v7411_v22 = vadd.f32 %v7370_v2, %v7299_v5  ;;  %v6982_v63 = vpop.f32.mrf.mxu1  ;;  %v7460_v15 = vrot.slane %v7235_v50, 2 }
 0x58b   : > { %v7343_v23 = vrot.slane %v6982_v63, 1  ;;  %v12721_v2 = vpop.f32.mrf.mxu0 }
 0x58c   : > { %8660 = vst [vmem:[%s12560_s29 + $0x48] sm:$0xff] %v8597_v29   ;;  %v7523_v3 = vadd.f32 %v7482_v31, %v7411_v22  ;;  %v6984_v47 = vpop.f32.mrf.mxu1 }
 0x58d   : > { %v7369_v61 = vsel %vm1366_vm1, %v7342_v35, %v7343_v23  ;;  %v7301_v43 = vadd.f32 %v6984_v47, %v12479_v8  ;;  %v7478_v47 = vsel %vm5289_vm4, %v7459_v53, %v7460_v15 }
 0x58e   : > { %v7412_v59 = vadd.f32 %v7369_v61, %v7300_v46  ;;  %v6986_v49 = vpop.f32.mrf.mxu1  ;;  %v7562_v60 = vadd.f32 %v12545_v27, %v7523_v3 }
 0x58f   : > { %v7344_v20 = vrot.slane %v6986_v49, 1 }
 0x590   : > { %v7524_v9 = vadd.f32 %v7481_v41, %v7412_v59  ;;  %v6990_v25 = vpop.f32.mrf.mxu1  ;;  %v7594_v13 = vmax.f32 %v7562_v60, 0.0  ;;  %v7248_v59 = vpop.f32.mrf.mxu0 }
 0x591   : > { %v7302_v0 = vadd.f32 %v6990_v25, %v12472_v30 }
 0x592   : > { %v7563_v42 = vadd.f32 %v12545_v27, %v7524_v9  ;;  %v6992_v26 = vpop.f32.mrf.mxu1  ;;  %v9238_v17 = vpop.f32.mrf.mxu0 }
 0x593   : > { %v7345_v16 = vrot.slane %v6992_v26, 1 }
 0x594   : > { %v7595_v40 = vmax.f32 %v7563_v42, 0.0  ;;  %v6994_v28 = vpop.f32.mrf.mxu1 }
 0x595   : > { %v7368_v36 = vsel %vm1366_vm1, %v7344_v20, %v7345_v16  ;;  %v7251_v28 = vpop.f32.mrf.mxu0 }
 0x596   : > { %v8602_v1 = vpack.c.bf16 %v7595_v40, %v7594_v13  ;;  %v7413_v54 = vadd.f32 %v7368_v36, %v7301_v43  ;;  %v6995_v21 = vpop.f32.mrf.mxu1  ;;  %v7463_v40 = vrot.slane %v7248_v59, 2 }
 0x597   : > { %v7346_v6 = vrot.slane %v6995_v21, 1  ;;  %v7462_v21 = vrot.slane %v9234_v33, 2 }
 0x598   : > { %8661 = vst [vmem:[%s12560_s29 + $0x50] sm:$0xff] %v8602_v1   ;;  %v7525_v52 = vadd.f32 %v7480_v48, %v7413_v54  ;;  %v6999_v8 = vpop.f32.mrf.mxu1 }
 0x599   : > { %v7367_v56 = vsel %vm1366_vm1, %v7345_v16, %v7346_v6  ;;  %v7303_v63 = vadd.f32 %v6999_v8, %v12490_v10  ;;  %v7461_v10 = vrot.slane %v12703_v51, 2  ;;  %v7464_v8 = vrot.slane %v7251_v28, 2 }
 0x59a   : > { %v7414_v4 = vadd.f32 %v7367_v56, %v7302_v0  ;;  %v7001_v57 = vpop.f32.mrf.mxu1  ;;  %v7564_v35 = vadd.f32 %v12545_v27, %v7525_v52  ;;  %v7476_v52 = vsel %vm5289_vm4, %v7462_v21, %v7463_v40 }
 0x59b   : > { %v7347_v30 = vrot.slane %v7001_v57, 1  ;;  %v7477_v26 = vsel %vm5289_vm4, %v7460_v15, %v7461_v10 }
 0x59c   : > { %v7526_v12 = vadd.f32 %v7479_v7, %v7414_v4  ;;  %v7003_v45 = vpop.f32.mrf.mxu1  ;;  %v7596_v29 = vmax.f32 %v7564_v35, 0.0  ;;  %v7475_v35 = vsel %vm5289_vm4, %v7463_v40, %v7464_v8 }
 0x59d   : > { %v7304_v49 = vadd.f32 %v7003_v45, %v12494_v39 }
 0x59e   : > { %v7565_v55 = vadd.f32 %v12545_v27, %v7526_v12  ;;  %v7005_v5 = vpop.f32.mrf.mxu1  ;;  %v9241_v12 = vpop.f32.mrf.mxu0 }
 0x59f   : > { %v7348_v34 = vrot.slane %v7005_v5, 1 }
 0x5a0   : > { %v7597_v22 = vmax.f32 %v7565_v55, 0.0  ;;  %v7009_v31 = vpop.f32.mrf.mxu1 }
 0x5a1   : > { %v7366_v23 = vsel %vm1366_vm1, %v7347_v30, %v7348_v34 }
 0x5a2   : > { %v8607_v32 = vpack.c.bf16 %v7597_v22, %v7596_v29  ;;  %v7415_v46 = vadd.f32 %v7366_v23, %v7303_v63  ;;  %v7010_v3 = vpop.f32.mrf.mxu1  ;;  %v7264_v22 = vpop.f32.mrf.mxu0 }
 0x5a3   : > { %v7349_v61 = vrot.slane %v7010_v3, 1 }
 0x5a4   : > { %8662 = vst [vmem:[%s12560_s29 + $0x58] sm:$0xff] %v8607_v32   ;;  %v7527_v41 = vadd.f32 %v7478_v47, %v7415_v46  ;;  %v7012_v60 = vpop.f32.mrf.mxu1  ;;  %v7465_v32 = vrot.slane %v12721_v2, 2 }
 0x5a5   : > { %v7365_v9 = vsel %vm1366_vm1, %v7348_v34, %v7349_v61  ;;  %v7305_v1 = vadd.f32 %v7012_v60, %v12499_v62  ;;  %v7466_v34 = vrot.slane %v9238_v17, 2 }
 0x5a6   : > { %v7416_v25 = vadd.f32 %v7365_v9, %v7304_v49  ;;  %v7014_v42 = vpop.f32.mrf.mxu1  ;;  %v7566_v20 = vadd.f32 %v12545_v27, %v7527_v41  ;;  %v7467_v49 = vrot.slane %v7264_v22, 2 }
 0x5a7   : > { %v7350_v43 = vrot.slane %v7014_v42, 1  ;;  %v7474_v59 = vsel %vm5289_vm4, %v7465_v32, %v7466_v34 }
 0x5a8   : > { %v7528_v16 = vadd.f32 %v7477_v26, %v7416_v25  ;;  %v7018_v44 = vpop.f32.mrf.mxu1  ;;  %v7598_v19 = vmax.f32 %v7566_v20, 0.0  ;;  %v7473_v26 = vsel %vm5289_vm4, %v7466_v34, %v7467_v49 }
 0x5a9   : > { %v7306_v4 = vadd.f32 %v7018_v44, %v12508_v11 }
 0x5aa   : > { %v7567_v13 = vadd.f32 %v12545_v27, %v7528_v16  ;;  %v7020_v39 = vpop.f32.mrf.mxu1 }
 0x5ab   : > { %v7351_v51 = vrot.slane %v7020_v39, 1 }
 0x5ac   : > { %v7599_v36 = vmax.f32 %v7567_v13, 0.0  ;;  %v7022_v54 = vpop.f32.mrf.mxu1 }
 0x5ad   : > { %v7364_v14 = vsel %vm1366_vm1, %v7350_v43, %v7351_v51 }
 0x5ae   : > { %v8612_v48 = vpack.c.bf16 %v7599_v36, %v7598_v19  ;;  %v7417_v6 = vadd.f32 %v7364_v14, %v7305_v1  ;;  %v7023_v0 = vpop.f32.mrf.mxu1 }
 0x5af   : > { %v7352_v56 = vrot.slane %v7023_v0, 1 }
 0x5b0   : > { %8663 = vst [vmem:[%s12560_s29 + $0x60] sm:$0xff] %v8612_v48   ;;  %v7529_v57 = vadd.f32 %v7476_v52, %v7417_v6  ;;  %v7027_v7 = vpop.f32.mrf.mxu1 }
 0x5b1   : > { %v7363_v62 = vsel %vm1366_vm1, %v7351_v51, %v7352_v56  ;;  %v7307_v53 = vadd.f32 %v7027_v7, %v12510_v18  ;;  %v9242_v18 = vpop.f32.mrf.mxu0 }
 0x5b2   : > { %v7418_v33 = vadd.f32 %v7363_v62, %v7306_v4  ;;  %v7029_v50 = vpop.f32.mrf.mxu1  ;;  %v7568_v45 = vadd.f32 %v12545_v27, %v7529_v57  ;;  %v7470_v6 = vrot.slane %v9242_v18, 2 }
 0x5b3   : > { %v7353_v11 = vrot.slane %v7029_v50, 1  ;;  %v7267_v44 = vpop.f32.mrf.mxu0 }
 0x5b4   : > { %v7530_v55 = vadd.f32 %v7475_v35, %v7418_v33  ;;  %v7031_v5 = vpop.f32.mrf.mxu1  ;;  %v7600_v63 = vmax.f32 %v7568_v45, 0.0  ;;  %v7468_v51 = vrot.slane %v7267_v44, 2 }
 0x5b5   : > { %v7308_v60 = vadd.f32 %v7031_v5, %v12519_v24  ;;  %v7469_v24 = vrot.slane %v9241_v12, 2 }
 0x5b6   : > { %v7569_v15 = vadd.f32 %v12545_v27, %v7530_v55  ;;  %v7033_v30 = vpop.f32.mrf.mxu1 }
 0x5b7   : > { %v7354_v29 = vrot.slane %v7033_v30, 1  ;;  %v7472_v0 = vsel %vm5289_vm4, %v7468_v51, %v7469_v24  ;;  %v7471_v57 = vsel %vm5289_vm4, %v7469_v24, %v7470_v6 }
 0x5b8   : > { %v7601_v31 = vmax.f32 %v7569_v15, 0.0  ;;  %v7037_v23 = vpop.f32.mrf.mxu1 }
 0x5b9   : > { %v7362_v46 = vsel %vm1366_vm1, %v7353_v11, %v7354_v29 }
 0x5ba   : > { %v8617_v3 = vpack.c.bf16 %v7601_v31, %v7600_v63  ;;  %v7419_v47 = vadd.f32 %v7362_v46, %v7307_v53  ;;  %v7038_v61 = vpop.f32.mrf.mxu1 }
 0x5bb   : > { %v7355_v41 = vrot.slane %v7038_v61, 1 }
 0x5bc   : > { %8664 = vst [vmem:[%s12560_s29 + $0x68] sm:$0xff] %v8617_v3   ;;  %v7531_v10 = vadd.f32 %v7474_v59, %v7419_v47  ;;  %v7040_v9 = vpop.f32.mrf.mxu1 }
 0x5bd   : > { %v7361_v2 = vsel %vm1366_vm1, %v7354_v29, %v7355_v41  ;;  %v7309_v36 = vadd.f32 %v7040_v9, %v12526_v38 }
 0x5be   : > { %v7420_v25 = vadd.f32 %v7361_v2, %v7308_v60  ;;  %v7042_v42 = vpop.f32.mrf.mxu1  ;;  %v7570_v17 = vadd.f32 %v12545_v27, %v7531_v10 }
 0x5bf   : > { %v7356_v40 = vrot.slane %v7042_v42, 1 }
 0x5c0   : > { %v7532_v20 = vadd.f32 %v7473_v26, %v7420_v25  ;;  %v7046_v16 = vpop.f32.mrf.mxu1  ;;  %v7602_v28 = vmax.f32 %v7570_v17, 0.0 }
 0x5c1   : > { %v7310_v8 = vadd.f32 %v7046_v16, %v12530_v58 }
 0x5c2   : > { %v7571_v13 = vadd.f32 %v12545_v27, %v7532_v20  ;;  %v7048_v39 = vpop.f32.mrf.mxu1 }
 0x5c3   : > { %v7357_v43 = vrot.slane %v7048_v39, 1 }
 0x5c4   : > { %v7603_v19 = vmax.f32 %v7571_v13, 0.0  ;;  %v7050_v1 = vpop.f32.mrf.mxu1 }
 0x5c5   : > { %v7360_v54 = vsel %vm1366_vm1, %v7356_v40, %v7357_v43 }
 0x5c6   : > { %v8622_v21 = vpack.c.bf16 %v7603_v19, %v7602_v28  ;;  %v7421_v14 = vadd.f32 %v7360_v54, %v7309_v36  ;;  %v7051_v48 = vpop.f32.mrf.mxu1 }
 0x5c7   : > { %v7358_v52 = vrot.slane %v7051_v48, 1 }
 0x5c8   : > { %8665 = vst [vmem:[%s12560_s29 + $0x70] sm:$0xff] %v8622_v21   ;;  %v7533_v38 = vadd.f32 %v7472_v0, %v7421_v14 }
 0x5c9   : > { %v7359_v56 = vsel %vm1366_vm1, %v7357_v43, %v7358_v52 }
 0x5ca   : > { %v7422_v4 = vadd.f32 %v7359_v56, %v7310_v8  ;;  %v7572_v7 = vadd.f32 %v12545_v27, %v7533_v38 }
 0x5cc   : > { %v7534_v62 = vadd.f32 %v7471_v57, %v7422_v4  ;;  %v7604_v50 = vmax.f32 %v7572_v7, 0.0 }
 0x5ce   : > { %v7573_v33 = vadd.f32 %v12545_v27, %v7534_v62 }
 0x5d0   : > { %v7605_v35 = vmax.f32 %v7573_v33, 0.0 }
 0x5d2   : > { %v8627_v37 = vpack.c.bf16 %v7605_v35, %v7604_v50 }
 0x5d4   : > { %8666 = vst [vmem:[%s12560_s29 + $0x78] sm:$0xff] %v8627_v37  }
 0x5d5   : > { %9750 = shalt.err (!%p9747_p9)
}
 0x5d6   : > { %s9751_s6 = scalar_lea.hbm %s12782_s17, 2048  ;;  %s9755_s12 = scalar_lea.hbm %s12833_s5, 4096 }
 0x5d7   : > { %p9752_p13 = scmp.ne.s32.totalorder %s12782_s17, %s9751_s6  ;;  %p9756_p4 = scmp.lt.s32.totalorder %s12782_s17, %s12833_s5 }
 0x5d8   : > { %p9757_p8 = scmp.lt.s32.totalorder %s9755_s12, %s9751_s6 }
 0x5d9   : > { %p9753_p5 = pnand %p9752_p13, %p12976_p10 }
 0x5da   : > { %p9758_p3 = por %p9757_p8, %p9756_p4 }
 0x5db   : > { %p9754_p0 = pneg %p9753_p5 }
 0x5dd   : > { %p9759_p11 = pnand %p9758_p3, %p9754_p0 }
 0x5df   : > { %9762 = shalt.err (!%p9759_p11)
}
 0x5e0   : > { %s9816_s8 = smov 64   ;;  %s9817_s13 = smov 4  }
 0x5e1   : > { %9256 = dma.vmem_to_hbm [thread:$0]  (%p12976_p10), %s12784_s10, 2048, %s12782_s17, %s7767_s30, %s9816_s8, %s9816_s8, %s9817_s13  }
 0x5e2 PF: > { %s7795_s14 = sand.u32 1, %s9793_s18   ;;  %p12977_p1 = scmp.ne.s32.totalorder %s12854_s25, 0 }
 0x5e3   : > { %p12978_p2 = scmp.ge.s32.totalorder %s9805_s21, 2  ;;  %s7796_s7 = scalar_lea.sflag [#allocation5], %s7795_s14 }
 0x5e5   : > { %p9270_p6 = pnand %p12978_p2, %p12977_p1 }
 0x5e7   : > { %p9271_p12 = pneg %p9270_p6 }
 0x5e9   : > { %9788 = dma.done.wait (%p9271_p12), %s7796_s7, 2048  }
 0x5ea   : > { %9790 = vsyncadd (%p9271_p12), %s7796_s7, 4294965248  ;;  %p19_p7 = scmp.ge.s32.totalorder %s9920_s15, 4   ;;  %s12979_s18 = smov %s9797_s19 }
 0x5eb   : > { %s12980_s19 = smov %s9801_s20  ;;  %s12981_s20 = smov %s9936_s27 }
 0x5ec   : > { %s12982_s21 = smov %s9920_s15  ;;  %21 = sbr.rel (!%p19_p7) target bundleno = 6 (0x6), region = 98 }
 0x5f1   :  { %7801 = vsyncpa [#allocation4], 1 }
 0x5f2   :  { %7803 = vsyncpa [#allocation4 + $0x1], 1 }
 0x5f3   :  { %7804 = vsyncpa [#allocation7], 1 }
 0x5f4   :  { %7805 = vsyncpa [#allocation5], 1 }
 0x5f5   :  { %7807 = vsyncpa [#allocation5 + $0x1], 1 }

</bundles_post_ra>
